<compile_context>
chip_gen: v6e
topology: v6e:2x2x1
jax: 0.10.0
libtpu: 0.0.40
codegen_flags: <defaults>
</compile_context>

<pallas_src>
import math

import numpy as np
import jax
import jax.numpy as jnp
from jax.experimental import pallas as pl
from jax.experimental.pallas import tpu as pltpu


# ------------------------------- geometry ------------------------------------
def _geometry(in_ch, cfg, h, w):
    """Per-block static layout: padded spatial (zero halo of 1), guard rows so every
    3x3 tap offset stays in-bounds, and the tap->K-slab packing plan."""
    blocks = []
    cin = in_ch
    slab_off = 0
    for cout in cfg:
        assert h % 2 == 0 and w % 2 == 0, "spatial dims must stay even through the pools"
        cin_store = max(8, -(-cin // 8) * 8)          # lane width of the stored feature map
        assert cin_store <= 128 and cout <= 128
        tps = 128 // cin_store                        # taps packed per K-slab
        n_slabs = -(-9 // tps)
        hp, wp = h + 2, w + 2
        g = wp + 1                                    # guard rows (tap offsets in-bounds)
        m = hp * wp
        blocks.append(dict(H=h, W=w, Hp=hp, Wp=wp, G=g, M=m, rows=m + 2 * g,
                           cin=cin, cin_store=cin_store, cout=cout,
                           tps=tps, n_slabs=n_slabs, slab_off=slab_off,
                           Hn=h // 2, Wn=w // 2))
        slab_off += n_slabs
        h, w, cin = h // 2, w // 2, cout
    assert blocks[-1]["Hn"] >= 1, "input spatial too small for this VGG config"
    return blocks


# ----------------------- parameters (PyTorch-equivalent init) -----------------
def init_params(key, in_ch=3, cfg=(16, 32, 64), num_classes=10):
    """kaiming_normal_(fan_out, relu) convs, N(0, .01) linears, zero biases,
    BN gamma=1 / beta=0, eval running stats mean=0 / var=1."""
    p = {}
    ks = jax.random.split(key, len(cfg) + 2)
    c_prev = in_ch
    for i, c in enumerate(cfg):
        std = math.sqrt(2.0 / (c * 3 * 3))
        p[f"conv{i}_w"] = std * jax.random.normal(ks[i], (c, c_prev, 3, 3), jnp.float32)
        p[f"conv{i}_b"] = jnp.zeros((c,), jnp.float32)
        p[f"bn{i}_gamma"] = jnp.ones((c,), jnp.float32)
        p[f"bn{i}_beta"] = jnp.zeros((c,), jnp.float32)
        p[f"bn{i}_mean"] = jnp.zeros((c,), jnp.float32)
        p[f"bn{i}_var"] = jnp.ones((c,), jnp.float32)
        c_prev = c
    ff = cfg[-1]
    for j, (din, dout) in enumerate(((ff, ff // 2), (ff // 2, num_classes))):
        p[f"cls_bn{j}_gamma"] = jnp.ones((din,), jnp.float32)
        p[f"cls_bn{j}_beta"] = jnp.zeros((din,), jnp.float32)
        p[f"cls_bn{j}_mean"] = jnp.zeros((din,), jnp.float32)
        p[f"cls_bn{j}_var"] = jnp.ones((din,), jnp.float32)
        p[f"fc{j}_w"] = 0.01 * jax.random.normal(ks[len(cfg) + j], (dout, din), jnp.float32)
        p[f"fc{j}_b"] = jnp.zeros((dout,), jnp.float32)
    return p


def prepare_params(params, *, in_ch, cfg, num_classes, blocks):
    """Host-side, one-time packing: fold eval-mode BatchNorm into the adjacent
    conv/linear weights and pack the 9 conv taps into K-slabs of 128 lanes."""
    eps = 1e-5
    nb = len(cfg)
    total_slabs = blocks[-1]["slab_off"] + blocks[-1]["n_slabs"]

    cw = np.zeros((total_slabs, 128, 128), np.float32)   # (slab, K, Cout)
    cb = np.zeros((nb, 1, 128), np.float32)
    for k, blk in enumerate(blocks):
        cin, cs, cout = blk["cin"], blk["cin_store"], blk["cout"]
        tps, base = blk["tps"], blk["slab_off"]
        w = np.asarray(params[f"conv{k}_w"], np.float32)            # (Cout, Cin, 3, 3)
        b = np.asarray(params[f"conv{k}_b"], np.float32)
        s = np.asarray(params[f"bn{k}_gamma"]) / np.sqrt(np.asarray(params[f"bn{k}_var"]) + eps)
        wf = w * s[:, None, None, None]
        bfold = np.asarray(params[f"bn{k}_beta"]) + (b - np.asarray(params[f"bn{k}_mean"])) * s
        for t in range(9):
            di, dj = divmod(t, 3)
            sidx, tl = base + t // tps, t % tps
            cw[sidx, tl * cs: tl * cs + cin, :cout] = wf[:, :, di, dj].T   # (Cin, Cout)
        cb[k, 0, :cout] = bfold

    ff, ff2 = cfg[-1], cfg[-1] // 2
    fw = np.zeros((2, 128, 128), np.float32)
    fb = np.zeros((2, 1, 128), np.float32)
    for j, (din, dout) in enumerate(((ff, ff2), (ff2, num_classes))):
        W = np.asarray(params[f"fc{j}_w"], np.float32)              # torch layout (out, in)
        bb = np.asarray(params[f"fc{j}_b"], np.float32)
        s = np.asarray(params[f"cls_bn{j}_gamma"]) / np.sqrt(
            np.asarray(params[f"cls_bn{j}_var"]) + eps)
        t = np.asarray(params[f"cls_bn{j}_beta"]) - np.asarray(params[f"cls_bn{j}_mean"]) * s
        fw[j, :din, :dout] = (W * s[None, :]).T                     # fold BN1d scale
        fb[j, 0, :dout] = bb + W @ t                                # fold BN1d shift

    return dict(cw=jnp.asarray(cw, jnp.bfloat16), cb=jnp.asarray(cb, jnp.float32),
                fw=jnp.asarray(fw, jnp.bfloat16), fb=jnp.asarray(fb, jnp.float32))


# --------------------------- fused Pallas kernel ------------------------------
def build_vgg_forward(*, batch, in_ch, height, width, cfg, num_classes):
    nb = len(cfg)
    assert num_classes <= 128
    blocks = _geometry(in_ch, cfg, height, width)
    total_slabs = blocks[-1]["slab_off"] + blocks[-1]["n_slabs"]
    ff, ff2 = cfg[-1], cfg[-1] // 2
    HW = height * width
    cin0_store = blocks[0]["cin_store"]

    def kernel(x_ref, cw_ref, cb_ref, fw_ref, fb_ref, o_ref, *scratch):
        fmaps = scratch[:nb]        # zero-halo + guard feature maps, native channel width
        cbufs = scratch[nb:]        # conv+ReLU outputs, native Cout width

        # ---- build block-0 input layout in VMEM (zero halo + guards) ----
        b0 = blocks[0]
        fmaps[0][...] = jnp.zeros_like(fmaps[0])
        for i in range(b0["H"]):
            dst = b0["G"] + (i + 1) * b0["Wp"] + 1
            fmaps[0][dst:dst + b0["W"], :] = (
                x_ref[0, i * b0["W"]:(i + 1) * b0["W"], :].astype(jnp.float32))

        gap = None
        for k, blk in enumerate(blocks):
            G, Wp, M = blk["G"], blk["Wp"], blk["M"]
            cs, cout, tps = blk["cin_store"], blk["cout"], blk["tps"]

            # conv3x3(pad=1) + folded BN + ReLU: taps packed into the contraction dim,
            # 1-3 bf16 MXU matmuls with f32 accumulation.
            taps = []
            for t in range(9):
                di, dj = divmod(t, 3)
                off = G + (di - 1) * Wp + (dj - 1)
                taps.append(fmaps[k][off:off + M, :].astype(jnp.bfloat16))
            acc = None
            for s in range(blk["n_slabs"]):
                grp = taps[s * tps:(s + 1) * tps]
                slab = grp[0] if len(grp) == 1 else jnp.concatenate(grp, axis=1)
                kk = len(grp) * cs
                part = jnp.dot(slab, cw_ref[blk["slab_off"] + s, :kk, :],
                               preferred_element_type=jnp.float32)
                acc = part if acc is None else acc + part
            conv = jnp.maximum(acc + cb_ref[k], 0.0)           # (M, 128) f32
            cbufs[k][...] = conv[:, :cout]

            # MaxPool2d(2,2) via strided row gathers; rebuild next zero-halo layout
            # (or fuse with AdaptiveAvgPool2d(1) on the last block).
            Hn, Wn = blk["Hn"], blk["Wn"]
            if k < nb - 1:
                nxt = blocks[k + 1]
                fmaps[k + 1][...] = jnp.zeros_like(fmaps[k + 1])   # halo + guards = 0
            else:
                gap = jnp.zeros((1, cout), jnp.float32)
            for oi in range(Hn):
                base = (1 + 2 * oi) * Wp + 1
                a = cbufs[k][pl.ds(base,          Wn, stride=2), :]
                b = cbufs[k][pl.ds(base + 1,      Wn, stride=2), :]
                c = cbufs[k][pl.ds(base + Wp,     Wn, stride=2), :]
                d = cbufs[k][pl.ds(base + Wp + 1, Wn, stride=2), :]
                pooled = jnp.maximum(jnp.maximum(a, b), jnp.maximum(c, d))   # (Wn, cout)
                if k < nb - 1:
                    q = nxt["G"] + (oi + 1) * nxt["Wp"] + 1
                    fmaps[k + 1][q:q + Wn, :] = pooled
                else:
                    gap = gap + jnp.sum(pooled, axis=0, keepdims=True)
            if k == nb - 1:
                gap = gap * (1.0 / (Hn * Wn))                  # (1, cfg[-1]) f32

        # classifier (eval): BN1d folded into the Linears, Dropout = identity.
        h = jnp.dot(gap.astype(jnp.bfloat16), fw_ref[0, :ff, :],
                    preferred_element_type=jnp.float32) + fb_ref[0]
        h = jnp.maximum(h, 0.0)
        logits = jnp.dot(h[:, :ff2].astype(jnp.bfloat16), fw_ref[1, :ff2, :],
                         preferred_element_type=jnp.float32) + fb_ref[1]
        o_ref[0] = logits                                      # (1, 128) lane-dense store

    grid_spec = pltpu.PrefetchScalarGridSpec(
        num_scalar_prefetch=0,
        grid=(batch,),
        in_specs=[
            pl.BlockSpec((1, HW, cin0_store), lambda b: (b, 0, 0)),        # compact input
            pl.BlockSpec((total_slabs, 128, 128), lambda b: (0, 0, 0)),    # conv K-slabs
            pl.BlockSpec((nb, 1, 128), lambda b: (0, 0, 0)),               # conv biases
            pl.BlockSpec((2, 128, 128), lambda b: (0, 0, 0)),              # fc weights
            pl.BlockSpec((2, 1, 128), lambda b: (0, 0, 0)),                # fc biases
        ],
        out_specs=pl.BlockSpec((1, 1, 128), lambda b: (b, 0, 0)),
        scratch_shapes=(
            [pltpu.VMEM((blk["rows"], blk["cin_store"]), jnp.float32) for blk in blocks]
            + [pltpu.VMEM((blk["M"], blk["cout"]), jnp.float32) for blk in blocks]),
    )

    # VMEM limit derived from the device (keeps one code path valid on v5e/v6e/v7x).
    try:
        vmem_cap = int(pltpu.get_tpu_info().vmem_capacity_bytes)
    except Exception:
        vmem_cap = 64 * 1024 * 1024
    vmem_limit = min(32 * 1024 * 1024, vmem_cap // 2)

    flops = 0
    for blk in blocks:
        flops += 2 * batch * blk["M"] * (9 * blk["cin_store"]) * 128
    flops += 2 * batch * (ff * 128 + ff2 * 128)
    bytes_accessed = (batch * HW * cin0_store * 2 + total_slabs * 128 * 128 * 2
                      + nb * 128 * 4 + 2 * 128 * 128 * 2 + 2 * 128 * 4
                      + batch * 128 * 4)
    cost = pl.CostEstimate(flops=int(flops), transcendentals=0,
                           bytes_accessed=int(bytes_accessed))

    fused = pl.pallas_call(
        kernel,
        out_shape=jax.ShapeDtypeStruct((batch, 1, 128), jnp.float32),
        grid_spec=grid_spec,
        compiler_params=pltpu.CompilerParams(
            dimension_semantics=("parallel",),
            vmem_limit_bytes=vmem_limit),
        cost_estimate=cost,
    )

    def forward(x, prepped):
        # tiny per-call layout prep: NCHW -> (B, H*W, in_ch) -> pad channels to 8, bf16.
        xh = jnp.transpose(x, (0, 2, 3, 1)).reshape(batch, HW, in_ch)
        xh = jnp.pad(xh, ((0, 0), (0, 0), (0, cin0_store - in_ch))).astype(jnp.bfloat16)
        out = fused(xh, prepped["cw"], prepped["cb"], prepped["fw"], prepped["fb"])
        return out[:, 0, :num_classes]          # drop the lane padding of the logits

    return jax.jit(forward), blocks


# ----------------------------------- main -------------------------------------
if __name__ == "__main__":
    BATCH, IN_CH, H, W = 2, 3, 16, 16
    CFG = (16, 32, 64)                 # small VGG-style features; final_filter = CFG[-1]
    NUM_CLASSES = 10

    forward, blocks = build_vgg_forward(batch=BATCH, in_ch=IN_CH, height=H, width=W,
                                        cfg=CFG, num_classes=NUM_CLASSES)
    kparam, kx = jax.random.split(jax.random.PRNGKey(0))
    params = init_params(kparam, in_ch=IN_CH, cfg=CFG, num_classes=NUM_CLASSES)
    prepped = prepare_params(params, in_ch=IN_CH, cfg=CFG, num_classes=NUM_CLASSES,
                             blocks=blocks)

    x = jax.random.normal(kx, (BATCH, IN_CH, H, W), jnp.float32)
    out = forward(x, prepped)
    jax.block_until_ready(out)
    assert out.shape == (BATCH, NUM_CLASSES), out.shape
    assert bool(jnp.all(jnp.isfinite(out)))
    print("KERNEL_OK")
</pallas_src>

<mosaic_0001>
module attributes {stable_mosaic.version = 11 : i64} {
  func.func @kernel(%arg0: i32, %arg1: memref<1x256x8xbf16, #tpu.memory_space<vmem>>, %arg2: memref<6x128x128xbf16, #tpu.memory_space<vmem>>, %arg3: memref<3x1x128xf32, #tpu.memory_space<vmem>>, %arg4: memref<2x128x128xbf16, #tpu.memory_space<vmem>>, %arg5: memref<2x1x128xf32, #tpu.memory_space<vmem>>, %arg6: memref<1x1x128xf32, #tpu.memory_space<vmem>>, %arg7: memref<362x8xf32, #tpu.memory_space<vmem>>, %arg8: memref<122x16xf32, #tpu.memory_space<vmem>>, %arg9: memref<50x32xf32, #tpu.memory_space<vmem>>, %arg10: memref<324x16xf32, #tpu.memory_space<vmem>>, %arg11: memref<100x32xf32, #tpu.memory_space<vmem>>, %arg12: memref<36x64xf32, #tpu.memory_space<vmem>>) attributes {dimension_semantics = [#tpu.dimension_semantics<parallel>], iteration_bounds = array<i64: 2>, scalar_prefetch = 0 : i64, scratch_operands = 6 : i64, tpu.core_type = #tpu.core_type<tc>, window_params = [{transform_indices = @transform_0, window_bounds = array<i64: 1, 256, 8>}, {pipeline_mode = #tpu.pipeline_mode<synchronous>, transform_indices = @transform_1, window_bounds = array<i64: 6, 128, 128>}, {pipeline_mode = #tpu.pipeline_mode<synchronous>, transform_indices = @transform_2, window_bounds = array<i64: 3, 1, 128>}, {pipeline_mode = #tpu.pipeline_mode<synchronous>, transform_indices = @transform_3, window_bounds = array<i64: 2, 128, 128>}, {pipeline_mode = #tpu.pipeline_mode<synchronous>, transform_indices = @transform_4, window_bounds = array<i64: 2, 1, 128>}, {transform_indices = @transform_5, window_bounds = array<i64: 1, 1, 128>}]} {
    %cst = arith.constant 0.000000e+00 : f32
    %0 = vector.broadcast %cst : f32 to vector<362x8xf32>
    %c0 = arith.constant 0 : index
    %c0_0 = arith.constant 0 : index
    %1 = vector.load %arg7[%c0, %c0_0] : memref<362x8xf32, #tpu.memory_space<vmem>>, vector<362x8xf32>
    tpu.vector_store %arg7[%c0, %c0_0], %0 {strides = array<i32>} : memref<362x8xf32, #tpu.memory_space<vmem>>, vector<362x8xf32>,
    %c0_1 = arith.constant 0 : index
    %c0_2 = arith.constant 0 : index
    %c0_3 = arith.constant 0 : index
    %2 = vector.load %arg1[%c0_1, %c0_2, %c0_3] : memref<1x256x8xbf16, #tpu.memory_space<vmem>>, vector<1x16x8xbf16>
    %3 = vector.shape_cast %2 : vector<1x16x8xbf16> to vector<16x8xbf16>
    %4 = arith.extf %3 : vector<16x8xbf16> to vector<16x8xf32>
    %c38 = arith.constant 38 : index
    %c0_4 = arith.constant 0 : index
    %5 = vector.load %arg7[%c38, %c0_4] : memref<362x8xf32, #tpu.memory_space<vmem>>, vector<16x8xf32>
    tpu.vector_store %arg7[%c38, %c0_4], %4 {strides = array<i32>} : memref<362x8xf32, #tpu.memory_space<vmem>>, vector<16x8xf32>,
    %c0_5 = arith.constant 0 : index
    %c16 = arith.constant 16 : index
    %c0_6 = arith.constant 0 : index
    %6 = vector.load %arg1[%c0_5, %c16, %c0_6] : memref<1x256x8xbf16, #tpu.memory_space<vmem>>, vector<1x16x8xbf16>
    %7 = vector.shape_cast %6 : vector<1x16x8xbf16> to vector<16x8xbf16>
    %8 = arith.extf %7 : vector<16x8xbf16> to vector<16x8xf32>
    %c56 = arith.constant 56 : index
    %c0_7 = arith.constant 0 : index
    %9 = vector.load %arg7[%c56, %c0_7] : memref<362x8xf32, #tpu.memory_space<vmem>>, vector<16x8xf32>
    tpu.vector_store %arg7[%c56, %c0_7], %8 {strides = array<i32>} : memref<362x8xf32, #tpu.memory_space<vmem>>, vector<16x8xf32>,
    %c0_8 = arith.constant 0 : index
    %c32 = arith.constant 32 : index
    %c0_9 = arith.constant 0 : index
    %10 = vector.load %arg1[%c0_8, %c32, %c0_9] : memref<1x256x8xbf16, #tpu.memory_space<vmem>>, vector<1x16x8xbf16>
    %11 = vector.shape_cast %10 : vector<1x16x8xbf16> to vector<16x8xbf16>
    %12 = arith.extf %11 : vector<16x8xbf16> to vector<16x8xf32>
    %c74 = arith.constant 74 : index
    %c0_10 = arith.constant 0 : index
    %13 = vector.load %arg7[%c74, %c0_10] : memref<362x8xf32, #tpu.memory_space<vmem>>, vector<16x8xf32>
    tpu.vector_store %arg7[%c74, %c0_10], %12 {strides = array<i32>} : memref<362x8xf32, #tpu.memory_space<vmem>>, vector<16x8xf32>,
    %c0_11 = arith.constant 0 : index
    %c48 = arith.constant 48 : index
    %c0_12 = arith.constant 0 : index
    %14 = vector.load %arg1[%c0_11, %c48, %c0_12] : memref<1x256x8xbf16, #tpu.memory_space<vmem>>, vector<1x16x8xbf16>
    %15 = vector.shape_cast %14 : vector<1x16x8xbf16> to vector<16x8xbf16>
    %16 = arith.extf %15 : vector<16x8xbf16> to vector<16x8xf32>
    %c92 = arith.constant 92 : index
    %c0_13 = arith.constant 0 : index
    %17 = vector.load %arg7[%c92, %c0_13] : memref<362x8xf32, #tpu.memory_space<vmem>>, vector<16x8xf32>
    tpu.vector_store %arg7[%c92, %c0_13], %16 {strides = array<i32>} : memref<362x8xf32, #tpu.memory_space<vmem>>, vector<16x8xf32>,
    %c0_14 = arith.constant 0 : index
    %c64 = arith.constant 64 : index
    %c0_15 = arith.constant 0 : index
    %18 = vector.load %arg1[%c0_14, %c64, %c0_15] : memref<1x256x8xbf16, #tpu.memory_space<vmem>>, vector<1x16x8xbf16>
    %19 = vector.shape_cast %18 : vector<1x16x8xbf16> to vector<16x8xbf16>
    %20 = arith.extf %19 : vector<16x8xbf16> to vector<16x8xf32>
    %c110 = arith.constant 110 : index
    %c0_16 = arith.constant 0 : index
    %21 = vector.load %arg7[%c110, %c0_16] : memref<362x8xf32, #tpu.memory_space<vmem>>, vector<16x8xf32>
    tpu.vector_store %arg7[%c110, %c0_16], %20 {strides = array<i32>} : memref<362x8xf32, #tpu.memory_space<vmem>>, vector<16x8xf32>,
    %c0_17 = arith.constant 0 : index
    %c80 = arith.constant 80 : index
    %c0_18 = arith.constant 0 : index
    %22 = vector.load %arg1[%c0_17, %c80, %c0_18] : memref<1x256x8xbf16, #tpu.memory_space<vmem>>, vector<1x16x8xbf16>
    %23 = vector.shape_cast %22 : vector<1x16x8xbf16> to vector<16x8xbf16>
    %24 = arith.extf %23 : vector<16x8xbf16> to vector<16x8xf32>
    %c128 = arith.constant 128 : index
    %c0_19 = arith.constant 0 : index
    %25 = vector.load %arg7[%c128, %c0_19] : memref<362x8xf32, #tpu.memory_space<vmem>>, vector<16x8xf32>
    tpu.vector_store %arg7[%c128, %c0_19], %24 {strides = array<i32>} : memref<362x8xf32, #tpu.memory_space<vmem>>, vector<16x8xf32>,
    %c0_20 = arith.constant 0 : index
    %c96 = arith.constant 96 : index
    %c0_21 = arith.constant 0 : index
    %26 = vector.load %arg1[%c0_20, %c96, %c0_21] : memref<1x256x8xbf16, #tpu.memory_space<vmem>>, vector<1x16x8xbf16>
    %27 = vector.shape_cast %26 : vector<1x16x8xbf16> to vector<16x8xbf16>
    %28 = arith.extf %27 : vector<16x8xbf16> to vector<16x8xf32>
    %c146 = arith.constant 146 : index
    %c0_22 = arith.constant 0 : index
    %29 = vector.load %arg7[%c146, %c0_22] : memref<362x8xf32, #tpu.memory_space<vmem>>, vector<16x8xf32>
    tpu.vector_store %arg7[%c146, %c0_22], %28 {strides = array<i32>} : memref<362x8xf32, #tpu.memory_space<vmem>>, vector<16x8xf32>,
    %c0_23 = arith.constant 0 : index
    %c112 = arith.constant 112 : index
    %c0_24 = arith.constant 0 : index
    %30 = vector.load %arg1[%c0_23, %c112, %c0_24] : memref<1x256x8xbf16, #tpu.memory_space<vmem>>, vector<1x16x8xbf16>
    %31 = vector.shape_cast %30 : vector<1x16x8xbf16> to vector<16x8xbf16>
    %32 = arith.extf %31 : vector<16x8xbf16> to vector<16x8xf32>
    %c164 = arith.constant 164 : index
    %c0_25 = arith.constant 0 : index
    %33 = vector.load %arg7[%c164, %c0_25] : memref<362x8xf32, #tpu.memory_space<vmem>>, vector<16x8xf32>
    tpu.vector_store %arg7[%c164, %c0_25], %32 {strides = array<i32>} : memref<362x8xf32, #tpu.memory_space<vmem>>, vector<16x8xf32>,
    %c0_26 = arith.constant 0 : index
    %c128_27 = arith.constant 128 : index
    %c0_28 = arith.constant 0 : index
    %34 = vector.load %arg1[%c0_26, %c128_27, %c0_28] : memref<1x256x8xbf16, #tpu.memory_space<vmem>>, vector<1x16x8xbf16>
    %35 = vector.shape_cast %34 : vector<1x16x8xbf16> to vector<16x8xbf16>
    %36 = arith.extf %35 : vector<16x8xbf16> to vector<16x8xf32>
    %c182 = arith.constant 182 : index
    %c0_29 = arith.constant 0 : index
    %37 = vector.load %arg7[%c182, %c0_29] : memref<362x8xf32, #tpu.memory_space<vmem>>, vector<16x8xf32>
    tpu.vector_store %arg7[%c182, %c0_29], %36 {strides = array<i32>} : memref<362x8xf32, #tpu.memory_space<vmem>>, vector<16x8xf32>,
    %c0_30 = arith.constant 0 : index
    %c144 = arith.constant 144 : index
    %c0_31 = arith.constant 0 : index
    %38 = vector.load %arg1[%c0_30, %c144, %c0_31] : memref<1x256x8xbf16, #tpu.memory_space<vmem>>, vector<1x16x8xbf16>
    %39 = vector.shape_cast %38 : vector<1x16x8xbf16> to vector<16x8xbf16>
    %40 = arith.extf %39 : vector<16x8xbf16> to vector<16x8xf32>
    %c200 = arith.constant 200 : index
    %c0_32 = arith.constant 0 : index
    %41 = vector.load %arg7[%c200, %c0_32] : memref<362x8xf32, #tpu.memory_space<vmem>>, vector<16x8xf32>
    tpu.vector_store %arg7[%c200, %c0_32], %40 {strides = array<i32>} : memref<362x8xf32, #tpu.memory_space<vmem>>, vector<16x8xf32>,
    %c0_33 = arith.constant 0 : index
    %c160 = arith.constant 160 : index
    %c0_34 = arith.constant 0 : index
    %42 = vector.load %arg1[%c0_33, %c160, %c0_34] : memref<1x256x8xbf16, #tpu.memory_space<vmem>>, vector<1x16x8xbf16>
    %43 = vector.shape_cast %42 : vector<1x16x8xbf16> to vector<16x8xbf16>
    %44 = arith.extf %43 : vector<16x8xbf16> to vector<16x8xf32>
    %c218 = arith.constant 218 : index
    %c0_35 = arith.constant 0 : index
    %45 = vector.load %arg7[%c218, %c0_35] : memref<362x8xf32, #tpu.memory_space<vmem>>, vector<16x8xf32>
    tpu.vector_store %arg7[%c218, %c0_35], %44 {strides = array<i32>} : memref<362x8xf32, #tpu.memory_space<vmem>>, vector<16x8xf32>,
    %c0_36 = arith.constant 0 : index
    %c176 = arith.constant 176 : index
    %c0_37 = arith.constant 0 : index
    %46 = vector.load %arg1[%c0_36, %c176, %c0_37] : memref<1x256x8xbf16, #tpu.memory_space<vmem>>, vector<1x16x8xbf16>
    %47 = vector.shape_cast %46 : vector<1x16x8xbf16> to vector<16x8xbf16>
    %48 = arith.extf %47 : vector<16x8xbf16> to vector<16x8xf32>
    %c236 = arith.constant 236 : index
    %c0_38 = arith.constant 0 : index
    %49 = vector.load %arg7[%c236, %c0_38] : memref<362x8xf32, #tpu.memory_space<vmem>>, vector<16x8xf32>
    tpu.vector_store %arg7[%c236, %c0_38], %48 {strides = array<i32>} : memref<362x8xf32, #tpu.memory_space<vmem>>, vector<16x8xf32>,
    %c0_39 = arith.constant 0 : index
    %c192 = arith.constant 192 : index
    %c0_40 = arith.constant 0 : index
    %50 = vector.load %arg1[%c0_39, %c192, %c0_40] : memref<1x256x8xbf16, #tpu.memory_space<vmem>>, vector<1x16x8xbf16>
    %51 = vector.shape_cast %50 : vector<1x16x8xbf16> to vector<16x8xbf16>
    %52 = arith.extf %51 : vector<16x8xbf16> to vector<16x8xf32>
    %c254 = arith.constant 254 : index
    %c0_41 = arith.constant 0 : index
    %53 = vector.load %arg7[%c254, %c0_41] : memref<362x8xf32, #tpu.memory_space<vmem>>, vector<16x8xf32>
    tpu.vector_store %arg7[%c254, %c0_41], %52 {strides = array<i32>} : memref<362x8xf32, #tpu.memory_space<vmem>>, vector<16x8xf32>,
    %c0_42 = arith.constant 0 : index
    %c208 = arith.constant 208 : index
    %c0_43 = arith.constant 0 : index
    %54 = vector.load %arg1[%c0_42, %c208, %c0_43] : memref<1x256x8xbf16, #tpu.memory_space<vmem>>, vector<1x16x8xbf16>
    %55 = vector.shape_cast %54 : vector<1x16x8xbf16> to vector<16x8xbf16>
    %56 = arith.extf %55 : vector<16x8xbf16> to vector<16x8xf32>
    %c272 = arith.constant 272 : index
    %c0_44 = arith.constant 0 : index
    %57 = vector.load %arg7[%c272, %c0_44] : memref<362x8xf32, #tpu.memory_space<vmem>>, vector<16x8xf32>
    tpu.vector_store %arg7[%c272, %c0_44], %56 {strides = array<i32>} : memref<362x8xf32, #tpu.memory_space<vmem>>, vector<16x8xf32>,
    %c0_45 = arith.constant 0 : index
    %c224 = arith.constant 224 : index
    %c0_46 = arith.constant 0 : index
    %58 = vector.load %arg1[%c0_45, %c224, %c0_46] : memref<1x256x8xbf16, #tpu.memory_space<vmem>>, vector<1x16x8xbf16>
    %59 = vector.shape_cast %58 : vector<1x16x8xbf16> to vector<16x8xbf16>
    %60 = arith.extf %59 : vector<16x8xbf16> to vector<16x8xf32>
    %c290 = arith.constant 290 : index
    %c0_47 = arith.constant 0 : index
    %61 = vector.load %arg7[%c290, %c0_47] : memref<362x8xf32, #tpu.memory_space<vmem>>, vector<16x8xf32>
    tpu.vector_store %arg7[%c290, %c0_47], %60 {strides = array<i32>} : memref<362x8xf32, #tpu.memory_space<vmem>>, vector<16x8xf32>,
    %c0_48 = arith.constant 0 : index
    %c240 = arith.constant 240 : index
    %c0_49 = arith.constant 0 : index
    %62 = vector.load %arg1[%c0_48, %c240, %c0_49] : memref<1x256x8xbf16, #tpu.memory_space<vmem>>, vector<1x16x8xbf16>
    %63 = vector.shape_cast %62 : vector<1x16x8xbf16> to vector<16x8xbf16>
    %64 = arith.extf %63 : vector<16x8xbf16> to vector<16x8xf32>
    %c308 = arith.constant 308 : index
    %c0_50 = arith.constant 0 : index
    %65 = vector.load %arg7[%c308, %c0_50] : memref<362x8xf32, #tpu.memory_space<vmem>>, vector<16x8xf32>
    tpu.vector_store %arg7[%c308, %c0_50], %64 {strides = array<i32>} : memref<362x8xf32, #tpu.memory_space<vmem>>, vector<16x8xf32>,
    %c0_51 = arith.constant 0 : index
    %c0_52 = arith.constant 0 : index
    %66 = vector.load %arg7[%c0_51, %c0_52] : memref<362x8xf32, #tpu.memory_space<vmem>>, vector<324x8xf32>
    %67 = arith.truncf %66 : vector<324x8xf32> to vector<324x8xbf16>
    %c1 = arith.constant 1 : index
    %c0_53 = arith.constant 0 : index
    %68 = vector.load %arg7[%c1, %c0_53] : memref<362x8xf32, #tpu.memory_space<vmem>>, vector<324x8xf32>
    %69 = arith.truncf %68 : vector<324x8xf32> to vector<324x8xbf16>
    %c2 = arith.constant 2 : index
    %c0_54 = arith.constant 0 : index
    %70 = vector.load %arg7[%c2, %c0_54] : memref<362x8xf32, #tpu.memory_space<vmem>>, vector<324x8xf32>
    %71 = arith.truncf %70 : vector<324x8xf32> to vector<324x8xbf16>
    %c18 = arith.constant 18 : index
    %c0_55 = arith.constant 0 : index
    %72 = vector.load %arg7[%c18, %c0_55] : memref<362x8xf32, #tpu.memory_space<vmem>>, vector<324x8xf32>
    %73 = arith.truncf %72 : vector<324x8xf32> to vector<324x8xbf16>
    %c19 = arith.constant 19 : index
    %c0_56 = arith.constant 0 : index
    %74 = vector.load %arg7[%c19, %c0_56] : memref<362x8xf32, #tpu.memory_space<vmem>>, vector<324x8xf32>
    %75 = arith.truncf %74 : vector<324x8xf32> to vector<324x8xbf16>
    %c20 = arith.constant 20 : index
    %c0_57 = arith.constant 0 : index
    %76 = vector.load %arg7[%c20, %c0_57] : memref<362x8xf32, #tpu.memory_space<vmem>>, vector<324x8xf32>
    %77 = arith.truncf %76 : vector<324x8xf32> to vector<324x8xbf16>
    %c36 = arith.constant 36 : index
    %c0_58 = arith.constant 0 : index
    %78 = vector.load %arg7[%c36, %c0_58] : memref<362x8xf32, #tpu.memory_space<vmem>>, vector<324x8xf32>
    %79 = arith.truncf %78 : vector<324x8xf32> to vector<324x8xbf16>
    %c37 = arith.constant 37 : index
    %c0_59 = arith.constant 0 : index
    %80 = vector.load %arg7[%c37, %c0_59] : memref<362x8xf32, #tpu.memory_space<vmem>>, vector<324x8xf32>
    %81 = arith.truncf %80 : vector<324x8xf32> to vector<324x8xbf16>
    %c38_60 = arith.constant 38 : index
    %c0_61 = arith.constant 0 : index
    %82 = vector.load %arg7[%c38_60, %c0_61] : memref<362x8xf32, #tpu.memory_space<vmem>>, vector<324x8xf32>
    %83 = arith.truncf %82 : vector<324x8xf32> to vector<324x8xbf16>
    %84 = tpu.concatenate %67, %69, %71, %73, %75, %77, %79, %81, %83 in 1 : vector<324x8xbf16>, vector<324x8xbf16>, vector<324x8xbf16>, vector<324x8xbf16>, vector<324x8xbf16>, vector<324x8xbf16>, vector<324x8xbf16>, vector<324x8xbf16>, vector<324x8xbf16> -> vector<324x72xbf16>
    %c0_62 = arith.constant 0 : index
    %c0_63 = arith.constant 0 : index
    %c0_64 = arith.constant 0 : index
    %85 = vector.load %arg2[%c0_62, %c0_63, %c0_64] : memref<6x128x128xbf16, #tpu.memory_space<vmem>>, vector<1x72x128xbf16>
    %86 = vector.shape_cast %85 : vector<1x72x128xbf16> to vector<72x128xbf16>
    %cst_65 = arith.constant dense<0.000000e+00> : vector<324x128xf32>
    %87 = tpu.matmul %84, %86, %cst_65 {dimension_numbers = #tpu.dot_dimension_numbers<[1], [0], [0], [1], [0, 0, 1, 1], [], []>} : vector<324x72xbf16>, vector<72x128xbf16>, vector<324x128xf32> -> vector<324x128xf32>
    %c0_66 = arith.constant 0 : index
    %c0_67 = arith.constant 0 : index
    %c0_68 = arith.constant 0 : index
    %88 = vector.load %arg3[%c0_66, %c0_67, %c0_68] : memref<3x1x128xf32, #tpu.memory_space<vmem>>, vector<1x1x128xf32>
    %89 = vector.shape_cast %88 : vector<1x1x128xf32> to vector<1x128xf32>
    %90 = vector.broadcast %89 : vector<1x128xf32> to vector<324x128xf32>
    %91 = arith.addf %87, %90 : vector<324x128xf32>
    %cst_69 = arith.constant 0.000000e+00 : f32
    %92 = vector.broadcast %cst_69 : f32 to vector<324x128xf32>
    %93 = arith.maximumf %91, %92 : vector<324x128xf32>
    %94 = vector.extract_strided_slice %93 {offsets = [0, 0], sizes = [324, 16], strides = [1, 1]} : vector<324x128xf32> to vector<324x16xf32>
    %c0_70 = arith.constant 0 : index
    %c0_71 = arith.constant 0 : index
    %95 = vector.load %arg10[%c0_70, %c0_71] : memref<324x16xf32, #tpu.memory_space<vmem>>, vector<324x16xf32>
    tpu.vector_store %arg10[%c0_70, %c0_71], %94 {strides = array<i32>} : memref<324x16xf32, #tpu.memory_space<vmem>>, vector<324x16xf32>,
    %cst_72 = arith.constant 0.000000e+00 : f32
    %96 = vector.broadcast %cst_72 : f32 to vector<122x16xf32>
    %c0_73 = arith.constant 0 : index
    %c0_74 = arith.constant 0 : index
    %97 = vector.load %arg8[%c0_73, %c0_74] : memref<122x16xf32, #tpu.memory_space<vmem>>, vector<122x16xf32>
    tpu.vector_store %arg8[%c0_73, %c0_74], %96 {strides = array<i32>} : memref<122x16xf32, #tpu.memory_space<vmem>>, vector<122x16xf32>,
    %c19_75 = arith.constant 19 : index
    %c0_76 = arith.constant 0 : index
    %98 = tpu.strided_load %arg10[%c19_75, %c0_76] {strides = array<i32: 2, 1>} : memref<324x16xf32, #tpu.memory_space<vmem>>, vector<8x16xf32>
    %c20_77 = arith.constant 20 : index
    %c0_78 = arith.constant 0 : index
    %99 = tpu.strided_load %arg10[%c20_77, %c0_78] {strides = array<i32: 2, 1>} : memref<324x16xf32, #tpu.memory_space<vmem>>, vector<8x16xf32>
    %c37_79 = arith.constant 37 : index
    %c0_80 = arith.constant 0 : index
    %100 = tpu.strided_load %arg10[%c37_79, %c0_80] {strides = array<i32: 2, 1>} : memref<324x16xf32, #tpu.memory_space<vmem>>, vector<8x16xf32>
    %c38_81 = arith.constant 38 : index
    %c0_82 = arith.constant 0 : index
    %101 = tpu.strided_load %arg10[%c38_81, %c0_82] {strides = array<i32: 2, 1>} : memref<324x16xf32, #tpu.memory_space<vmem>>, vector<8x16xf32>
    %102 = arith.maximumf %98, %99 : vector<8x16xf32>
    %103 = arith.maximumf %100, %101 : vector<8x16xf32>
    %104 = arith.maximumf %102, %103 : vector<8x16xf32>
    %c22 = arith.constant 22 : index
    %c0_83 = arith.constant 0 : index
    %105 = vector.load %arg8[%c22, %c0_83] : memref<122x16xf32, #tpu.memory_space<vmem>>, vector<8x16xf32>
    tpu.vector_store %arg8[%c22, %c0_83], %104 {strides = array<i32>} : memref<122x16xf32, #tpu.memory_space<vmem>>, vector<8x16xf32>,
    %c55 = arith.constant 55 : index
    %c0_84 = arith.constant 0 : index
    %106 = tpu.strided_load %arg10[%c55, %c0_84] {strides = array<i32: 2, 1>} : memref<324x16xf32, #tpu.memory_space<vmem>>, vector<8x16xf32>
    %c56_85 = arith.constant 56 : index
    %c0_86 = arith.constant 0 : index
    %107 = tpu.strided_load %arg10[%c56_85, %c0_86] {strides = array<i32: 2, 1>} : memref<324x16xf32, #tpu.memory_space<vmem>>, vector<8x16xf32>
    %c73 = arith.constant 73 : index
    %c0_87 = arith.constant 0 : index
    %108 = tpu.strided_load %arg10[%c73, %c0_87] {strides = array<i32: 2, 1>} : memref<324x16xf32, #tpu.memory_space<vmem>>, vector<8x16xf32>
    %c74_88 = arith.constant 74 : index
    %c0_89 = arith.constant 0 : index
    %109 = tpu.strided_load %arg10[%c74_88, %c0_89] {strides = array<i32: 2, 1>} : memref<324x16xf32, #tpu.memory_space<vmem>>, vector<8x16xf32>
    %110 = arith.maximumf %106, %107 : vector<8x16xf32>
    %111 = arith.maximumf %108, %109 : vector<8x16xf32>
    %112 = arith.maximumf %110, %111 : vector<8x16xf32>
    %c32_90 = arith.constant 32 : index
    %c0_91 = arith.constant 0 : index
    %113 = vector.load %arg8[%c32_90, %c0_91] : memref<122x16xf32, #tpu.memory_space<vmem>>, vector<8x16xf32>
    tpu.vector_store %arg8[%c32_90, %c0_91], %112 {strides = array<i32>} : memref<122x16xf32, #tpu.memory_space<vmem>>, vector<8x16xf32>,
    %c91 = arith.constant 91 : index
    %c0_92 = arith.constant 0 : index
    %114 = tpu.strided_load %arg10[%c91, %c0_92] {strides = array<i32: 2, 1>} : memref<324x16xf32, #tpu.memory_space<vmem>>, vector<8x16xf32>
    %c92_93 = arith.constant 92 : index
    %c0_94 = arith.constant 0 : index
    %115 = tpu.strided_load %arg10[%c92_93, %c0_94] {strides = array<i32: 2, 1>} : memref<324x16xf32, #tpu.memory_space<vmem>>, vector<8x16xf32>
    %c109 = arith.constant 109 : index
    %c0_95 = arith.constant 0 : index
    %116 = tpu.strided_load %arg10[%c109, %c0_95] {strides = array<i32: 2, 1>} : memref<324x16xf32, #tpu.memory_space<vmem>>, vector<8x16xf32>
    %c110_96 = arith.constant 110 : index
    %c0_97 = arith.constant 0 : index
    %117 = tpu.strided_load %arg10[%c110_96, %c0_97] {strides = array<i32: 2, 1>} : memref<324x16xf32, #tpu.memory_space<vmem>>, vector<8x16xf32>
    %118 = arith.maximumf %114, %115 : vector<8x16xf32>
    %119 = arith.maximumf %116, %117 : vector<8x16xf32>
    %120 = arith.maximumf %118, %119 : vector<8x16xf32>
    %c42 = arith.constant 42 : index
    %c0_98 = arith.constant 0 : index
    %121 = vector.load %arg8[%c42, %c0_98] : memref<122x16xf32, #tpu.memory_space<vmem>>, vector<8x16xf32>
    tpu.vector_store %arg8[%c42, %c0_98], %120 {strides = array<i32>} : memref<122x16xf32, #tpu.memory_space<vmem>>, vector<8x16xf32>,
    %c127 = arith.constant 127 : index
    %c0_99 = arith.constant 0 : index
    %122 = tpu.strided_load %arg10[%c127, %c0_99] {strides = array<i32: 2, 1>} : memref<324x16xf32, #tpu.memory_space<vmem>>, vector<8x16xf32>
    %c128_100 = arith.constant 128 : index
    %c0_101 = arith.constant 0 : index
    %123 = tpu.strided_load %arg10[%c128_100, %c0_101] {strides = array<i32: 2, 1>} : memref<324x16xf32, #tpu.memory_space<vmem>>, vector<8x16xf32>
    %c145 = arith.constant 145 : index
    %c0_102 = arith.constant 0 : index
    %124 = tpu.strided_load %arg10[%c145, %c0_102] {strides = array<i32: 2, 1>} : memref<324x16xf32, #tpu.memory_space<vmem>>, vector<8x16xf32>
    %c146_103 = arith.constant 146 : index
    %c0_104 = arith.constant 0 : index
    %125 = tpu.strided_load %arg10[%c146_103, %c0_104] {strides = array<i32: 2, 1>} : memref<324x16xf32, #tpu.memory_space<vmem>>, vector<8x16xf32>
    %126 = arith.maximumf %122, %123 : vector<8x16xf32>
    %127 = arith.maximumf %124, %125 : vector<8x16xf32>
    %128 = arith.maximumf %126, %127 : vector<8x16xf32>
    %c52 = arith.constant 52 : index
    %c0_105 = arith.constant 0 : index
    %129 = vector.load %arg8[%c52, %c0_105] : memref<122x16xf32, #tpu.memory_space<vmem>>, vector<8x16xf32>
    tpu.vector_store %arg8[%c52, %c0_105], %128 {strides = array<i32>} : memref<122x16xf32, #tpu.memory_space<vmem>>, vector<8x16xf32>,
    %c163 = arith.constant 163 : index
    %c0_106 = arith.constant 0 : index
    %130 = tpu.strided_load %arg10[%c163, %c0_106] {strides = array<i32: 2, 1>} : memref<324x16xf32, #tpu.memory_space<vmem>>, vector<8x16xf32>
    %c164_107 = arith.constant 164 : index
    %c0_108 = arith.constant 0 : index
    %131 = tpu.strided_load %arg10[%c164_107, %c0_108] {strides = array<i32: 2, 1>} : memref<324x16xf32, #tpu.memory_space<vmem>>, vector<8x16xf32>
    %c181 = arith.constant 181 : index
    %c0_109 = arith.constant 0 : index
    %132 = tpu.strided_load %arg10[%c181, %c0_109] {strides = array<i32: 2, 1>} : memref<324x16xf32, #tpu.memory_space<vmem>>, vector<8x16xf32>
    %c182_110 = arith.constant 182 : index
    %c0_111 = arith.constant 0 : index
    %133 = tpu.strided_load %arg10[%c182_110, %c0_111] {strides = array<i32: 2, 1>} : memref<324x16xf32, #tpu.memory_space<vmem>>, vector<8x16xf32>
    %134 = arith.maximumf %130, %131 : vector<8x16xf32>
    %135 = arith.maximumf %132, %133 : vector<8x16xf32>
    %136 = arith.maximumf %134, %135 : vector<8x16xf32>
    %c62 = arith.constant 62 : index
    %c0_112 = arith.constant 0 : index
    %137 = vector.load %arg8[%c62, %c0_112] : memref<122x16xf32, #tpu.memory_space<vmem>>, vector<8x16xf32>
    tpu.vector_store %arg8[%c62, %c0_112], %136 {strides = array<i32>} : memref<122x16xf32, #tpu.memory_space<vmem>>, vector<8x16xf32>,
    %c199 = arith.constant 199 : index
    %c0_113 = arith.constant 0 : index
    %138 = tpu.strided_load %arg10[%c199, %c0_113] {strides = array<i32: 2, 1>} : memref<324x16xf32, #tpu.memory_space<vmem>>, vector<8x16xf32>
    %c200_114 = arith.constant 200 : index
    %c0_115 = arith.constant 0 : index
    %139 = tpu.strided_load %arg10[%c200_114, %c0_115] {strides = array<i32: 2, 1>} : memref<324x16xf32, #tpu.memory_space<vmem>>, vector<8x16xf32>
    %c217 = arith.constant 217 : index
    %c0_116 = arith.constant 0 : index
    %140 = tpu.strided_load %arg10[%c217, %c0_116] {strides = array<i32: 2, 1>} : memref<324x16xf32, #tpu.memory_space<vmem>>, vector<8x16xf32>
    %c218_117 = arith.constant 218 : index
    %c0_118 = arith.constant 0 : index
    %141 = tpu.strided_load %arg10[%c218_117, %c0_118] {strides = array<i32: 2, 1>} : memref<324x16xf32, #tpu.memory_space<vmem>>, vector<8x16xf32>
    %142 = arith.maximumf %138, %139 : vector<8x16xf32>
    %143 = arith.maximumf %140, %141 : vector<8x16xf32>
    %144 = arith.maximumf %142, %143 : vector<8x16xf32>
    %c72 = arith.constant 72 : index
    %c0_119 = arith.constant 0 : index
    %145 = vector.load %arg8[%c72, %c0_119] : memref<122x16xf32, #tpu.memory_space<vmem>>, vector<8x16xf32>
    tpu.vector_store %arg8[%c72, %c0_119], %144 {strides = array<i32>} : memref<122x16xf32, #tpu.memory_space<vmem>>, vector<8x16xf32>,
    %c235 = arith.constant 235 : index
    %c0_120 = arith.constant 0 : index
    %146 = tpu.strided_load %arg10[%c235, %c0_120] {strides = array<i32: 2, 1>} : memref<324x16xf32, #tpu.memory_space<vmem>>, vector<8x16xf32>
    %c236_121 = arith.constant 236 : index
    %c0_122 = arith.constant 0 : index
    %147 = tpu.strided_load %arg10[%c236_121, %c0_122] {strides = array<i32: 2, 1>} : memref<324x16xf32, #tpu.memory_space<vmem>>, vector<8x16xf32>
    %c253 = arith.constant 253 : index
    %c0_123 = arith.constant 0 : index
    %148 = tpu.strided_load %arg10[%c253, %c0_123] {strides = array<i32: 2, 1>} : memref<324x16xf32, #tpu.memory_space<vmem>>, vector<8x16xf32>
    %c254_124 = arith.constant 254 : index
    %c0_125 = arith.constant 0 : index
    %149 = tpu.strided_load %arg10[%c254_124, %c0_125] {strides = array<i32: 2, 1>} : memref<324x16xf32, #tpu.memory_space<vmem>>, vector<8x16xf32>
    %150 = arith.maximumf %146, %147 : vector<8x16xf32>
    %151 = arith.maximumf %148, %149 : vector<8x16xf32>
    %152 = arith.maximumf %150, %151 : vector<8x16xf32>
    %c82 = arith.constant 82 : index
    %c0_126 = arith.constant 0 : index
    %153 = vector.load %arg8[%c82, %c0_126] : memref<122x16xf32, #tpu.memory_space<vmem>>, vector<8x16xf32>
    tpu.vector_store %arg8[%c82, %c0_126], %152 {strides = array<i32>} : memref<122x16xf32, #tpu.memory_space<vmem>>, vector<8x16xf32>,
    %c271 = arith.constant 271 : index
    %c0_127 = arith.constant 0 : index
    %154 = tpu.strided_load %arg10[%c271, %c0_127] {strides = array<i32: 2, 1>} : memref<324x16xf32, #tpu.memory_space<vmem>>, vector<8x16xf32>
    %c272_128 = arith.constant 272 : index
    %c0_129 = arith.constant 0 : index
    %155 = tpu.strided_load %arg10[%c272_128, %c0_129] {strides = array<i32: 2, 1>} : memref<324x16xf32, #tpu.memory_space<vmem>>, vector<8x16xf32>
    %c289 = arith.constant 289 : index
    %c0_130 = arith.constant 0 : index
    %156 = tpu.strided_load %arg10[%c289, %c0_130] {strides = array<i32: 2, 1>} : memref<324x16xf32, #tpu.memory_space<vmem>>, vector<8x16xf32>
    %c290_131 = arith.constant 290 : index
    %c0_132 = arith.constant 0 : index
    %157 = tpu.strided_load %arg10[%c290_131, %c0_132] {strides = array<i32: 2, 1>} : memref<324x16xf32, #tpu.memory_space<vmem>>, vector<8x16xf32>
    %158 = arith.maximumf %154, %155 : vector<8x16xf32>
    %159 = arith.maximumf %156, %157 : vector<8x16xf32>
    %160 = arith.maximumf %158, %159 : vector<8x16xf32>
    %c92_133 = arith.constant 92 : index
    %c0_134 = arith.constant 0 : index
    %161 = vector.load %arg8[%c92_133, %c0_134] : memref<122x16xf32, #tpu.memory_space<vmem>>, vector<8x16xf32>
    tpu.vector_store %arg8[%c92_133, %c0_134], %160 {strides = array<i32>} : memref<122x16xf32, #tpu.memory_space<vmem>>, vector<8x16xf32>,
    %c0_135 = arith.constant 0 : index
    %c0_136 = arith.constant 0 : index
    %162 = vector.load %arg8[%c0_135, %c0_136] : memref<122x16xf32, #tpu.memory_space<vmem>>, vector<100x16xf32>
    %163 = arith.truncf %162 : vector<100x16xf32> to vector<100x16xbf16>
    %c1_137 = arith.constant 1 : index
    %c0_138 = arith.constant 0 : index
    %164 = vector.load %arg8[%c1_137, %c0_138] : memref<122x16xf32, #tpu.memory_space<vmem>>, vector<100x16xf32>
    %165 = arith.truncf %164 : vector<100x16xf32> to vector<100x16xbf16>
    %c2_139 = arith.constant 2 : index
    %c0_140 = arith.constant 0 : index
    %166 = vector.load %arg8[%c2_139, %c0_140] : memref<122x16xf32, #tpu.memory_space<vmem>>, vector<100x16xf32>
    %167 = arith.truncf %166 : vector<100x16xf32> to vector<100x16xbf16>
    %c10 = arith.constant 10 : index
    %c0_141 = arith.constant 0 : index
    %168 = vector.load %arg8[%c10, %c0_141] : memref<122x16xf32, #tpu.memory_space<vmem>>, vector<100x16xf32>
    %169 = arith.truncf %168 : vector<100x16xf32> to vector<100x16xbf16>
    %c11 = arith.constant 11 : index
    %c0_142 = arith.constant 0 : index
    %170 = vector.load %arg8[%c11, %c0_142] : memref<122x16xf32, #tpu.memory_space<vmem>>, vector<100x16xf32>
    %171 = arith.truncf %170 : vector<100x16xf32> to vector<100x16xbf16>
    %c12 = arith.constant 12 : index
    %c0_143 = arith.constant 0 : index
    %172 = vector.load %arg8[%c12, %c0_143] : memref<122x16xf32, #tpu.memory_space<vmem>>, vector<100x16xf32>
    %173 = arith.truncf %172 : vector<100x16xf32> to vector<100x16xbf16>
    %c20_144 = arith.constant 20 : index
    %c0_145 = arith.constant 0 : index
    %174 = vector.load %arg8[%c20_144, %c0_145] : memref<122x16xf32, #tpu.memory_space<vmem>>, vector<100x16xf32>
    %175 = arith.truncf %174 : vector<100x16xf32> to vector<100x16xbf16>
    %c21 = arith.constant 21 : index
    %c0_146 = arith.constant 0 : index
    %176 = vector.load %arg8[%c21, %c0_146] : memref<122x16xf32, #tpu.memory_space<vmem>>, vector<100x16xf32>
    %177 = arith.truncf %176 : vector<100x16xf32> to vector<100x16xbf16>
    %c22_147 = arith.constant 22 : index
    %c0_148 = arith.constant 0 : index
    %178 = vector.load %arg8[%c22_147, %c0_148] : memref<122x16xf32, #tpu.memory_space<vmem>>, vector<100x16xf32>
    %179 = arith.truncf %178 : vector<100x16xf32> to vector<100x16xbf16>
    %180 = tpu.concatenate %163, %165, %167, %169, %171, %173, %175, %177 in 1 : vector<100x16xbf16>, vector<100x16xbf16>, vector<100x16xbf16>, vector<100x16xbf16>, vector<100x16xbf16>, vector<100x16xbf16>, vector<100x16xbf16>, vector<100x16xbf16> -> vector<100x128xbf16>
    %c1_149 = arith.constant 1 : index
    %c0_150 = arith.constant 0 : index
    %c0_151 = arith.constant 0 : index
    %181 = vector.load %arg2[%c1_149, %c0_150, %c0_151] : memref<6x128x128xbf16, #tpu.memory_space<vmem>>, vector<1x128x128xbf16>
    %182 = vector.shape_cast %181 : vector<1x128x128xbf16> to vector<128x128xbf16>
    %cst_152 = arith.constant dense<0.000000e+00> : vector<100x128xf32>
    %183 = tpu.matmul %180, %182, %cst_152 {dimension_numbers = #tpu.dot_dimension_numbers<[1], [0], [0], [1], [0, 0, 1, 1], [], []>} : vector<100x128xbf16>, vector<128x128xbf16>, vector<100x128xf32> -> vector<100x128xf32>
    %c2_153 = arith.constant 2 : index
    %c0_154 = arith.constant 0 : index
    %c0_155 = arith.constant 0 : index
    %184 = vector.load %arg2[%c2_153, %c0_154, %c0_155] : memref<6x128x128xbf16, #tpu.memory_space<vmem>>, vector<1x16x128xbf16>
    %185 = vector.shape_cast %184 : vector<1x16x128xbf16> to vector<16x128xbf16>
    %cst_156 = arith.constant dense<0.000000e+00> : vector<100x128xf32>
    %186 = tpu.matmul %179, %185, %cst_156 {dimension_numbers = #tpu.dot_dimension_numbers<[1], [0], [0], [1], [0, 0, 1, 1], [], []>} : vector<100x16xbf16>, vector<16x128xbf16>, vector<100x128xf32> -> vector<100x128xf32>
    %187 = arith.addf %183, %186 : vector<100x128xf32>
    %c1_157 = arith.constant 1 : index
    %c0_158 = arith.constant 0 : index
    %c0_159 = arith.constant 0 : index
    %188 = vector.load %arg3[%c1_157, %c0_158, %c0_159] : memref<3x1x128xf32, #tpu.memory_space<vmem>>, vector<1x1x128xf32>
    %189 = vector.shape_cast %188 : vector<1x1x128xf32> to vector<1x128xf32>
    %190 = vector.broadcast %189 : vector<1x128xf32> to vector<100x128xf32>
    %191 = arith.addf %187, %190 : vector<100x128xf32>
    %cst_160 = arith.constant 0.000000e+00 : f32
    %192 = vector.broadcast %cst_160 : f32 to vector<100x128xf32>
    %193 = arith.maximumf %191, %192 : vector<100x128xf32>
    %194 = vector.extract_strided_slice %193 {offsets = [0, 0], sizes = [100, 32], strides = [1, 1]} : vector<100x128xf32> to vector<100x32xf32>
    %c0_161 = arith.constant 0 : index
    %c0_162 = arith.constant 0 : index
    %195 = vector.load %arg11[%c0_161, %c0_162] : memref<100x32xf32, #tpu.memory_space<vmem>>, vector<100x32xf32>
    tpu.vector_store %arg11[%c0_161, %c0_162], %194 {strides = array<i32>} : memref<100x32xf32, #tpu.memory_space<vmem>>, vector<100x32xf32>,
    %cst_163 = arith.constant 0.000000e+00 : f32
    %196 = vector.broadcast %cst_163 : f32 to vector<50x32xf32>
    %c0_164 = arith.constant 0 : index
    %c0_165 = arith.constant 0 : index
    %197 = vector.load %arg9[%c0_164, %c0_165] : memref<50x32xf32, #tpu.memory_space<vmem>>, vector<50x32xf32>
    tpu.vector_store %arg9[%c0_164, %c0_165], %196 {strides = array<i32>} : memref<50x32xf32, #tpu.memory_space<vmem>>, vector<50x32xf32>,
    %c11_166 = arith.constant 11 : index
    %c0_167 = arith.constant 0 : index
    %198 = tpu.strided_load %arg11[%c11_166, %c0_167] {strides = array<i32: 2, 1>} : memref<100x32xf32, #tpu.memory_space<vmem>>, vector<4x32xf32>
    %c12_168 = arith.constant 12 : index
    %c0_169 = arith.constant 0 : index
    %199 = tpu.strided_load %arg11[%c12_168, %c0_169] {strides = array<i32: 2, 1>} : memref<100x32xf32, #tpu.memory_space<vmem>>, vector<4x32xf32>
    %c21_170 = arith.constant 21 : index
    %c0_171 = arith.constant 0 : index
    %200 = tpu.strided_load %arg11[%c21_170, %c0_171] {strides = array<i32: 2, 1>} : memref<100x32xf32, #tpu.memory_space<vmem>>, vector<4x32xf32>
    %c22_172 = arith.constant 22 : index
    %c0_173 = arith.constant 0 : index
    %201 = tpu.strided_load %arg11[%c22_172, %c0_173] {strides = array<i32: 2, 1>} : memref<100x32xf32, #tpu.memory_space<vmem>>, vector<4x32xf32>
    %202 = arith.maximumf %198, %199 : vector<4x32xf32>
    %203 = arith.maximumf %200, %201 : vector<4x32xf32>
    %204 = arith.maximumf %202, %203 : vector<4x32xf32>
    %c14 = arith.constant 14 : index
    %c0_174 = arith.constant 0 : index
    %205 = vector.load %arg9[%c14, %c0_174] : memref<50x32xf32, #tpu.memory_space<vmem>>, vector<4x32xf32>
    tpu.vector_store %arg9[%c14, %c0_174], %204 {strides = array<i32>} : memref<50x32xf32, #tpu.memory_space<vmem>>, vector<4x32xf32>,
    %c31 = arith.constant 31 : index
    %c0_175 = arith.constant 0 : index
    %206 = tpu.strided_load %arg11[%c31, %c0_175] {strides = array<i32: 2, 1>} : memref<100x32xf32, #tpu.memory_space<vmem>>, vector<4x32xf32>
    %c32_176 = arith.constant 32 : index
    %c0_177 = arith.constant 0 : index
    %207 = tpu.strided_load %arg11[%c32_176, %c0_177] {strides = array<i32: 2, 1>} : memref<100x32xf32, #tpu.memory_space<vmem>>, vector<4x32xf32>
    %c41 = arith.constant 41 : index
    %c0_178 = arith.constant 0 : index
    %208 = tpu.strided_load %arg11[%c41, %c0_178] {strides = array<i32: 2, 1>} : memref<100x32xf32, #tpu.memory_space<vmem>>, vector<4x32xf32>
    %c42_179 = arith.constant 42 : index
    %c0_180 = arith.constant 0 : index
    %209 = tpu.strided_load %arg11[%c42_179, %c0_180] {strides = array<i32: 2, 1>} : memref<100x32xf32, #tpu.memory_space<vmem>>, vector<4x32xf32>
    %210 = arith.maximumf %206, %207 : vector<4x32xf32>
    %211 = arith.maximumf %208, %209 : vector<4x32xf32>
    %212 = arith.maximumf %210, %211 : vector<4x32xf32>
    %c20_181 = arith.constant 20 : index
    %c0_182 = arith.constant 0 : index
    %213 = vector.load %arg9[%c20_181, %c0_182] : memref<50x32xf32, #tpu.memory_space<vmem>>, vector<4x32xf32>
    tpu.vector_store %arg9[%c20_181, %c0_182], %212 {strides = array<i32>} : memref<50x32xf32, #tpu.memory_space<vmem>>, vector<4x32xf32>,
    %c51 = arith.constant 51 : index
    %c0_183 = arith.constant 0 : index
    %214 = tpu.strided_load %arg11[%c51, %c0_183] {strides = array<i32: 2, 1>} : memref<100x32xf32, #tpu.memory_space<vmem>>, vector<4x32xf32>
    %c52_184 = arith.constant 52 : index
    %c0_185 = arith.constant 0 : index
    %215 = tpu.strided_load %arg11[%c52_184, %c0_185] {strides = array<i32: 2, 1>} : memref<100x32xf32, #tpu.memory_space<vmem>>, vector<4x32xf32>
    %c61 = arith.constant 61 : index
    %c0_186 = arith.constant 0 : index
    %216 = tpu.strided_load %arg11[%c61, %c0_186] {strides = array<i32: 2, 1>} : memref<100x32xf32, #tpu.memory_space<vmem>>, vector<4x32xf32>
    %c62_187 = arith.constant 62 : index
    %c0_188 = arith.constant 0 : index
    %217 = tpu.strided_load %arg11[%c62_187, %c0_188] {strides = array<i32: 2, 1>} : memref<100x32xf32, #tpu.memory_space<vmem>>, vector<4x32xf32>
    %218 = arith.maximumf %214, %215 : vector<4x32xf32>
    %219 = arith.maximumf %216, %217 : vector<4x32xf32>
    %220 = arith.maximumf %218, %219 : vector<4x32xf32>
    %c26 = arith.constant 26 : index
    %c0_189 = arith.constant 0 : index
    %221 = vector.load %arg9[%c26, %c0_189] : memref<50x32xf32, #tpu.memory_space<vmem>>, vector<4x32xf32>
    tpu.vector_store %arg9[%c26, %c0_189], %220 {strides = array<i32>} : memref<50x32xf32, #tpu.memory_space<vmem>>, vector<4x32xf32>,
    %c71 = arith.constant 71 : index
    %c0_190 = arith.constant 0 : index
    %222 = tpu.strided_load %arg11[%c71, %c0_190] {strides = array<i32: 2, 1>} : memref<100x32xf32, #tpu.memory_space<vmem>>, vector<4x32xf32>
    %c72_191 = arith.constant 72 : index
    %c0_192 = arith.constant 0 : index
    %223 = tpu.strided_load %arg11[%c72_191, %c0_192] {strides = array<i32: 2, 1>} : memref<100x32xf32, #tpu.memory_space<vmem>>, vector<4x32xf32>
    %c81 = arith.constant 81 : index
    %c0_193 = arith.constant 0 : index
    %224 = tpu.strided_load %arg11[%c81, %c0_193] {strides = array<i32: 2, 1>} : memref<100x32xf32, #tpu.memory_space<vmem>>, vector<4x32xf32>
    %c82_194 = arith.constant 82 : index
    %c0_195 = arith.constant 0 : index
    %225 = tpu.strided_load %arg11[%c82_194, %c0_195] {strides = array<i32: 2, 1>} : memref<100x32xf32, #tpu.memory_space<vmem>>, vector<4x32xf32>
    %226 = arith.maximumf %222, %223 : vector<4x32xf32>
    %227 = arith.maximumf %224, %225 : vector<4x32xf32>
    %228 = arith.maximumf %226, %227 : vector<4x32xf32>
    %c32_196 = arith.constant 32 : index
    %c0_197 = arith.constant 0 : index
    %229 = vector.load %arg9[%c32_196, %c0_197] : memref<50x32xf32, #tpu.memory_space<vmem>>, vector<4x32xf32>
    tpu.vector_store %arg9[%c32_196, %c0_197], %228 {strides = array<i32>} : memref<50x32xf32, #tpu.memory_space<vmem>>, vector<4x32xf32>,
    %c0_198 = arith.constant 0 : index
    %c0_199 = arith.constant 0 : index
    %230 = vector.load %arg9[%c0_198, %c0_199] : memref<50x32xf32, #tpu.memory_space<vmem>>, vector<36x32xf32>
    %231 = arith.truncf %230 : vector<36x32xf32> to vector<36x32xbf16>
    %c1_200 = arith.constant 1 : index
    %c0_201 = arith.constant 0 : index
    %232 = vector.load %arg9[%c1_200, %c0_201] : memref<50x32xf32, #tpu.memory_space<vmem>>, vector<36x32xf32>
    %233 = arith.truncf %232 : vector<36x32xf32> to vector<36x32xbf16>
    %c2_202 = arith.constant 2 : index
    %c0_203 = arith.constant 0 : index
    %234 = vector.load %arg9[%c2_202, %c0_203] : memref<50x32xf32, #tpu.memory_space<vmem>>, vector<36x32xf32>
    %235 = arith.truncf %234 : vector<36x32xf32> to vector<36x32xbf16>
    %c6 = arith.constant 6 : index
    %c0_204 = arith.constant 0 : index
    %236 = vector.load %arg9[%c6, %c0_204] : memref<50x32xf32, #tpu.memory_space<vmem>>, vector<36x32xf32>
    %237 = arith.truncf %236 : vector<36x32xf32> to vector<36x32xbf16>
    %c7 = arith.constant 7 : index
    %c0_205 = arith.constant 0 : index
    %238 = vector.load %arg9[%c7, %c0_205] : memref<50x32xf32, #tpu.memory_space<vmem>>, vector<36x32xf32>
    %239 = arith.truncf %238 : vector<36x32xf32> to vector<36x32xbf16>
    %c8 = arith.constant 8 : index
    %c0_206 = arith.constant 0 : index
    %240 = vector.load %arg9[%c8, %c0_206] : memref<50x32xf32, #tpu.memory_space<vmem>>, vector<36x32xf32>
    %241 = arith.truncf %240 : vector<36x32xf32> to vector<36x32xbf16>
    %c12_207 = arith.constant 12 : index
    %c0_208 = arith.constant 0 : index
    %242 = vector.load %arg9[%c12_207, %c0_208] : memref<50x32xf32, #tpu.memory_space<vmem>>, vector<36x32xf32>
    %243 = arith.truncf %242 : vector<36x32xf32> to vector<36x32xbf16>
    %c13 = arith.constant 13 : index
    %c0_209 = arith.constant 0 : index
    %244 = vector.load %arg9[%c13, %c0_209] : memref<50x32xf32, #tpu.memory_space<vmem>>, vector<36x32xf32>
    %245 = arith.truncf %244 : vector<36x32xf32> to vector<36x32xbf16>
    %c14_210 = arith.constant 14 : index
    %c0_211 = arith.constant 0 : index
    %246 = vector.load %arg9[%c14_210, %c0_211] : memref<50x32xf32, #tpu.memory_space<vmem>>, vector<36x32xf32>
    %247 = arith.truncf %246 : vector<36x32xf32> to vector<36x32xbf16>
    %248 = tpu.concatenate %231, %233, %235, %237 in 1 : vector<36x32xbf16>, vector<36x32xbf16>, vector<36x32xbf16>, vector<36x32xbf16> -> vector<36x128xbf16>
    %c3 = arith.constant 3 : index
    %c0_212 = arith.constant 0 : index
    %c0_213 = arith.constant 0 : index
    %249 = vector.load %arg2[%c3, %c0_212, %c0_213] : memref<6x128x128xbf16, #tpu.memory_space<vmem>>, vector<1x128x128xbf16>
    %250 = vector.shape_cast %249 : vector<1x128x128xbf16> to vector<128x128xbf16>
    %cst_214 = arith.constant dense<0.000000e+00> : vector<36x128xf32>
    %251 = tpu.matmul %248, %250, %cst_214 {dimension_numbers = #tpu.dot_dimension_numbers<[1], [0], [0], [1], [0, 0, 1, 1], [], []>} : vector<36x128xbf16>, vector<128x128xbf16>, vector<36x128xf32> -> vector<36x128xf32>
    %252 = tpu.concatenate %239, %241, %243, %245 in 1 : vector<36x32xbf16>, vector<36x32xbf16>, vector<36x32xbf16>, vector<36x32xbf16> -> vector<36x128xbf16>
    %c4 = arith.constant 4 : index
    %c0_215 = arith.constant 0 : index
    %c0_216 = arith.constant 0 : index
    %253 = vector.load %arg2[%c4, %c0_215, %c0_216] : memref<6x128x128xbf16, #tpu.memory_space<vmem>>, vector<1x128x128xbf16>
    %254 = vector.shape_cast %253 : vector<1x128x128xbf16> to vector<128x128xbf16>
    %cst_217 = arith.constant dense<0.000000e+00> : vector<36x128xf32>
    %255 = tpu.matmul %252, %254, %cst_217 {dimension_numbers = #tpu.dot_dimension_numbers<[1], [0], [0], [1], [0, 0, 1, 1], [], []>} : vector<36x128xbf16>, vector<128x128xbf16>, vector<36x128xf32> -> vector<36x128xf32>
    %256 = arith.addf %251, %255 : vector<36x128xf32>
    %c5 = arith.constant 5 : index
    %c0_218 = arith.constant 0 : index
    %c0_219 = arith.constant 0 : index
    %257 = vector.load %arg2[%c5, %c0_218, %c0_219] : memref<6x128x128xbf16, #tpu.memory_space<vmem>>, vector<1x32x128xbf16>
    %258 = vector.shape_cast %257 : vector<1x32x128xbf16> to vector<32x128xbf16>
    %cst_220 = arith.constant dense<0.000000e+00> : vector<36x128xf32>
    %259 = tpu.matmul %247, %258, %cst_220 {dimension_numbers = #tpu.dot_dimension_numbers<[1], [0], [0], [1], [0, 0, 1, 1], [], []>} : vector<36x32xbf16>, vector<32x128xbf16>, vector<36x128xf32> -> vector<36x128xf32>
    %260 = arith.addf %256, %259 : vector<36x128xf32>
    %c2_221 = arith.constant 2 : index
    %c0_222 = arith.constant 0 : index
    %c0_223 = arith.constant 0 : index
    %261 = vector.load %arg3[%c2_221, %c0_222, %c0_223] : memref<3x1x128xf32, #tpu.memory_space<vmem>>, vector<1x1x128xf32>
    %262 = vector.shape_cast %261 : vector<1x1x128xf32> to vector<1x128xf32>
    %263 = vector.broadcast %262 : vector<1x128xf32> to vector<36x128xf32>
    %264 = arith.addf %260, %263 : vector<36x128xf32>
    %cst_224 = arith.constant 0.000000e+00 : f32
    %265 = vector.broadcast %cst_224 : f32 to vector<36x128xf32>
    %266 = arith.maximumf %264, %265 : vector<36x128xf32>
    %267 = vector.extract_strided_slice %266 {offsets = [0, 0], sizes = [36, 64], strides = [1, 1]} : vector<36x128xf32> to vector<36x64xf32>
    %c0_225 = arith.constant 0 : index
    %c0_226 = arith.constant 0 : index
    %268 = vector.load %arg12[%c0_225, %c0_226] : memref<36x64xf32, #tpu.memory_space<vmem>>, vector<36x64xf32>
    tpu.vector_store %arg12[%c0_225, %c0_226], %267 {strides = array<i32>} : memref<36x64xf32, #tpu.memory_space<vmem>>, vector<36x64xf32>,
    %cst_227 = arith.constant 0.000000e+00 : f32
    %269 = vector.broadcast %cst_227 : f32 to vector<1x64xf32>
    %c7_228 = arith.constant 7 : index
    %c0_229 = arith.constant 0 : index
    %270 = tpu.strided_load %arg12[%c7_228, %c0_229] {strides = array<i32: 2, 1>} : memref<36x64xf32, #tpu.memory_space<vmem>>, vector<2x64xf32>
    %c8_230 = arith.constant 8 : index
    %c0_231 = arith.constant 0 : index
    %271 = tpu.strided_load %arg12[%c8_230, %c0_231] {strides = array<i32: 2, 1>} : memref<36x64xf32, #tpu.memory_space<vmem>>, vector<2x64xf32>
    %c13_232 = arith.constant 13 : index
    %c0_233 = arith.constant 0 : index
    %272 = tpu.strided_load %arg12[%c13_232, %c0_233] {strides = array<i32: 2, 1>} : memref<36x64xf32, #tpu.memory_space<vmem>>, vector<2x64xf32>
    %c14_234 = arith.constant 14 : index
    %c0_235 = arith.constant 0 : index
    %273 = tpu.strided_load %arg12[%c14_234, %c0_235] {strides = array<i32: 2, 1>} : memref<36x64xf32, #tpu.memory_space<vmem>>, vector<2x64xf32>
    %274 = arith.maximumf %270, %271 : vector<2x64xf32>
    %275 = arith.maximumf %272, %273 : vector<2x64xf32>
    %276 = arith.maximumf %274, %275 : vector<2x64xf32>
    %cst_236 = arith.constant dense<0.000000e+00> : vector<64xf32>
    %277 = vector.multi_reduction <add>, %276, %cst_236 [0] : vector<2x64xf32> to vector<64xf32>
    %278 = vector.shape_cast %277 : vector<64xf32> to vector<1x64xf32>
    %279 = arith.addf %269, %278 : vector<1x64xf32>
    %c19_237 = arith.constant 19 : index
    %c0_238 = arith.constant 0 : index
    %280 = tpu.strided_load %arg12[%c19_237, %c0_238] {strides = array<i32: 2, 1>} : memref<36x64xf32, #tpu.memory_space<vmem>>, vector<2x64xf32>
    %c20_239 = arith.constant 20 : index
    %c0_240 = arith.constant 0 : index
    %281 = tpu.strided_load %arg12[%c20_239, %c0_240] {strides = array<i32: 2, 1>} : memref<36x64xf32, #tpu.memory_space<vmem>>, vector<2x64xf32>
    %c25 = arith.constant 25 : index
    %c0_241 = arith.constant 0 : index
    %282 = tpu.strided_load %arg12[%c25, %c0_241] {strides = array<i32: 2, 1>} : memref<36x64xf32, #tpu.memory_space<vmem>>, vector<2x64xf32>
    %c26_242 = arith.constant 26 : index
    %c0_243 = arith.constant 0 : index
    %283 = tpu.strided_load %arg12[%c26_242, %c0_243] {strides = array<i32: 2, 1>} : memref<36x64xf32, #tpu.memory_space<vmem>>, vector<2x64xf32>
    %284 = arith.maximumf %280, %281 : vector<2x64xf32>
    %285 = arith.maximumf %282, %283 : vector<2x64xf32>
    %286 = arith.maximumf %284, %285 : vector<2x64xf32>
    %cst_244 = arith.constant dense<0.000000e+00> : vector<64xf32>
    %287 = vector.multi_reduction <add>, %286, %cst_244 [0] : vector<2x64xf32> to vector<64xf32>
    %288 = vector.shape_cast %287 : vector<64xf32> to vector<1x64xf32>
    %289 = arith.addf %279, %288 : vector<1x64xf32>
    %cst_245 = arith.constant 2.500000e-01 : f32
    %290 = vector.broadcast %cst_245 : f32 to vector<1x64xf32>
    %291 = arith.mulf %289, %290 : vector<1x64xf32>
    %292 = arith.truncf %291 : vector<1x64xf32> to vector<1x64xbf16>
    %c0_246 = arith.constant 0 : index
    %c0_247 = arith.constant 0 : index
    %c0_248 = arith.constant 0 : index
    %293 = vector.load %arg4[%c0_246, %c0_247, %c0_248] : memref<2x128x128xbf16, #tpu.memory_space<vmem>>, vector<1x64x128xbf16>
    %294 = vector.shape_cast %293 : vector<1x64x128xbf16> to vector<64x128xbf16>
    %cst_249 = arith.constant dense<0.000000e+00> : vector<1x128xf32>
    %295 = tpu.matmul %292, %294, %cst_249 {dimension_numbers = #tpu.dot_dimension_numbers<[1], [0], [0], [1], [0, 0, 1, 1], [], []>} : vector<1x64xbf16>, vector<64x128xbf16>, vector<1x128xf32> -> vector<1x128xf32>
    %c0_250 = arith.constant 0 : index
    %c0_251 = arith.constant 0 : index
    %c0_252 = arith.constant 0 : index
    %296 = vector.load %arg5[%c0_250, %c0_251, %c0_252] : memref<2x1x128xf32, #tpu.memory_space<vmem>>, vector<1x1x128xf32>
    %297 = vector.shape_cast %296 : vector<1x1x128xf32> to vector<1x128xf32>
    %298 = arith.addf %295, %297 : vector<1x128xf32>
    %cst_253 = arith.constant 0.000000e+00 : f32
    %299 = vector.broadcast %cst_253 : f32 to vector<1x128xf32>
    %300 = arith.maximumf %298, %299 : vector<1x128xf32>
    %301 = vector.extract_strided_slice %300 {offsets = [0, 0], sizes = [1, 32], strides = [1, 1]} : vector<1x128xf32> to vector<1x32xf32>
    %302 = arith.truncf %301 : vector<1x32xf32> to vector<1x32xbf16>
    %c1_254 = arith.constant 1 : index
    %c0_255 = arith.constant 0 : index
    %c0_256 = arith.constant 0 : index
    %303 = vector.load %arg4[%c1_254, %c0_255, %c0_256] : memref<2x128x128xbf16, #tpu.memory_space<vmem>>, vector<1x32x128xbf16>
    %304 = vector.shape_cast %303 : vector<1x32x128xbf16> to vector<32x128xbf16>
    %cst_257 = arith.constant dense<0.000000e+00> : vector<1x128xf32>
    %305 = tpu.matmul %302, %304, %cst_257 {dimension_numbers = #tpu.dot_dimension_numbers<[1], [0], [0], [1], [0, 0, 1, 1], [], []>} : vector<1x32xbf16>, vector<32x128xbf16>, vector<1x128xf32> -> vector<1x128xf32>
    %c1_258 = arith.constant 1 : index
    %c0_259 = arith.constant 0 : index
    %c0_260 = arith.constant 0 : index
    %306 = vector.load %arg5[%c1_258, %c0_259, %c0_260] : memref<2x1x128xf32, #tpu.memory_space<vmem>>, vector<1x1x128xf32>
    %307 = vector.shape_cast %306 : vector<1x1x128xf32> to vector<1x128xf32>
    %308 = arith.addf %305, %307 : vector<1x128xf32>
    %c0_261 = arith.constant 0 : index
    %c0_262 = arith.constant 0 : index
    %c0_263 = arith.constant 0 : index
    %309 = vector.load %arg6[%c0_261, %c0_262, %c0_263] : memref<1x1x128xf32, #tpu.memory_space<vmem>>, vector<1x1x128xf32>
    %310 = vector.shape_cast %309 : vector<1x1x128xf32> to vector<1x128xf32>
    %311 = vector.shape_cast %308 : vector<1x128xf32> to vector<1x1x128xf32>
    tpu.vector_store %arg6[%c0_261, %c0_262, %c0_263], %311 {strides = array<i32>} : memref<1x1x128xf32, #tpu.memory_space<vmem>>, vector<1x1x128xf32>,
    return
  }
  func.func @transform_0(%arg0: i32) -> (i32, i32, i32) {
    %c0_i32 = arith.constant 0 : i32
    %c0_i32_0 = arith.constant 0 : i32
    %c0_i32_1 = arith.constant 0 : i32
    return %arg0, %c0_i32, %c0_i32_0 : i32, i32, i32
  }
  func.func @transform_1(%arg0: i32) -> (i32, i32, i32) {
    %c0_i32 = arith.constant 0 : i32
    %c0_i32_0 = arith.constant 0 : i32
    %c0_i32_1 = arith.constant 0 : i32
    %c0_i32_2 = arith.constant 0 : i32
    return %c0_i32, %c0_i32_0, %c0_i32_1 : i32, i32, i32
  }
  func.func @transform_2(%arg0: i32) -> (i32, i32, i32) {
    %c0_i32 = arith.constant 0 : i32
    %c0_i32_0 = arith.constant 0 : i32
    %c0_i32_1 = arith.constant 0 : i32
    %c0_i32_2 = arith.constant 0 : i32
    return %c0_i32, %c0_i32_0, %c0_i32_1 : i32, i32, i32
  }
  func.func @transform_3(%arg0: i32) -> (i32, i32, i32) {
    %c0_i32 = arith.constant 0 : i32
    %c0_i32_0 = arith.constant 0 : i32
    %c0_i32_1 = arith.constant 0 : i32
    %c0_i32_2 = arith.constant 0 : i32
    return %c0_i32, %c0_i32_0, %c0_i32_1 : i32, i32, i32
  }
  func.func @transform_4(%arg0: i32) -> (i32, i32, i32) {
    %c0_i32 = arith.constant 0 : i32
    %c0_i32_0 = arith.constant 0 : i32
    %c0_i32_1 = arith.constant 0 : i32
    %c0_i32_2 = arith.constant 0 : i32
    return %c0_i32, %c0_i32_0, %c0_i32_1 : i32, i32, i32
  }
  func.func @transform_5(%arg0: i32) -> (i32, i32, i32) {
    %c0_i32 = arith.constant 0 : i32
    %c0_i32_0 = arith.constant 0 : i32
    %c0_i32_1 = arith.constant 0 : i32
    return %arg0, %c0_i32, %c0_i32_0 : i32, i32, i32
  }
}

</mosaic_0001>

<bundles_post_ra>
// kernel: forward.1
= control target key start
LH: loop header
LB: loop body
LE: loop exit
PB: predicated region body
PF: predicated region fallthrough
CT: control target
= control target key end

     0   :  { %10 = vsyncpa [#allocation9], 0  ;;  %s5739_s0 = inlined_call_operand.vmem [shape: bf16[2,256,8], index: 0, kind: input, shape index: {}]   ;;  %s5740_s1 = inlined_call_operand.vmem [shape: bf16[6,128,128], index: 1, kind: input, shape index: {}]   ;;  %s5741_s2 = inlined_call_operand.vmem [shape: f32[3,1,128], index: 2, kind: input, shape index: {}]   ;;  %s5742_s3 = inlined_call_operand.vmem [shape: bf16[2,128,128], index: 3, kind: input, shape index: {}]   ;;  %s5743_s4 = inlined_call_operand.vmem [shape: f32[2,1,128], index: 4, kind: input, shape index: {}]   ;;  %s5744_s5 = inlined_call_operand.hbm [shape: f32[2,1,128], index: 5, kind: output, shape index: {}]  }
   0x1   :  { %12 = vsyncpa [#allocation9 + $0x1], 0  ;;  %s4459_s18 = smov 0   ;;  %s4461_s19 = smov 0  }
   0x2   :  { %s4463_s20 = smov 0   ;;  %s4465_s21 = smov 0  }
   0x3 LB: > { %s4480_s22 = sadd.s32 4294967295, %s4413_s21   ;;  %s3693_s23 = sadd.s32 4294967294, %s4413_s21   ;;  %s4413_s21 = sphi %s4465_s21, %s5750_s21   ;;  %s4409_s20 = sphi %s4463_s20, %s5749_s20   ;;  %s4405_s19 = sphi %s4461_s19, %s5748_s19   ;;  %s4401_s18 = sphi %s4459_s18, %s5747_s18  }
   0x4   : > { %s4484_s24 = sadd.s32 1, %s4413_s21   ;;  %s135_s25 = sadd.s32 1, %s4409_s20 }
   0x5   : > { %s132_s26 = ssub.s32 %s4413_s21, %s4484_s24  ;;  %p145_p0 = scmp.ne.s32.totalorder %s4409_s20, %s4405_s19 }
   0x6   : > { %p133_p1 = scmp.eq.s32.totalorder %s132_s26, 0  ;;  %p146_p2 = scmp.eq.s32.totalorder %s4480_s22, 1 }
   0x7   : > { %p151_p3 = scmp.ne.s32.totalorder %s4405_s19, %s4401_s18  ;;  %p152_p4 = scmp.eq.s32.totalorder %s3693_s23, 1 }
   0x8   : > { %s4495_s27 = scalar_select %p133_p1, %s4409_s20, %s135_s25  }
   0x9   : > { %p4497_p5 = por %p146_p2, %p145_p0  ;;  %p4501_p6 = por %p152_p4, %p151_p3 }
   0xa   : > { %p3696_p7 = scmp.ge.s32.totalorder %s4413_s21, 1  ;;  %p190_p8 = scmp.lt.s32.totalorder %s4413_s21, 3 }
   0xc   : > { %p191_p9 = pnand %p3696_p7, %p190_p8 }
   0xd   : > { %p217_p10 = scmp.lt.s32.totalorder (!%p191_p9), %s4480_s22, 1  ;;  %s4416_s16 = smov (!%p191_p9), 24  }
   0xe   : > { %194 = sbr.rel (%p191_p9) target bundleno = 1873 (0x751), region = 40  ;;  %s4417_s17 = smov (!%p191_p9), 8  }
   0xf   : > { %s4418_s23 = smov (!%p191_p9), 32   ;;  %s4419_s30 = smov (!%p191_p9), 16  }
  0x10   : > { %s4421_s8 = smov (!%p191_p9), 40   ;;  %s4422_s9 = smov (!%p191_p9), 48  }
  0x11   : > { %s4424_s11 = smov (!%p191_p9), 64   ;;  %s4425_s25 = smov (!%p191_p9), 80  }
  0x12   : > { %s4426_s26 = smov (!%p191_p9), 112   ;;  %s4427_s6 = smov (!%p191_p9), 96  }
  0x13   : > { %vm223_vm0 = vcmask 64512   ;;  %v4415_v0 = vmov 0.0   ;;  %v4313_v1 = vld [vmem:[%s5740_s1 + $0x20] ss:$0 sps:$4 sm:$0xff]   ;;  %vm1727_vm1 = vcmask 1043456   ;;  %vm1340_vm2 = vcmask 130048  }
  0x14   : > { %226 = vst.msk [vmem:[#allocation2 + $0x10] sm:$0xff] %vm223_vm0, %v4415_v0  ;;  %227 = vst.msk [vmem:[#allocation2 + $0x18] sm:$0xff] %vm223_vm0, %v4415_v0  ;;  %4001 = vmatprep.subr.bf16.mxu0 %v4415_v0  ;;  %4095 = vmatprep.subr.bf16.mxu1 %v4415_v0  ;;  %v1729_v2 = vsel %vm1727_vm1, %v4313_v1, 0  ;;  %s4604_s7 = scalar_select %p217_p10, %s4480_s22, 1  ;;  %v4314_v3 = vld [vmem:[%s5740_s1 + $0x18] sm:$0xff]   ;;  %vm1426_vm3 = vcmask 261120  }
  0x15   : > { %228 = vst.msk [vmem:[#allocation2 + $0x20] sm:$0xff] %vm223_vm0, %v4415_v0  ;;  %224 = vst.msk [vmem:[#allocation2] sm:$0xff] %vm223_vm0, %v4415_v0  ;;  %4002 = vmatpush3.bf16.msra.mxu0 %v1729_v2  ;;  %v4315_v4 = vld [vmem:[%s5740_s1 + $0x10] sm:$0xff]   ;;  %v4316_v39 = vld [vmem:[%s5740_s1 + $0x8] sm:$0xff]   ;;  %vm4420_vm4 = vmmov 0   ;;  %vm1383_vm5 = vcmask 195584  }
  0x16   : > { %225 = vst.msk [vmem:[#allocation2 + $0x8] sm:$0xff] %vm223_vm0, %v4415_v0  ;;  %229 = vst.msk [vmem:[#allocation2 + $0x28] sm:$0xff] %vm223_vm0, %v4415_v0  ;;  %4003 = vmatprep.subr.bf16.mxu0 %v4415_v0  ;;  %s3837_s10 = sshll.u32 %s4604_s7, 7  ;;  %v4317_v46 = vld [vmem:[%s5740_s1] sm:$0xff]   ;;  %4011 = vmatprep.mubr.msk.bf16.mxu0 %vm4420_vm4, %v4415_v0  ;;  %vm1469_vm6 = vcmask 326656   ;;  %vm1512_vm7 = vcmask 392192  }
  0x17   : > { %230 = vst.msk [vmem:[#allocation2 + $0x30] sm:$0xff] %vm223_vm0, %v4415_v0  ;;  %231 = vst.msk [vmem:[#allocation2 + $0x38] sm:$0xff] %vm223_vm0, %v4415_v0  ;;  %s4661_s15 = scalar_lea.vmem %s5739_s0, %s3837_s10  ;;  %4097 = vmatprep.mubr.msk.bf16.mxu1 %vm4420_vm4, %v4415_v0  ;;  %s4423_s10 = smov 56   ;;  %vm1555_vm8 = vcmask 457728   ;;  %vm1598_vm9 = vcmask 523264   ;;  %vm1684_vm10 = vcmask 588800  }
  0x18   : > { %232 = vst.msk [vmem:[#allocation2 + $0x40] sm:$0xff] %vm223_vm0, %v4415_v0  ;;  %233 = vst.msk [vmem:[#allocation2 + $0x48] sm:$0xff] %vm223_vm0, %v4415_v0  ;;  %v3839_v19 = vld [vmem:[%s4661_s15] sm:$0xff]   ;;  %v3902_v20 = vld [vmem:[%s4661_s15 + $0x8] sm:$0xff]   ;;  %vm2029_vm11 = vcmask 123904   ;;  %vm2495_vm12 = vcmask 654336  }
  0x19   : > { %234 = vst.msk [vmem:[#allocation2 + $0x50] sm:$0xff] %vm223_vm0, %v4415_v0  ;;  %235 = vst.msk [vmem:[#allocation2 + $0x58] sm:$0xff] %vm223_vm0, %v4415_v0  ;;  %4004 = vmatpush3.bf16.msra.mxu0 %v4314_v3  ;;  %v3903_v21 = vld [vmem:[%s4661_s15 + $0x10] sm:$0xff]   ;;  %v3840_v22 = vunpack.c.l.bf16 %v3839_v19  ;;  %v3841_v23 = vunpack.c.h.bf16 %v3839_v19  ;;  %v3844_v24 = vunpack.c.l.bf16 %v3902_v20  ;;  %v3845_v25 = vunpack.c.h.bf16 %v3902_v20  ;;  %v3904_v26 = vld [vmem:[%s4661_s15 + $0x18] sm:$0xff]  }
  0x1a   : > { %236 = vst.msk [vmem:[#allocation2 + $0x60] sm:$0xff] %vm223_vm0, %v4415_v0  ;;  %237 = vst.msk [vmem:[#allocation2 + $0x68] sm:$0xff] %vm223_vm0, %v4415_v0  ;;  %4005 = vmatprep.subr.bf16.mxu0 %v4415_v0  ;;  %v3905_v27 = vld [vmem:[%s4661_s15 + $0x20] sm:$0xff]   ;;  %v3906_v28 = vld [vmem:[%s4661_s15 + $0x28] sm:$0xff]   ;;  %v3848_v29 = vunpack.c.l.bf16 %v3903_v21  ;;  %v3849_v30 = vunpack.c.h.bf16 %v3903_v21  ;;  %v3852_v31 = vunpack.c.l.bf16 %v3904_v26  ;;  %v3853_v32 = vunpack.c.h.bf16 %v3904_v26 }
  0x1b   : > { %238 = vst.msk [vmem:[#allocation2 + $0x70] sm:$0xff] %vm223_vm0, %v4415_v0  ;;  %239 = vst.msk [vmem:[#allocation2 + $0x78] sm:$0xff] %vm223_vm0, %v4415_v0  ;;  %v493_v5 = vld [vmem:[#allocation2 + $0x12] sm:$0xff]  ;;  %v3856_v34 = vunpack.c.l.bf16 %v3905_v27  ;;  %v3857_v35 = vunpack.c.h.bf16 %v3905_v27  ;;  %v3860_v36 = vunpack.c.l.bf16 %v3906_v28  ;;  %v3861_v37 = vunpack.c.h.bf16 %v3906_v28 }
  0x1c   : > { %240 = vst.msk [vmem:[#allocation2 + $0x80] sm:$0xff] %vm223_vm0, %v4415_v0  ;;  %241 = vst.msk [vmem:[#allocation2 + $0x88] sm:$0xff] %vm223_vm0, %v4415_v0  ;;  %v494_v6 = vld [vmem:[#allocation2 + $0x1a] sm:$0xff]  ;;  %v3907_v33 = vld [vmem:[%s4661_s15 + $0x30] sm:$0xff]   ;;  %vm2510_vm13 = vcmask 785408   ;;  %vm2525_vm14 = vcmask 916480  }
  0x1d   : > { %242 = vst.msk [vmem:[#allocation2 + $0x90] sm:$0xff] %vm223_vm0, %v4415_v0  ;;  %243 = vst.msk [vmem:[#allocation2 + $0x98] sm:$0xff] %vm223_vm0, %v4415_v0  ;;  %v429_v7 = vld [vmem:[#allocation2 + $0x1] sm:$0xff]  ;;  %v4656_v8 = vpack.c.bf16 %v494_v6, %v493_v5  ;;  %v430_v9 = vld [vmem:[#allocation2 + $0x9] sm:$0xff]  ;;  %4006 = vmatpush3.bf16.msra.mxu0 %v4315_v4  ;;  %v3864_v42 = vunpack.c.l.bf16 %v3907_v33  ;;  %v3865_v43 = vunpack.c.h.bf16 %v3907_v33  ;;  %vm2872_vm15 = vcmask 254976  }
  0x1e   : > { %244 = vst.msk [vmem:[#allocation2 + $0xa0] sm:$0xff] %vm223_vm0, %v4415_v0  ;;  %245 = vst.msk [vmem:[#allocation2 + $0xa8] sm:$0xff] %vm223_vm0, %v4415_v0  ;;  %v558_v10 = vld [vmem:[#allocation2 + $0x13] sm:$0xff]  ;;  %v559_v11 = vld [vmem:[#allocation2 + $0x1b] sm:$0xff]  ;;  %v470_v12 = vpack.c.bf16 %v430_v9, %v429_v7  ;;  %4007 = vmatprep.subr.bf16.mxu0 %v4415_v0  ;;  %vm2864_vm1 = vcmask 257024  }
  0x1f   : > { %246 = vst.msk [vmem:[#allocation2 + $0xb0] sm:$0xff] %vm223_vm0, %v4415_v0  ;;  %247 = vst.msk [vmem:[#allocation2 + $0xb8] sm:$0xff] %vm223_vm0, %v4415_v0  ;;  %v491_v13 = vld [vmem:[#allocation2 + $0x2] sm:$0xff]  ;;  %v492_v14 = vld [vmem:[#allocation2 + $0xa] sm:$0xff]  ;;  %939 = vrot.lane.b32.xlu1 %v4656_v8, %s4416_s16  ;;  %v599_v15 = vpack.c.bf16 %v559_v11, %v558_v10 }
  0x20   : > { %248 = vst.msk [vmem:[#allocation2 + $0xc0] sm:$0xff] %vm223_vm0, %v4415_v0  ;;  %249 = vst.msk [vmem:[#allocation2 + $0xc8] sm:$0xff] %vm223_vm0, %v4415_v0  ;;  %v620_v16 = vld [vmem:[#allocation2 + $0x14] sm:$0xff]  ;;  %v621_v17 = vld [vmem:[#allocation2 + $0x1c] sm:$0xff]  ;;  %832 = vrot.lane.b32.xlu0 %v470_v12, %s4417_s17  ;;  %v532_v18 = vpack.c.bf16 %v492_v14, %v491_v13 }
  0x21   : > { %250 = vst.msk [vmem:[#allocation2 + $0xd0] sm:$0xff] %vm223_vm0, %v4415_v0  ;;  %251 = vst.msk [vmem:[#allocation2 + $0xd8] sm:$0xff] %vm223_vm0, %v4415_v0  ;;  %v3908_v38 = vld [vmem:[%s4661_s15 + $0x38] sm:$0xff]   ;;  %v661_v40 = vpack.c.bf16 %v621_v17, %v620_v16  ;;  %4008 = vmatpush3.bf16.msra.mxu0 %v4316_v39 }
  0x22   : > { %252 = vst.msk [vmem:[#allocation2 + $0xe0] sm:$0xff] %vm223_vm0, %v4415_v0  ;;  %253 = vst.msk [vmem:[#allocation2 + $0xe8] sm:$0xff] %vm223_vm0, %v4415_v0  ;;  %v431_v41 = vld [vmem:[#allocation2 + $0x11] sm:$0xff]  ;;  %v3868_v44 = vunpack.c.l.bf16 %v3908_v38  ;;  %v432_v45 = vld [vmem:[#allocation2 + $0x19] sm:$0xff]  ;;  %4009 = vmatprep.subr.bf16.mxu0 %v4415_v0  ;;  %v3869_v47 = vunpack.c.h.bf16 %v3908_v38 }
  0x23   : > { %254 = vst.msk [vmem:[#allocation2 + $0xf0] sm:$0xff] %vm223_vm0, %v4415_v0  ;;  %255 = vst.msk [vmem:[#allocation2 + $0xf8] sm:$0xff] %vm223_vm0, %v4415_v0  ;;  %1002 = vrot.lane.b32.xlu1 %v599_v15, %s4418_s23  ;;  %v471_v48 = vpack.c.bf16 %v432_v45, %v431_v41  ;;  %v3910_v38 = vld [vmem:[%s4661_s15 + $0x48] sm:$0xff]  }
  0x24   : > { %256 = vst.msk [vmem:[#allocation2 + $0x100] sm:$0xff] %vm223_vm0, %v4415_v0  ;;  %257 = vst.msk [vmem:[#allocation2 + $0x108] sm:$0xff] %vm223_vm0, %v4415_v0  ;;  %895 = vrot.lane.b32.xlu0 %v532_v18, %s4419_s30  ;;  %v3877_v41 = vunpack.c.h.bf16 %v3910_v38 }
  0x25   : > { %258 = vst.msk [vmem:[#allocation2 + $0x110] sm:$0xff] %vm223_vm0, %v4415_v0  ;;  %259 = vst.msk [vmem:[#allocation2 + $0x118] sm:$0xff] %vm223_vm0, %v4415_v0  ;;  %4010 = vmatpush3.bf16.msra.mxu0 %v4317_v46 }
  0x26   : > { %260 = vst.msk [vmem:[#allocation2 + $0x120] sm:$0xff] %vm223_vm0, %v4415_v0  ;;  %261 = vst.msk [vmem:[#allocation2 + $0x128] sm:$0xff] %vm223_vm0, %v4415_v0  ;;  %4241 = vmatprep.subr.bf16.mxu0 %v4415_v0 }
  0x27   : > { %262 = vst.msk [vmem:[#allocation2 + $0x130] sm:$0xff] %vm223_vm0, %v4415_v0  ;;  %263 = vst.msk [vmem:[#allocation2 + $0x138] sm:$0xff] %vm223_vm0, %v4415_v0  ;;  %897 = vrot.lane.b32.xlu1 %v4656_v8, %s4419_s30 }
  0x28   : > { %264 = vst.msk [vmem:[#allocation2 + $0x140] sm:$0xff] %vm223_vm0, %v4415_v0  ;;  %265 = vst.msk [vmem:[#allocation2 + $0x148] sm:$0xff] %vm223_vm0, %v4415_v0  ;;  %1065 = vrot.lane.b32.xlu0 %v661_v40, %s4421_s8  ;;  %v3876_v40 = vunpack.c.l.bf16 %v3910_v38  ;;  %v3914_v38 = vld [vmem:[%s4661_s15 + $0x68] sm:$0xff]  }
  0x29   : > { %266 = vst.msk [vmem:[#allocation2 + $0x150] sm:$0xff] %vm223_vm0, %v4415_v0  ;;  %267 = vst.msk [vmem:[#allocation2 + $0x158] sm:$0xff] %vm223_vm0, %v4415_v0 }
  0x2a   : > { %268 = vst.msk [vmem:[#allocation2 + $0x160] sm:$0xff] %vm223_vm0, %v4415_v0  ;;  %275 = vst.msk [vmem:[#allocation2 + $0x26] sm:$0xff] %vm223_vm0, %v3840_v22 }
  0x2b   : > { %2014 = vst.msk [vmem:[#allocation3] sm:$0xff] %vm1340_vm2, %v4415_v0  ;;  %2015 = vst.msk [vmem:[#allocation3 + $0x8] sm:$0xff] %vm1340_vm2, %v4415_v0 }
  0x2c   : > { %2016 = vst.msk [vmem:[#allocation3 + $0x10] sm:$0xff] %vm1340_vm2, %v4415_v0  ;;  %2017 = vst.msk [vmem:[#allocation3 + $0x18] sm:$0xff] %vm1340_vm2, %v4415_v0  ;;  %834 = vrot.lane.b32.xlu0 %v471_v48, %s4417_s17 }
  0x2d   : > { %2018 = vst.msk [vmem:[#allocation3 + $0x20] sm:$0xff] %vm1340_vm2, %v4415_v0  ;;  %2019 = vst.msk [vmem:[#allocation3 + $0x28] sm:$0xff] %vm1340_vm2, %v4415_v0 }
  0x2e   : > { %2020 = vst.msk [vmem:[#allocation3 + $0x30] sm:$0xff] %vm1340_vm2, %v4415_v0  ;;  %2021 = vst.msk [vmem:[#allocation3 + $0x38] sm:$0xff] %vm1340_vm2, %v4415_v0 }
  0x2f   : > { %2022 = vst.msk [vmem:[#allocation3 + $0x40] sm:$0xff] %vm1340_vm2, %v4415_v0  ;;  %2023 = vst.msk [vmem:[#allocation3 + $0x48] sm:$0xff] %vm1340_vm2, %v4415_v0 }
  0x30   : > { %2024 = vst.msk [vmem:[#allocation3 + $0x50] sm:$0xff] %vm1340_vm2, %v4415_v0  ;;  %2025 = vst.msk [vmem:[#allocation3 + $0x58] sm:$0xff] %vm1340_vm2, %v4415_v0 }
  0x31   : > { %2026 = vst.msk [vmem:[#allocation3 + $0x60] sm:$0xff] %vm1340_vm2, %v4415_v0  ;;  %2027 = vst.msk [vmem:[#allocation3 + $0x68] sm:$0xff] %vm1340_vm2, %v4415_v0  ;;  %v622_v49 = vld [vmem:[#allocation2 + $0x24] sm:$0xff] }
  0x32   : > { %2028 = vst.msk [vmem:[#allocation3 + $0x70] sm:$0xff] %vm1340_vm2, %v4415_v0  ;;  %v687_v51 = vld [vmem:[#allocation2 + $0x25] sm:$0xff] }
  0x33   : > { %2866 = vst.msk [vmem:[#allocation4] sm:$0xff] %vm1426_vm3, %v4415_v0  ;;  %2867 = vst.msk [vmem:[#allocation4 + $0x8] sm:$0xff] %vm1426_vm3, %v4415_v0  ;;  %v749_v54 = vld [vmem:[#allocation2 + $0x26] sm:$0xff] }
  0x34   : > { %2868 = vst.msk [vmem:[#allocation4 + $0x10] sm:$0xff] %vm1426_vm3, %v4415_v0  ;;  %2869 = vst.msk [vmem:[#allocation4 + $0x18] sm:$0xff] %vm1426_vm3, %v4415_v0  ;;  %v495_v58 = vld [vmem:[#allocation2 + $0x22] sm:$0xff] }
  0x35   : > { %2870 = vst.msk [vmem:[#allocation4 + $0x20] sm:$0xff] %vm1426_vm3, %v4415_v0  ;;  %2871 = vst.msk [vmem:[#allocation4 + $0x28] sm:$0xff] %vm1426_vm3, %v4415_v0  ;;  %v560_v60 = vld [vmem:[#allocation2 + $0x23] sm:$0xff] }
  0x36   : > { %276 = vst.msk [vmem:[#allocation2 + $0x2e] sm:$0xff] %vm223_vm0, %v3841_v23  ;;  %281 = vst.msk [vmem:[#allocation2 + $0x38] sm:$0xff] %vm223_vm0, %v3844_v24  ;;  %v433_v10 = vld [vmem:[#allocation2 + $0x21] sm:$0xff] }
  0x37   : > { %282 = vst.msk [vmem:[#allocation2 + $0x40] sm:$0xff] %vm223_vm0, %v3845_v25  ;;  %287 = vst.msk [vmem:[#allocation2 + $0x4a] sm:$0xff] %vm223_vm0, %v3848_v29 }
  0x38   : > { %288 = vst.msk [vmem:[#allocation2 + $0x52] sm:$0xff] %vm223_vm0, %v3849_v30  ;;  %293 = vst.msk [vmem:[#allocation2 + $0x5c] sm:$0xff] %vm223_vm0, %v3852_v31 }
  0x39   : > { %294 = vst.msk [vmem:[#allocation2 + $0x64] sm:$0xff] %vm223_vm0, %v3853_v32  ;;  %299 = vst.msk [vmem:[#allocation2 + $0x6e] sm:$0xff] %vm223_vm0, %v3856_v34 }
  0x3a   : > { %300 = vst.msk [vmem:[#allocation2 + $0x76] sm:$0xff] %vm223_vm0, %v3857_v35  ;;  %305 = vst.msk [vmem:[#allocation2 + $0x80] sm:$0xff] %vm223_vm0, %v3860_v36  ;;  %v3909_v35 = vld [vmem:[%s4661_s15 + $0x40] sm:$0xff]  }
  0x3b   : > { %306 = vst.msk [vmem:[#allocation2 + $0x88] sm:$0xff] %vm223_vm0, %v3861_v37  ;;  %311 = vst.msk [vmem:[#allocation2 + $0x92] sm:$0xff] %vm223_vm0, %v3864_v42  ;;  %v3872_v36 = vunpack.c.l.bf16 %v3909_v35  ;;  %v3873_v37 = vunpack.c.h.bf16 %v3909_v35  ;;  %v3911_v42 = vld [vmem:[%s4661_s15 + $0x50] sm:$0xff]  }
  0x3c   : > { %312 = vst.msk [vmem:[#allocation2 + $0x9a] sm:$0xff] %vm223_vm0, %v3865_v43  ;;  %317 = vst.msk [vmem:[#allocation2 + $0xa4] sm:$0xff] %vm223_vm0, %v3868_v44  ;;  %v3880_v46 = vunpack.c.l.bf16 %v3911_v42 }
  0x3d   : > { %318 = vst.msk [vmem:[#allocation2 + $0xac] sm:$0xff] %vm223_vm0, %v3869_v47  ;;  %v623_v50 = vld [vmem:[#allocation2 + $0x2c] sm:$0xff]  ;;  %v624_v1 = vld [vmem:[#allocation2 + $0x34] sm:$0xff]  ;;  %323 = vst.msk [vmem:[#allocation2 + $0xb6] sm:$0xff] %vm223_vm0, %v3872_v36  ;;  %v3881_v47 = vunpack.c.h.bf16 %v3911_v42  ;;  %v3892_v42 = vunpack.c.l.bf16 %v3914_v38 }
  0x3e   : > { %v662_v52 = vpack.c.bf16 %v623_v50, %v622_v49  ;;  %v688_v53 = vld [vmem:[#allocation2 + $0x2d] sm:$0xff]  ;;  %v625_v2 = vld [vmem:[#allocation2 + $0x3c] sm:$0xff]  ;;  %v626_v19 = vld [vmem:[#allocation2 + $0x44] sm:$0xff]  ;;  %324 = vst.msk [vmem:[#allocation2 + $0xbe] sm:$0xff] %vm223_vm0, %v3873_v37 }
  0x3f   : > { %v750_v55 = vld [vmem:[#allocation2 + $0x2e] sm:$0xff]  ;;  %v728_v56 = vpack.c.bf16 %v688_v53, %v687_v51  ;;  %v663_v3 = vpack.c.bf16 %v625_v2, %v624_v1  ;;  %v690_v5 = vld [vmem:[#allocation2 + $0x3d] sm:$0xff]  ;;  %v691_v22 = vld [vmem:[#allocation2 + $0x45] sm:$0xff]  ;;  %329 = vst.msk [vmem:[#allocation2 + $0xc8] sm:$0xff] %vm223_vm0, %v3876_v40 }
  0x40   : > { %1109 = vrot.lane.b32.xlu1 %v662_v52, %s4422_s9  ;;  %v790_v57 = vpack.c.bf16 %v750_v55, %v749_v54  ;;  %v496_v59 = vld [vmem:[#allocation2 + $0x2a] sm:$0xff]  ;;  %v689_v4 = vld [vmem:[#allocation2 + $0x35] sm:$0xff]  ;;  %v752_v7 = vld [vmem:[#allocation2 + $0x3e] sm:$0xff]  ;;  %330 = vst.msk [vmem:[#allocation2 + $0xd0] sm:$0xff] %vm223_vm0, %v3877_v41 }
  0x41   : > { %v561_v61 = vld [vmem:[#allocation2 + $0x2b] sm:$0xff]  ;;  %1172 = vrot.lane.b32.xlu0 %v728_v56, %s4423_s10  ;;  %v534_v62 = vpack.c.bf16 %v496_v59, %v495_v58  ;;  %v751_v6 = vld [vmem:[#allocation2 + $0x36] sm:$0xff]  ;;  %v729_v8 = vpack.c.bf16 %v690_v5, %v689_v4  ;;  %v499_v31 = vld [vmem:[#allocation2 + $0x42] sm:$0xff]  ;;  %335 = vst.msk [vmem:[#allocation2 + $0xda] sm:$0xff] %vm223_vm0, %v3880_v46 }
  0x42   : > { %v600_v63 = vpack.c.bf16 %v561_v61, %v560_v60  ;;  %v791_v9 = vpack.c.bf16 %v752_v7, %v751_v6  ;;  %v434_v11 = vld [vmem:[#allocation2 + $0x29] sm:$0xff]  ;;  %v497_v13 = vld [vmem:[#allocation2 + $0x32] sm:$0xff]  ;;  %v498_v14 = vld [vmem:[#allocation2 + $0x3a] sm:$0xff]  ;;  %336 = vst.msk [vmem:[#allocation2 + $0xe2] sm:$0xff] %vm223_vm0, %v3881_v47 }
  0x43   : > { %v472_v12 = vpack.c.bf16 %v434_v11, %v433_v10  ;;  %v562_v15 = vld [vmem:[#allocation2 + $0x33] sm:$0xff]  ;;  %v563_v16 = vld [vmem:[#allocation2 + $0x3b] sm:$0xff]  ;;  %v535_v17 = vpack.c.bf16 %v498_v14, %v497_v13  ;;  %v753_v24 = vld [vmem:[#allocation2 + $0x46] sm:$0xff]  ;;  %353 = vst.msk [vmem:[#allocation2 + $0x110] sm:$0xff] %vm223_vm0, %v3892_v42 }
  0x44   : > { %1235 = vrot.lane.b32.xlu1 %v790_v57, %s4424_s11  ;;  %v601_v18 = vpack.c.bf16 %v563_v16, %v562_v15  ;;  %v627_v20 = vld [vmem:[#allocation2 + $0x4c] sm:$0xff]  ;;  %v436_v29 = vld [vmem:[#allocation2 + $0x39] sm:$0xff]  ;;  %v564_v33 = vld [vmem:[#allocation2 + $0x43] sm:$0xff]  ;;  %2030 = vst.msk [vmem:[#allocation3 + $0x78] sm:$0x3] %vm2029_vm11, %v4415_v0  ;;  %vm269_vm11 = vcmask 58368  }
  0x45   : > { %941 = vrot.lane.b32.xlu0 %v534_v62, %s4416_s16  ;;  %v664_v21 = vpack.c.bf16 %v627_v20, %v626_v19  ;;  %v692_v23 = vld [vmem:[#allocation2 + $0x4d] sm:$0xff]  ;;  %v629_v45 = vld [vmem:[#allocation2 + $0x5c] sm:$0xff]  ;;  %v630_v1 = vld [vmem:[#allocation2 + $0x64] sm:$0xff]  ;;  %2873 = vst.msk [vmem:[#allocation4 + $0x30] sm:$0x3] %vm2872_vm15, %v4415_v0 }
  0x46   : > { %v754_v25 = vld [vmem:[#allocation2 + $0x4e] sm:$0xff]  ;;  %v730_v26 = vpack.c.bf16 %v692_v23, %v691_v22  ;;  %v694_v49 = vld [vmem:[#allocation2 + $0x5d] sm:$0xff]  ;;  %v757_v5 = vld [vmem:[#allocation2 + $0x66] sm:$0xff]  ;;  %270 = vst.msk [vmem:[#allocation2 + $0x168] sm:$0x3] %vm269_vm11, %v4415_v0 }
  0x47   : > { %v792_v27 = vpack.c.bf16 %v754_v25, %v753_v24  ;;  %v435_v28 = vld [vmem:[#allocation2 + $0x31] sm:$0xff]  ;;  %v756_v51 = vld [vmem:[#allocation2 + $0x5e] sm:$0xff]  ;;  %v438_v56 = vld [vmem:[#allocation2 + $0x49] sm:$0xff] }
  0x48   : > { %1004 = vrot.lane.b32.xlu1 %v600_v63, %s4418_s23  ;;  %v473_v30 = vpack.c.bf16 %v436_v29, %v435_v28  ;;  %v500_v32 = vld [vmem:[#allocation2 + $0x4a] sm:$0xff]  ;;  %v628_v44 = vld [vmem:[#allocation2 + $0x54] sm:$0xff]  ;;  %v437_v55 = vld [vmem:[#allocation2 + $0x41] sm:$0xff] }
  0x49   : > { %1067 = vrot.lane.b32.xlu0 %v662_v52, %s4421_s8  ;;  %v565_v34 = vld [vmem:[#allocation2 + $0x4b] sm:$0xff]  ;;  %v536_v39 = vpack.c.bf16 %v500_v32, %v499_v31  ;;  %v693_v48 = vld [vmem:[#allocation2 + $0x55] sm:$0xff]  ;;  %v665_v52 = vpack.c.bf16 %v629_v45, %v628_v44  ;;  %v474_v57 = vpack.c.bf16 %v438_v56, %v437_v55  ;;  %v503_v15 = vld [vmem:[#allocation2 + $0x62] sm:$0xff] }
  0x4a   : > { %v602_v43 = vpack.c.bf16 %v565_v34, %v564_v33  ;;  %v755_v50 = vld [vmem:[#allocation2 + $0x56] sm:$0xff]  ;;  %v731_v53 = vpack.c.bf16 %v694_v49, %v693_v48  ;;  %v631_v2 = vld [vmem:[#allocation2 + $0x6c] sm:$0xff]  ;;  %v568_v19 = vld [vmem:[#allocation2 + $0x63] sm:$0xff] }
  0x4b   : > { %v793_v54 = vpack.c.bf16 %v756_v51, %v755_v50  ;;  %v501_v58 = vld [vmem:[#allocation2 + $0x52] sm:$0xff]  ;;  %v502_v59 = vld [vmem:[#allocation2 + $0x5a] sm:$0xff]  ;;  %v504_v16 = vld [vmem:[#allocation2 + $0x6a] sm:$0xff] }
  0x4c   : > { %1111 = vrot.lane.b32.xlu1 %v663_v3, %s4422_s9  ;;  %v566_v60 = vld [vmem:[#allocation2 + $0x53] sm:$0xff]  ;;  %v567_v61 = vld [vmem:[#allocation2 + $0x5b] sm:$0xff]  ;;  %v569_v20 = vld [vmem:[#allocation2 + $0x6b] sm:$0xff]  ;;  %v538_v22 = vpack.c.bf16 %v504_v16, %v503_v15 }
  0x4d   : > { %1174 = vrot.lane.b32.xlu0 %v729_v8, %s4423_s10  ;;  %v603_v63 = vpack.c.bf16 %v567_v61, %v566_v60  ;;  %v696_v4 = vld [vmem:[#allocation2 + $0x6d] sm:$0xff]  ;;  %v3912_v7 = vld [vmem:[%s4661_s15 + $0x58] sm:$0xff]   ;;  %v666_v8 = vpack.c.bf16 %v631_v2, %v630_v1  ;;  %v604_v23 = vpack.c.bf16 %v569_v20, %v568_v19  ;;  %v441_v33 = vld [vmem:[#allocation2 + $0x61] sm:$0xff] }
  0x4e   : > { %v758_v6 = vld [vmem:[#allocation2 + $0x6e] sm:$0xff]  ;;  %v3885_v10 = vunpack.c.h.bf16 %v3912_v7  ;;  %v633_v25 = vld [vmem:[#allocation2 + $0x7c] sm:$0xff]  ;;  %v634_v45 = vld [vmem:[#allocation2 + $0x84] sm:$0xff] }
  0x4f   : > { %v439_v11 = vld [vmem:[#allocation2 + $0x51] sm:$0xff]  ;;  %v794_v14 = vpack.c.bf16 %v758_v6, %v757_v5  ;;  %v698_v28 = vld [vmem:[#allocation2 + $0x7d] sm:$0xff]  ;;  %v442_v34 = vld [vmem:[#allocation2 + $0x69] sm:$0xff] }
  0x50   : > { %1237 = vrot.lane.b32.xlu1 %v791_v9, %s4424_s11  ;;  %v3884_v9 = vunpack.c.l.bf16 %v3912_v7  ;;  %342 = vst.msk [vmem:[#allocation2 + $0xf4] sm:$0xff] %vm223_vm0, %v3885_v10  ;;  %v632_v24 = vld [vmem:[#allocation2 + $0x74] sm:$0xff]  ;;  %v476_v35 = vpack.c.bf16 %v442_v34, %v441_v33  ;;  %v635_v46 = vld [vmem:[#allocation2 + $0x8c] sm:$0xff]  ;;  %v572_v60 = vld [vmem:[#allocation2 + $0x83] sm:$0xff] }
  0x51   : > { %836 = vrot.lane.b32.xlu0 %v472_v12, %s4417_s17  ;;  %v440_v12 = vld [vmem:[#allocation2 + $0x59] sm:$0xff]  ;;  %v668_v47 = vpack.c.bf16 %v635_v46, %v634_v45  ;;  %v699_v48 = vld [vmem:[#allocation2 + $0x85] sm:$0xff]  ;;  %v700_v49 = vld [vmem:[#allocation2 + $0x8d] sm:$0xff] }
  0x52   : > { %341 = vst.msk [vmem:[#allocation2 + $0xec] sm:$0xff] %vm223_vm0, %v3884_v9  ;;  %v759_v29 = vld [vmem:[#allocation2 + $0x76] sm:$0xff]  ;;  %v761_v50 = vld [vmem:[#allocation2 + $0x86] sm:$0xff]  ;;  %v762_v51 = vld [vmem:[#allocation2 + $0x8e] sm:$0xff] }
  0x53   : > { %v505_v36 = vld [vmem:[#allocation2 + $0x72] sm:$0xff]  ;;  %v506_v37 = vld [vmem:[#allocation2 + $0x7a] sm:$0xff]  ;;  %v368_v1 = vld [vmem:[#allocation2 + $0x8] sm:$0xff] }
  0x54   : > { %899 = vrot.lane.b32.xlu1 %v534_v62, %s4419_s30  ;;  %v537_v62 = vpack.c.bf16 %v502_v59, %v501_v58  ;;  %v571_v40 = vld [vmem:[#allocation2 + $0x7b] sm:$0xff]  ;;  %v508_v58 = vld [vmem:[#allocation2 + $0x8a] sm:$0xff]  ;;  %v574_v33 = vld [vmem:[#allocation2 + $0x93] sm:$0xff] }
  0x55   : > { %943 = vrot.lane.b32.xlu0 %v535_v17, %s4416_s16  ;;  %v444_v55 = vld [vmem:[#allocation2 + $0x79] sm:$0xff]  ;;  %v3915_v59 = vld [vmem:[%s4661_s15 + $0x70] sm:$0xff]   ;;  %v638_v45 = vld [vmem:[#allocation2 + $0xa4] sm:$0xff] }
  0x56   : > { %v573_v61 = vld [vmem:[#allocation2 + $0x8b] sm:$0xff]  ;;  %v367_v2 = vld [vmem:[#allocation2] sm:$0xff]  ;;  %v636_v7 = vld [vmem:[#allocation2 + $0x94] sm:$0xff] }
  0x57   : > { %v606_v5 = vpack.c.bf16 %v573_v61, %v572_v60  ;;  %v408_v9 = vpack.c.bf16 %v368_v1, %v367_v2  ;;  %v763_v15 = vld [vmem:[#allocation2 + $0x96] sm:$0xff]  ;;  %v764_v16 = vld [vmem:[#allocation2 + $0x9e] sm:$0xff]  ;;  %v639_v46 = vld [vmem:[#allocation2 + $0xac] sm:$0xff] }
  0x58   : > { %1006 = vrot.lane.b32.xlu1 %v601_v18, %s4418_s23  ;;  %v3913_v18 = vld [vmem:[%s4661_s15 + $0x60] sm:$0xff]  }
  0x59   : > { %1069 = vrot.lane.b32.xlu0 %v663_v3, %s4421_s8  ;;  %v695_v3 = vld [vmem:[#allocation2 + $0x65] sm:$0xff]  ;;  %v3889_v41 = vunpack.c.h.bf16 %v3913_v18  ;;  %v575_v34 = vld [vmem:[#allocation2 + $0x9b] sm:$0xff] }
  0x5a   : > { %v732_v13 = vpack.c.bf16 %v696_v4, %v695_v3 }
  0x5b   : > { %348 = vst.msk [vmem:[#allocation2 + $0x106] sm:$0xff] %vm223_vm0, %v3889_v41  ;;  %v607_v41 = vpack.c.bf16 %v575_v34, %v574_v33 }
  0x5c   : > { %1113 = vrot.lane.b32.xlu1 %v664_v21, %s4422_s9 }
  0x5d   : > { %1176 = vrot.lane.b32.xlu0 %v730_v26, %s4423_s10  ;;  %v667_v26 = vpack.c.bf16 %v633_v25, %v632_v24 }
  0x60   : > { %1239 = vrot.lane.b32.xlu1 %v792_v27, %s4424_s11  ;;  %v697_v27 = vld [vmem:[#allocation2 + $0x75] sm:$0xff] }
  0x61   : > { %838 = vrot.lane.b32.xlu0 %v473_v30, %s4417_s17  ;;  %v760_v30 = vld [vmem:[#allocation2 + $0x7e] sm:$0xff]  ;;  %v733_v31 = vpack.c.bf16 %v698_v28, %v697_v27 }
  0x62   : > { %v795_v32 = vpack.c.bf16 %v760_v30, %v759_v29  ;;  %v370_v27 = vld [vmem:[#allocation2 + $0x18] sm:$0xff] }
  0x63   : > { %v509_v29 = vld [vmem:[#allocation2 + $0x92] sm:$0xff]  ;;  %v510_v30 = vld [vmem:[#allocation2 + $0x9a] sm:$0xff] }
  0x64   : > { %901 = vrot.lane.b32.xlu1 %v535_v17, %s4419_s30  ;;  %v475_v17 = vpack.c.bf16 %v440_v12, %v439_v11  ;;  %v701_v12 = vld [vmem:[#allocation2 + $0x95] sm:$0xff] }
  0x65   : > { %945 = vrot.lane.b32.xlu0 %v536_v39, %s4416_s16 }
  0x68   : > { %1008 = vrot.lane.b32.xlu1 %v602_v43, %s4418_s23  ;;  %v539_v43 = vpack.c.bf16 %v506_v37, %v505_v36 }
  0x69   : > { %1071 = vrot.lane.b32.xlu0 %v664_v21, %s4421_s8  ;;  %v3888_v21 = vunpack.c.l.bf16 %v3913_v18 }
  0x6b   : > { %347 = vst.msk [vmem:[#allocation2 + $0xfe] sm:$0xff] %vm223_vm0, %v3888_v21  ;;  %v797_v21 = vpack.c.bf16 %v764_v16, %v763_v15 }
  0x6c   : > { %1115 = vrot.lane.b32.xlu1 %v665_v52, %s4422_s9 }
  0x6d   : > { %1178 = vrot.lane.b32.xlu0 %v731_v53, %s4423_s10  ;;  %v796_v53 = vpack.c.bf16 %v762_v51, %v761_v50  ;;  %v670_v51 = vpack.c.bf16 %v639_v46, %v638_v45  ;;  %v374_v45 = vld [vmem:[#allocation2 + $0x38] sm:$0xff] }
  0x6e   : > { %v513_v46 = vld [vmem:[#allocation2 + $0xb2] sm:$0xff] }
  0x70   : > { %1241 = vrot.lane.b32.xlu1 %v793_v54, %s4424_s11  ;;  %v443_v54 = vld [vmem:[#allocation2 + $0x71] sm:$0xff] }
  0x71   : > { %840 = vrot.lane.b32.xlu0 %v474_v57, %s4417_s17  ;;  %v477_v56 = vpack.c.bf16 %v444_v55, %v443_v54  ;;  %v507_v57 = vld [vmem:[#allocation2 + $0x82] sm:$0xff] }
  0x72   : > { %v540_v3 = vpack.c.bf16 %v508_v58, %v507_v57  ;;  %v766_v57 = vld [vmem:[#allocation2 + $0xae] sm:$0xff] }
  0x74   : > { %903 = vrot.lane.b32.xlu1 %v536_v39, %s4419_s30  ;;  %v570_v39 = vld [vmem:[#allocation2 + $0x73] sm:$0xff] }
  0x75   : > { %947 = vrot.lane.b32.xlu0 %v537_v62, %s4416_s16  ;;  %v605_v44 = vpack.c.bf16 %v571_v40, %v570_v39  ;;  %v3916_v39 = vld [vmem:[%s4661_s15 + $0x78] sm:$0xff]  }
  0x76   : > { %v3900_v42 = vunpack.c.l.bf16 %v3916_v39 }
  0x78   : > { %1010 = vrot.lane.b32.xlu1 %v603_v63, %s4418_s23  ;;  %v3896_v63 = vunpack.c.l.bf16 %v3915_v59  ;;  %365 = vst.msk [vmem:[#allocation2 + $0x134] sm:$0xff] %vm223_vm0, %v3900_v42 }
  0x79   : > { %1073 = vrot.lane.b32.xlu0 %v665_v52, %s4421_s8  ;;  %v734_v52 = vpack.c.bf16 %v700_v49, %v699_v48 }
  0x7a   : > { %359 = vst.msk [vmem:[#allocation2 + $0x122] sm:$0xff] %vm223_vm0, %v3896_v63  ;;  %v448_v63 = vld [vmem:[#allocation2 + $0x99] sm:$0xff] }
  0x7c   : > { %1117 = vrot.lane.b32.xlu1 %v666_v8, %s4422_s9 }
  0x7d   : > { %1180 = vrot.lane.b32.xlu0 %v732_v13, %s4423_s10  ;;  %v702_v13 = vld [vmem:[#allocation2 + $0x9d] sm:$0xff] }
  0x7e   : > { %v735_v19 = vpack.c.bf16 %v702_v13, %v701_v12  ;;  %v576_v12 = vld [vmem:[#allocation2 + $0xa3] sm:$0xff]  ;;  %v577_v13 = vld [vmem:[#allocation2 + $0xab] sm:$0xff] }
  0x80   : > { %1243 = vrot.lane.b32.xlu1 %v794_v14, %s4424_s11 }
  0x81   : > { %842 = vrot.lane.b32.xlu0 %v475_v17, %s4417_s17 }
  0x84   : > { %905 = vrot.lane.b32.xlu1 %v537_v62, %s4419_s30  ;;  %v3893_v62 = vunpack.c.h.bf16 %v3914_v38  ;;  %v541_v38 = vpack.c.bf16 %v510_v30, %v509_v29 }
  0x85   : > { %949 = vrot.lane.b32.xlu0 %v538_v22, %s4416_s16 }
  0x86   : > { %354 = vst.msk [vmem:[#allocation2 + $0x118] sm:$0xff] %vm223_vm0, %v3893_v62  ;;  %v447_v62 = vld [vmem:[#allocation2 + $0x91] sm:$0xff] }
  0x88   : > { %1012 = vrot.lane.b32.xlu1 %v604_v23, %s4418_s23  ;;  %v446_v23 = vld [vmem:[#allocation2 + $0x89] sm:$0xff] }
  0x89   : > { %1075 = vrot.lane.b32.xlu0 %v666_v8, %s4421_s8  ;;  %v637_v8 = vld [vmem:[#allocation2 + $0x9c] sm:$0xff] }
  0x8a   : > { %v4783_v11 = vpack.c.bf16 %v637_v8, %v636_v7  ;;  %v372_v7 = vld [vmem:[#allocation2 + $0x28] sm:$0xff] }
  0x8b   : > { %v511_v8 = vld [vmem:[#allocation2 + $0xa2] sm:$0xff] }
  0x8c   : > { %1119 = vrot.lane.b32.xlu1 %v667_v26, %s4422_s9 }
  0x8d   : > { %1182 = vrot.lane.b32.xlu0 %v733_v31, %s4423_s10 }
  0x90   : > { %1245 = vrot.lane.b32.xlu1 %v795_v32, %s4424_s11 }
  0x91   : > { %844 = vrot.lane.b32.xlu0 %v476_v35, %s4417_s17  ;;  %v940_v4 = vpop.permute.xlu1 %939  ;;  %v3897_v35 = vunpack.c.h.bf16 %v3915_v59 }
  0x92   : > { %v833_v6 = vpop.permute.xlu0 %832 }
  0x93   : > { %v1279_v17 = vsel %vm223_vm0, %v408_v9, %v833_v6  ;;  %360 = vst.msk [vmem:[#allocation2 + $0x12a] sm:$0xff] %vm223_vm0, %v3897_v35  ;;  %v371_v6 = vld [vmem:[#allocation2 + $0x20] sm:$0xff]  ;;  %v512_v9 = vld [vmem:[#allocation2 + $0xaa] sm:$0xff] }
  0x94   : > { %907 = vrot.lane.b32.xlu1 %v538_v22, %s4419_s30  ;;  %v445_v22 = vld [vmem:[#allocation2 + $0x81] sm:$0xff] }
  0x95   : > { %951 = vrot.lane.b32.xlu0 %v539_v43, %s4416_s16  ;;  %v1003_v10 = vpop.permute.xlu1 %1002  ;;  %v478_v28 = vpack.c.bf16 %v446_v23, %v445_v22  ;;  %v640_v22 = vld [vmem:[#allocation2 + $0xb4] sm:$0xff]  ;;  %v641_v23 = vld [vmem:[#allocation2 + $0xbc] sm:$0xff] }
  0x96   : > { %v896_v14 = vpop.permute.xlu0 %895 }
  0x97   : > { %v1342_v18 = vsel %vm1340_vm2, %v1279_v17, %v896_v14  ;;  %v3901_v14 = vunpack.c.h.bf16 %v3916_v39  ;;  %v410_v17 = vpack.c.bf16 %v372_v7, %v371_v6  ;;  %v770_v6 = vld [vmem:[#allocation2 + $0xce] sm:$0xff] }
  0x98   : > { %1014 = vrot.lane.b32.xlu1 %v605_v44, %s4418_s23  ;;  %v1385_v25 = vsel %vm1383_vm5, %v1342_v18, %v940_v4 }
  0x99   : > { %1077 = vrot.lane.b32.xlu0 %v667_v26, %s4421_s8  ;;  %v898_v20 = vpop.permute.xlu1 %897  ;;  %v369_v26 = vld [vmem:[#allocation2 + $0x10] sm:$0xff]  ;;  %v1428_v31 = vsel %vm1426_vm3, %v1385_v25, %v1003_v10  ;;  %366 = vst.msk [vmem:[#allocation2 + $0x13c] sm:$0xff] %vm223_vm0, %v3901_v14 }
  0x9a   : > { %v1066_v24 = vpop.permute.xlu0 %1065  ;;  %v409_v36 = vpack.c.bf16 %v370_v27, %v369_v26  ;;  %v671_v26 = vpack.c.bf16 %v641_v23, %v640_v22  ;;  %v705_v27 = vld [vmem:[#allocation2 + $0xb5] sm:$0xff] }
  0x9b   : > { %v1471_v40 = vsel %vm1469_vm6, %v1428_v31, %v1066_v24  ;;  %v767_v31 = vld [vmem:[#allocation2 + $0xb6] sm:$0xff] }
  0x9c   : > { %1121 = vrot.lane.b32.xlu1 %v668_v47, %s4422_s9 }
  0x9d   : > { %1184 = vrot.lane.b32.xlu0 %v734_v52, %s4423_s10  ;;  %v703_v52 = vld [vmem:[#allocation2 + $0xa5] sm:$0xff] }
  0x9e   : > { %v835_v32 = vpop.permute.xlu0 %834 }
  0xa0   : > { %1247 = vrot.lane.b32.xlu1 %v796_v53, %s4424_s11  ;;  %v704_v53 = vld [vmem:[#allocation2 + $0xad] sm:$0xff] }
  0xa1   : > { %846 = vrot.lane.b32.xlu0 %v477_v56, %s4417_s17  ;;  %v765_v56 = vld [vmem:[#allocation2 + $0xa6] sm:$0xff]  ;;  %v736_v60 = vpack.c.bf16 %v704_v53, %v703_v52 }
  0xa2   : > { %v798_v61 = vpack.c.bf16 %v766_v57, %v765_v56 }
  0xa4   : > { %909 = vrot.lane.b32.xlu1 %v539_v43, %s4419_s30 }
  0xa5   : > { %953 = vrot.lane.b32.xlu0 %v540_v3, %s4416_s16 }
  0xa8   : > { %1016 = vrot.lane.b32.xlu1 %v606_v5, %s4418_s23  ;;  %v479_v5 = vpack.c.bf16 %v448_v63, %v447_v62 }
  0xa9   : > { %1079 = vrot.lane.b32.xlu0 %v668_v47, %s4421_s8  ;;  %v1282_v47 = vsel %vm223_vm0, %v409_v36, %v835_v32  ;;  %v768_v32 = vld [vmem:[#allocation2 + $0xbe] sm:$0xff] }
  0xaa   : > { %v1344_v54 = vsel %vm1340_vm2, %v1282_v47, %v898_v20  ;;  %v608_v20 = vpack.c.bf16 %v577_v13, %v576_v12  ;;  %v799_v36 = vpack.c.bf16 %v768_v32, %v767_v31  ;;  %v514_v47 = vld [vmem:[#allocation2 + $0xba] sm:$0xff] }
  0xab   : > { %v543_v56 = vpack.c.bf16 %v514_v47, %v513_v46  ;;  %v452_v12 = vld [vmem:[#allocation2 + $0xb9] sm:$0xff] }
  0xac   : > { %1123 = vrot.lane.b32.xlu1 %v4783_v11, %s4422_s9 }
  0xad   : > { %1186 = vrot.lane.b32.xlu0 %v735_v19, %s4423_s10  ;;  %v542_v19 = vpack.c.bf16 %v512_v9, %v511_v8 }
  0xb0   : > { %1249 = vrot.lane.b32.xlu1 %v797_v21, %s4424_s11 }
  0xb1   : > { %848 = vrot.lane.b32.xlu0 %v478_v28, %s4417_s17  ;;  %v706_v28 = vld [vmem:[#allocation2 + $0xbd] sm:$0xff] }
  0xb2   : > { %v1110_v37 = vpop.permute.xlu1 %1109  ;;  %v737_v35 = vpack.c.bf16 %v706_v28, %v705_v27 }
  0xb3   : > { %v1514_v43 = vsel %vm1512_vm7, %v1471_v40, %v1110_v37  ;;  %v1173_v44 = vpop.permute.xlu0 %1172  ;;  %v449_v37 = vld [vmem:[#allocation2 + $0xa1] sm:$0xff] }
  0xb4   : > { %911 = vrot.lane.b32.xlu1 %v540_v3, %s4419_s30  ;;  %v1557_v48 = vsel %vm1555_vm8, %v1514_v43, %v1173_v44  ;;  %v373_v44 = vld [vmem:[#allocation2 + $0x30] sm:$0xff] }
  0xb5   : > { %955 = vrot.lane.b32.xlu0 %v541_v38, %s4416_s16 }
  0xb6   : > { %v1236_v49 = vpop.permute.xlu1 %1235 }
  0xb7   : > { %v1600_v50 = vsel %vm1598_vm9, %v1557_v48, %v1236_v49  ;;  %v942_v55 = vpop.permute.xlu0 %941 }
  0xb8   : > { %4012 = vmatmul.mubr.msk.bf16.vlgmr.msra.gmra.mxu0 %vm1684_vm10, %v1600_v50  ;;  %1018 = vrot.lane.b32.xlu1 %v607_v41, %s4418_s23  ;;  %v1387_v58 = vsel %vm1383_vm5, %v1344_v54, %v942_v55  ;;  %v578_v50 = vld [vmem:[#allocation2 + $0xb3] sm:$0xff]  ;;  %v411_v54 = vpack.c.bf16 %v374_v45, %v373_v44 }
  0xb9   : > { %4015 = vmatprep.mubr.msk.bf16.mxu0 %vm4420_vm4, %v4415_v0  ;;  %1081 = vrot.lane.b32.xlu0 %v4783_v11, %s4421_s8 }
  0xba   : > { %v1005_v59 = vpop.permute.xlu1 %1004 }
  0xbb   : > { %v1430_v1 = vsel %vm1426_vm3, %v1387_v58, %v1005_v59  ;;  %v1068_v2 = vpop.permute.xlu0 %1067  ;;  %v642_v59 = vld [vmem:[#allocation2 + $0xc4] sm:$0xff] }
  0xbc   : > { %1125 = vrot.lane.b32.xlu1 %v670_v51, %s4422_s9  ;;  %v1473_v3 = vsel %vm1469_vm6, %v1430_v1, %v1068_v2  ;;  %v707_v1 = vld [vmem:[#allocation2 + $0xc5] sm:$0xff]  ;;  %v708_v2 = vld [vmem:[#allocation2 + $0xcd] sm:$0xff] }
  0xbd   : > { %1188 = vrot.lane.b32.xlu0 %v736_v60, %s4423_s10  ;;  %v643_v60 = vld [vmem:[#allocation2 + $0xcc] sm:$0xff]  ;;  %v738_v9 = vpack.c.bf16 %v708_v2, %v707_v1 }
  0xbe   : > { %v1112_v4 = vpop.permute.xlu1 %1111  ;;  %v672_v63 = vpack.c.bf16 %v643_v60, %v642_v59 }
  0xbf   : > { %v1516_v10 = vsel %vm1512_vm7, %v1473_v3, %v1112_v4  ;;  %v1175_v11 = vpop.permute.xlu0 %1174 }
  0xc0   : > { %1251 = vrot.lane.b32.xlu1 %v798_v61, %s4424_s11  ;;  %v1559_v15 = vsel %vm1555_vm8, %v1516_v10, %v1175_v11  ;;  %v451_v11 = vld [vmem:[#allocation2 + $0xb1] sm:$0xff] }
  0xc1   : > { %850 = vrot.lane.b32.xlu0 %v479_v5, %s4417_s17  ;;  %v769_v5 = vld [vmem:[#allocation2 + $0xc6] sm:$0xff] }
  0xc2   : > { %v1238_v16 = vpop.permute.xlu1 %1237  ;;  %v800_v10 = vpack.c.bf16 %v770_v6, %v769_v5 }
  0xc3   : > { %v1602_v18 = vsel %vm1598_vm9, %v1559_v15, %v1238_v16  ;;  %v837_v21 = vpop.permute.xlu0 %836 }
  0xc4   : > { %913 = vrot.lane.b32.xlu1 %v541_v38, %s4419_s30  ;;  %4016 = vmatmul.mubr.msk.bf16.gmra.mxu0 %vm1684_vm10, %v1602_v18  ;;  %v1285_v24 = vsel %vm223_vm0, %v410_v17, %v837_v21  ;;  %v450_v38 = vld [vmem:[#allocation2 + $0xa9] sm:$0xff]  ;;  %v481_v17 = vpack.c.bf16 %v452_v12, %v451_v11  ;;  %v375_v18 = vld [vmem:[#allocation2 + $0x40] sm:$0xff] }
  0xc5   : > { %4019 = vmatprep.mubr.msk.bf16.mxu0 %vm4420_vm4, %v4415_v0  ;;  %957 = vrot.lane.b32.xlu0 %v542_v19, %s4416_s16  ;;  %v480_v43 = vpack.c.bf16 %v450_v38, %v449_v37  ;;  %v516_v21 = vld [vmem:[#allocation2 + $0xca] sm:$0xff]  ;;  %v709_v38 = vld [vmem:[#allocation2 + $0xd5] sm:$0xff] }
  0xc6   : > { %v900_v25 = vpop.permute.xlu1 %899  ;;  %v711_v12 = vld [vmem:[#allocation2 + $0xe5] sm:$0xff] }
  0xc7   : > { %v1346_v29 = vsel %vm1340_vm2, %v1285_v24, %v900_v25  ;;  %v944_v30 = vpop.permute.xlu0 %943  ;;  %v580_v24 = vld [vmem:[#allocation2 + $0xc3] sm:$0xff]  ;;  %v581_v25 = vld [vmem:[#allocation2 + $0xcb] sm:$0xff] }
  0xc8   : > { %1020 = vrot.lane.b32.xlu1 %v608_v20, %s4418_s23  ;;  %v1389_v33 = vsel %vm1383_vm5, %v1346_v29, %v944_v30  ;;  %v515_v20 = vld [vmem:[#allocation2 + $0xc2] sm:$0xff]  ;;  %v610_v31 = vpack.c.bf16 %v581_v25, %v580_v24 }
  0xc9   : > { %1083 = vrot.lane.b32.xlu0 %v670_v51, %s4421_s8  ;;  %v579_v51 = vld [vmem:[#allocation2 + $0xbb] sm:$0xff]  ;;  %v544_v30 = vpack.c.bf16 %v516_v21, %v515_v20 }
  0xca   : > { %v1007_v34 = vpop.permute.xlu1 %1006  ;;  %v609_v57 = vpack.c.bf16 %v579_v51, %v578_v50 }
  0xcb   : > { %v1432_v39 = vsel %vm1426_vm3, %v1389_v33, %v1007_v34  ;;  %v1070_v40 = vpop.permute.xlu0 %1069  ;;  %v644_v33 = vld [vmem:[#allocation2 + $0xd4] sm:$0xff]  ;;  %v645_v34 = vld [vmem:[#allocation2 + $0xdc] sm:$0xff] }
  0xcc   : > { %1127 = vrot.lane.b32.xlu1 %v671_v26, %s4422_s9  ;;  %v1475_v41 = vsel %vm1469_vm6, %v1432_v39, %v1070_v40  ;;  %v673_v37 = vpack.c.bf16 %v645_v34, %v644_v33  ;;  %v710_v39 = vld [vmem:[#allocation2 + $0xdd] sm:$0xff] }
  0xcd   : > { %1190 = vrot.lane.b32.xlu0 %v737_v35, %s4423_s10  ;;  %v739_v46 = vpack.c.bf16 %v710_v39, %v709_v38 }
  0xce   : > { %v1114_v42 = vpop.permute.xlu1 %1113 }
  0xcf   : > { %v1518_v48 = vsel %vm1512_vm7, %v1475_v41, %v1114_v42  ;;  %v1177_v49 = vpop.permute.xlu0 %1176  ;;  %v771_v42 = vld [vmem:[#allocation2 + $0xd6] sm:$0xff] }
  0xd0   : > { %1253 = vrot.lane.b32.xlu1 %v799_v36, %s4424_s11  ;;  %v1561_v52 = vsel %vm1555_vm8, %v1518_v48, %v1177_v49  ;;  %v453_v48 = vld [vmem:[#allocation2 + $0xc1] sm:$0xff]  ;;  %v454_v49 = vld [vmem:[#allocation2 + $0xc9] sm:$0xff] }
  0xd1   : > { %852 = vrot.lane.b32.xlu0 %v480_v43, %s4417_s17  ;;  %v772_v43 = vld [vmem:[#allocation2 + $0xde] sm:$0xff] }
  0xd2   : > { %v1240_v53 = vpop.permute.xlu1 %1239  ;;  %v801_v47 = vpack.c.bf16 %v772_v43, %v771_v42 }
  0xd3   : > { %v1604_v55 = vsel %vm1598_vm9, %v1561_v52, %v1240_v53  ;;  %v839_v58 = vpop.permute.xlu0 %838 }
  0xd4   : > { %915 = vrot.lane.b32.xlu1 %v542_v19, %s4419_s30  ;;  %4020 = vmatmul.mubr.msk.bf16.gmra.mxu0 %vm1684_vm10, %v1604_v55  ;;  %v1288_v61 = vsel %vm223_vm0, %v411_v54, %v839_v58  ;;  %v376_v19 = vld [vmem:[#allocation2 + $0x48] sm:$0xff]  ;;  %v482_v54 = vpack.c.bf16 %v454_v49, %v453_v48  ;;  %v377_v55 = vld [vmem:[#allocation2 + $0x50] sm:$0xff]  ;;  %v518_v58 = vld [vmem:[#allocation2 + $0xda] sm:$0xff] }
  0xd5   : > { %4023 = vmatprep.mubr.msk.bf16.mxu0 %vm4420_vm4, %v4415_v0  ;;  %959 = vrot.lane.b32.xlu0 %v543_v56, %s4416_s16  ;;  %v412_v28 = vpack.c.bf16 %v376_v19, %v375_v18  ;;  %v713_v49 = vld [vmem:[#allocation2 + $0xf5] sm:$0xff] }
  0xd6   : > { %v902_v62 = vpop.permute.xlu1 %901 }
  0xd7   : > { %v1348_v3 = vsel %vm1340_vm2, %v1288_v61, %v902_v62  ;;  %v946_v4 = vpop.permute.xlu0 %945  ;;  %v582_v61 = vld [vmem:[#allocation2 + $0xd3] sm:$0xff]  ;;  %v583_v62 = vld [vmem:[#allocation2 + $0xdb] sm:$0xff] }
  0xd8   : > { %1022 = vrot.lane.b32.xlu1 %v609_v57, %s4418_s23  ;;  %v1391_v7 = vsel %vm1383_vm5, %v1348_v3, %v946_v4  ;;  %v517_v57 = vld [vmem:[#allocation2 + $0xd2] sm:$0xff]  ;;  %v611_v5 = vpack.c.bf16 %v583_v62, %v582_v61 }
  0xd9   : > { %1085 = vrot.lane.b32.xlu0 %v671_v26, %s4421_s8  ;;  %v545_v4 = vpack.c.bf16 %v518_v58, %v517_v57 }
  0xda   : > { %v1009_v8 = vpop.permute.xlu1 %1008 }
  0xdb   : > { %v1434_v13 = vsel %vm1426_vm3, %v1391_v7, %v1009_v8  ;;  %v1072_v14 = vpop.permute.xlu0 %1071  ;;  %v646_v7 = vld [vmem:[#allocation2 + $0xe4] sm:$0xff]  ;;  %v647_v8 = vld [vmem:[#allocation2 + $0xec] sm:$0xff] }
  0xdc   : > { %1129 = vrot.lane.b32.xlu1 %v672_v63, %s4422_s9  ;;  %v1477_v15 = vsel %vm1469_vm6, %v1434_v13, %v1072_v14  ;;  %v674_v11 = vpack.c.bf16 %v647_v8, %v646_v7  ;;  %v712_v13 = vld [vmem:[#allocation2 + $0xed] sm:$0xff] }
  0xdd   : > { %1192 = vrot.lane.b32.xlu0 %v738_v9, %s4423_s10  ;;  %v740_v20 = vpack.c.bf16 %v712_v13, %v711_v12 }
  0xde   : > { %v1116_v16 = vpop.permute.xlu1 %1115 }
  0xdf   : > { %v1520_v22 = vsel %vm1512_vm7, %v1477_v15, %v1116_v16  ;;  %v1179_v23 = vpop.permute.xlu0 %1178  ;;  %v773_v16 = vld [vmem:[#allocation2 + $0xe6] sm:$0xff] }
  0xe0   : > { %1255 = vrot.lane.b32.xlu1 %v800_v10, %s4424_s11  ;;  %v1563_v26 = vsel %vm1555_vm8, %v1520_v22, %v1179_v23  ;;  %v455_v22 = vld [vmem:[#allocation2 + $0xd1] sm:$0xff]  ;;  %v456_v23 = vld [vmem:[#allocation2 + $0xd9] sm:$0xff] }
  0xe1   : > { %854 = vrot.lane.b32.xlu0 %v481_v17, %s4417_s17  ;;  %v774_v17 = vld [vmem:[#allocation2 + $0xee] sm:$0xff] }
  0xe2   : > { %v1242_v27 = vpop.permute.xlu1 %1241  ;;  %v802_v21 = vpack.c.bf16 %v774_v17, %v773_v16 }
  0xe3   : > { %v1606_v29 = vsel %vm1598_vm9, %v1563_v26, %v1242_v27  ;;  %v841_v32 = vpop.permute.xlu0 %840 }
  0xe4   : > { %917 = vrot.lane.b32.xlu1 %v543_v56, %s4419_s30  ;;  %4024 = vmatmul.mubr.msk.bf16.gmra.mxu0 %vm1684_vm10, %v1606_v29  ;;  %v1291_v35 = vsel %vm223_vm0, %v412_v28, %v841_v32  ;;  %v378_v56 = vld [vmem:[#allocation2 + $0x58] sm:$0xff]  ;;  %v483_v28 = vpack.c.bf16 %v456_v23, %v455_v22  ;;  %v379_v29 = vld [vmem:[#allocation2 + $0x60] sm:$0xff]  ;;  %v520_v32 = vld [vmem:[#allocation2 + $0xea] sm:$0xff] }
  0xe5   : > { %4027 = vmatprep.mubr.msk.bf16.mxu0 %vm4420_vm4, %v4415_v0  ;;  %961 = vrot.lane.b32.xlu0 %v544_v30, %s4416_s16  ;;  %v413_v2 = vpack.c.bf16 %v378_v56, %v377_v55  ;;  %v715_v23 = vld [vmem:[#allocation2 + $0x105] sm:$0xff] }
  0xe6   : > { %v904_v36 = vpop.permute.xlu1 %903 }
  0xe7   : > { %v1350_v40 = vsel %vm1340_vm2, %v1291_v35, %v904_v36  ;;  %v948_v41 = vpop.permute.xlu0 %947  ;;  %v584_v35 = vld [vmem:[#allocation2 + $0xe3] sm:$0xff]  ;;  %v585_v36 = vld [vmem:[#allocation2 + $0xeb] sm:$0xff] }
  0xe8   : > { %1024 = vrot.lane.b32.xlu1 %v610_v31, %s4418_s23  ;;  %v1393_v44 = vsel %vm1383_vm5, %v1350_v40, %v948_v41  ;;  %v519_v31 = vld [vmem:[#allocation2 + $0xe2] sm:$0xff]  ;;  %v612_v42 = vpack.c.bf16 %v585_v36, %v584_v35 }
  0xe9   : > { %1087 = vrot.lane.b32.xlu0 %v672_v63, %s4421_s8  ;;  %v546_v41 = vpack.c.bf16 %v520_v32, %v519_v31 }
  0xea   : > { %v1011_v45 = vpop.permute.xlu1 %1010 }
  0xeb   : > { %v1436_v50 = vsel %vm1426_vm3, %v1393_v44, %v1011_v45  ;;  %v1074_v51 = vpop.permute.xlu0 %1073  ;;  %v648_v44 = vld [vmem:[#allocation2 + $0xf4] sm:$0xff]  ;;  %v649_v45 = vld [vmem:[#allocation2 + $0xfc] sm:$0xff] }
  0xec   : > { %1131 = vrot.lane.b32.xlu1 %v673_v37, %s4422_s9  ;;  %v1479_v52 = vsel %vm1469_vm6, %v1436_v50, %v1074_v51  ;;  %v675_v48 = vpack.c.bf16 %v649_v45, %v648_v44  ;;  %v714_v50 = vld [vmem:[#allocation2 + $0xfd] sm:$0xff] }
  0xed   : > { %1194 = vrot.lane.b32.xlu0 %v739_v46, %s4423_s10  ;;  %v741_v57 = vpack.c.bf16 %v714_v50, %v713_v49 }
  0xee   : > { %v1118_v53 = vpop.permute.xlu1 %1117 }
  0xef   : > { %v1522_v59 = vsel %vm1512_vm7, %v1479_v52, %v1118_v53  ;;  %v1181_v60 = vpop.permute.xlu0 %1180  ;;  %v775_v53 = vld [vmem:[#allocation2 + $0xf6] sm:$0xff] }
  0xf0   : > { %1257 = vrot.lane.b32.xlu1 %v801_v47, %s4424_s11  ;;  %v1565_v63 = vsel %vm1555_vm8, %v1522_v59, %v1181_v60  ;;  %v457_v59 = vld [vmem:[#allocation2 + $0xe1] sm:$0xff]  ;;  %v458_v60 = vld [vmem:[#allocation2 + $0xe9] sm:$0xff] }
  0xf1   : > { %856 = vrot.lane.b32.xlu0 %v482_v54, %s4417_s17  ;;  %v776_v54 = vld [vmem:[#allocation2 + $0xfe] sm:$0xff] }
  0xf2   : > { %v1244_v1 = vpop.permute.xlu1 %1243  ;;  %v803_v58 = vpack.c.bf16 %v776_v54, %v775_v53 }
  0xf3   : > { %v1608_v3 = vsel %vm1598_vm9, %v1565_v63, %v1244_v1  ;;  %v843_v6 = vpop.permute.xlu0 %842 }
  0xf4   : > { %919 = vrot.lane.b32.xlu1 %v544_v30, %s4419_s30  ;;  %4028 = vmatmul.mubr.msk.bf16.gmra.mxu0 %vm1684_vm10, %v1608_v3  ;;  %v1294_v9 = vsel %vm223_vm0, %v413_v2, %v843_v6  ;;  %v380_v30 = vld [vmem:[#allocation2 + $0x68] sm:$0xff]  ;;  %v484_v2 = vpack.c.bf16 %v458_v60, %v457_v59  ;;  %v381_v3 = vld [vmem:[#allocation2 + $0x70] sm:$0xff]  ;;  %v522_v6 = vld [vmem:[#allocation2 + $0xfa] sm:$0xff] }
  0xf5   : > { %4031 = vmatprep.mubr.msk.bf16.mxu0 %vm4420_vm4, %v4415_v0  ;;  %963 = vrot.lane.b32.xlu0 %v545_v4, %s4416_s16  ;;  %v414_v39 = vpack.c.bf16 %v380_v30, %v379_v29  ;;  %v717_v60 = vld [vmem:[#allocation2 + $0x115] sm:$0xff] }
  0xf6   : > { %v906_v10 = vpop.permute.xlu1 %905 }
  0xf7   : > { %v1352_v14 = vsel %vm1340_vm2, %v1294_v9, %v906_v10  ;;  %v950_v15 = vpop.permute.xlu0 %949  ;;  %v586_v9 = vld [vmem:[#allocation2 + $0xf3] sm:$0xff]  ;;  %v587_v10 = vld [vmem:[#allocation2 + $0xfb] sm:$0xff] }
  0xf8   : > { %1026 = vrot.lane.b32.xlu1 %v611_v5, %s4418_s23  ;;  %v1395_v18 = vsel %vm1383_vm5, %v1352_v14, %v950_v15  ;;  %v521_v5 = vld [vmem:[#allocation2 + $0xf2] sm:$0xff]  ;;  %v613_v16 = vpack.c.bf16 %v587_v10, %v586_v9 }
  0xf9   : > { %1089 = vrot.lane.b32.xlu0 %v673_v37, %s4421_s8  ;;  %v547_v15 = vpack.c.bf16 %v522_v6, %v521_v5 }
  0xfa   : > { %v1013_v19 = vpop.permute.xlu1 %1012 }
  0xfb   : > { %v1438_v24 = vsel %vm1426_vm3, %v1395_v18, %v1013_v19  ;;  %v1076_v25 = vpop.permute.xlu0 %1075  ;;  %v650_v18 = vld [vmem:[#allocation2 + $0x104] sm:$0xff]  ;;  %v651_v19 = vld [vmem:[#allocation2 + $0x10c] sm:$0xff] }
  0xfc   : > { %1133 = vrot.lane.b32.xlu1 %v674_v11, %s4422_s9  ;;  %v1481_v26 = vsel %vm1469_vm6, %v1438_v24, %v1076_v25  ;;  %v676_v22 = vpack.c.bf16 %v651_v19, %v650_v18  ;;  %v716_v24 = vld [vmem:[#allocation2 + $0x10d] sm:$0xff] }
  0xfd   : > { %1196 = vrot.lane.b32.xlu0 %v740_v20, %s4423_s10  ;;  %v742_v31 = vpack.c.bf16 %v716_v24, %v715_v23 }
  0xfe   : > { %v1120_v27 = vpop.permute.xlu1 %1119 }
  0xff   : > { %v1524_v33 = vsel %vm1512_vm7, %v1481_v26, %v1120_v27  ;;  %v1183_v34 = vpop.permute.xlu0 %1182  ;;  %v777_v27 = vld [vmem:[#allocation2 + $0x106] sm:$0xff] }
 0x100   : > { %1259 = vrot.lane.b32.xlu1 %v802_v21, %s4424_s11  ;;  %v1567_v37 = vsel %vm1555_vm8, %v1524_v33, %v1183_v34  ;;  %v459_v33 = vld [vmem:[#allocation2 + $0xf1] sm:$0xff]  ;;  %v460_v34 = vld [vmem:[#allocation2 + $0xf9] sm:$0xff] }
 0x101   : > { %858 = vrot.lane.b32.xlu0 %v483_v28, %s4417_s17  ;;  %v778_v28 = vld [vmem:[#allocation2 + $0x10e] sm:$0xff] }
 0x102   : > { %v1246_v38 = vpop.permute.xlu1 %1245  ;;  %v804_v32 = vpack.c.bf16 %v778_v28, %v777_v27 }
 0x103   : > { %v1610_v40 = vsel %vm1598_vm9, %v1567_v37, %v1246_v38  ;;  %v845_v43 = vpop.permute.xlu0 %844 }
 0x104   : > { %921 = vrot.lane.b32.xlu1 %v545_v4, %s4419_s30  ;;  %4032 = vmatmul.mubr.msk.bf16.gmra.mxu0 %vm1684_vm10, %v1610_v40  ;;  %v1297_v46 = vsel %vm223_vm0, %v414_v39, %v845_v43  ;;  %v382_v4 = vld [vmem:[#allocation2 + $0x78] sm:$0xff]  ;;  %v485_v39 = vpack.c.bf16 %v460_v34, %v459_v33  ;;  %v383_v40 = vld [vmem:[#allocation2 + $0x80] sm:$0xff]  ;;  %v524_v43 = vld [vmem:[#allocation2 + $0x10a] sm:$0xff] }
 0x105   : > { %4035 = vmatprep.mubr.msk.bf16.mxu0 %vm4420_vm4, %v4415_v0  ;;  %965 = vrot.lane.b32.xlu0 %v546_v41, %s4416_s16  ;;  %v415_v13 = vpack.c.bf16 %v382_v4, %v381_v3  ;;  %v719_v34 = vld [vmem:[#allocation2 + $0x125] sm:$0xff] }
 0x106   : > { %v908_v47 = vpop.permute.xlu1 %907 }
 0x107   : > { %v1354_v51 = vsel %vm1340_vm2, %v1297_v46, %v908_v47  ;;  %v952_v52 = vpop.permute.xlu0 %951  ;;  %v588_v46 = vld [vmem:[#allocation2 + $0x103] sm:$0xff]  ;;  %v589_v47 = vld [vmem:[#allocation2 + $0x10b] sm:$0xff] }
 0x108   : > { %1028 = vrot.lane.b32.xlu1 %v612_v42, %s4418_s23  ;;  %v1397_v55 = vsel %vm1383_vm5, %v1354_v51, %v952_v52  ;;  %v523_v42 = vld [vmem:[#allocation2 + $0x102] sm:$0xff]  ;;  %v614_v53 = vpack.c.bf16 %v589_v47, %v588_v46 }
 0x109   : > { %1091 = vrot.lane.b32.xlu0 %v674_v11, %s4421_s8  ;;  %v548_v52 = vpack.c.bf16 %v524_v43, %v523_v42 }
 0x10a   : > { %v1015_v56 = vpop.permute.xlu1 %1014 }
 0x10b   : > { %v1440_v61 = vsel %vm1426_vm3, %v1397_v55, %v1015_v56  ;;  %v1078_v62 = vpop.permute.xlu0 %1077  ;;  %v652_v55 = vld [vmem:[#allocation2 + $0x114] sm:$0xff]  ;;  %v653_v56 = vld [vmem:[#allocation2 + $0x11c] sm:$0xff] }
 0x10c   : > { %1135 = vrot.lane.b32.xlu1 %v675_v48, %s4422_s9  ;;  %v1483_v63 = vsel %vm1469_vm6, %v1440_v61, %v1078_v62  ;;  %v677_v59 = vpack.c.bf16 %v653_v56, %v652_v55  ;;  %v718_v61 = vld [vmem:[#allocation2 + $0x11d] sm:$0xff] }
 0x10d   : > { %1198 = vrot.lane.b32.xlu0 %v741_v57, %s4423_s10  ;;  %v743_v5 = vpack.c.bf16 %v718_v61, %v717_v60 }
 0x10e   : > { %v1122_v1 = vpop.permute.xlu1 %1121 }
 0x10f   : > { %v1526_v7 = vsel %vm1512_vm7, %v1483_v63, %v1122_v1  ;;  %v1185_v8 = vpop.permute.xlu0 %1184  ;;  %v779_v1 = vld [vmem:[#allocation2 + $0x116] sm:$0xff] }
 0x110   : > { %1261 = vrot.lane.b32.xlu1 %v803_v58, %s4424_s11  ;;  %v1569_v11 = vsel %vm1555_vm8, %v1526_v7, %v1185_v8  ;;  %v461_v7 = vld [vmem:[#allocation2 + $0x101] sm:$0xff]  ;;  %v462_v8 = vld [vmem:[#allocation2 + $0x109] sm:$0xff] }
 0x111   : > { %860 = vrot.lane.b32.xlu0 %v484_v2, %s4417_s17  ;;  %v780_v2 = vld [vmem:[#allocation2 + $0x11e] sm:$0xff] }
 0x112   : > { %v1248_v12 = vpop.permute.xlu1 %1247  ;;  %v805_v6 = vpack.c.bf16 %v780_v2, %v779_v1 }
 0x113   : > { %v1612_v14 = vsel %vm1598_vm9, %v1569_v11, %v1248_v12  ;;  %v847_v17 = vpop.permute.xlu0 %846 }
 0x114   : > { %923 = vrot.lane.b32.xlu1 %v546_v41, %s4419_s30  ;;  %4036 = vmatmul.mubr.msk.bf16.gmra.mxu0 %vm1684_vm10, %v1612_v14  ;;  %v1300_v20 = vsel %vm223_vm0, %v415_v13, %v847_v17  ;;  %v384_v41 = vld [vmem:[#allocation2 + $0x88] sm:$0xff]  ;;  %v486_v13 = vpack.c.bf16 %v462_v8, %v461_v7  ;;  %v385_v14 = vld [vmem:[#allocation2 + $0x90] sm:$0xff]  ;;  %v526_v17 = vld [vmem:[#allocation2 + $0x11a] sm:$0xff] }
 0x115   : > { %4039 = vmatprep.mubr.msk.bf16.mxu0 %vm4420_vm4, %v4415_v0  ;;  %967 = vrot.lane.b32.xlu0 %v547_v15, %s4416_s16  ;;  %v416_v50 = vpack.c.bf16 %v384_v41, %v383_v40  ;;  %v721_v8 = vld [vmem:[#allocation2 + $0x135] sm:$0xff] }
 0x116   : > { %v910_v21 = vpop.permute.xlu1 %909 }
 0x117   : > { %v1356_v25 = vsel %vm1340_vm2, %v1300_v20, %v910_v21  ;;  %v954_v26 = vpop.permute.xlu0 %953  ;;  %v590_v20 = vld [vmem:[#allocation2 + $0x113] sm:$0xff]  ;;  %v591_v21 = vld [vmem:[#allocation2 + $0x11b] sm:$0xff] }
 0x118   : > { %1030 = vrot.lane.b32.xlu1 %v613_v16, %s4418_s23  ;;  %v1399_v29 = vsel %vm1383_vm5, %v1356_v25, %v954_v26  ;;  %v525_v16 = vld [vmem:[#allocation2 + $0x112] sm:$0xff]  ;;  %v615_v27 = vpack.c.bf16 %v591_v21, %v590_v20 }
 0x119   : > { %1093 = vrot.lane.b32.xlu0 %v675_v48, %s4421_s8  ;;  %v549_v26 = vpack.c.bf16 %v526_v17, %v525_v16 }
 0x11a   : > { %v1017_v30 = vpop.permute.xlu1 %1016 }
 0x11b   : > { %v1442_v35 = vsel %vm1426_vm3, %v1399_v29, %v1017_v30  ;;  %v1080_v36 = vpop.permute.xlu0 %1079  ;;  %v654_v29 = vld [vmem:[#allocation2 + $0x124] sm:$0xff]  ;;  %v655_v30 = vld [vmem:[#allocation2 + $0x12c] sm:$0xff] }
 0x11c   : > { %1137 = vrot.lane.b32.xlu1 %v676_v22, %s4422_s9  ;;  %v1485_v37 = vsel %vm1469_vm6, %v1442_v35, %v1080_v36  ;;  %v678_v33 = vpack.c.bf16 %v655_v30, %v654_v29  ;;  %v720_v35 = vld [vmem:[#allocation2 + $0x12d] sm:$0xff] }
 0x11d   : > { %1200 = vrot.lane.b32.xlu0 %v742_v31, %s4423_s10  ;;  %v744_v42 = vpack.c.bf16 %v720_v35, %v719_v34 }
 0x11e   : > { %v1124_v38 = vpop.permute.xlu1 %1123 }
 0x11f   : > { %v1528_v44 = vsel %vm1512_vm7, %v1485_v37, %v1124_v38  ;;  %v1187_v45 = vpop.permute.xlu0 %1186  ;;  %v781_v38 = vld [vmem:[#allocation2 + $0x126] sm:$0xff] }
 0x120   : > { %1263 = vrot.lane.b32.xlu1 %v804_v32, %s4424_s11  ;;  %v1571_v48 = vsel %vm1555_vm8, %v1528_v44, %v1187_v45  ;;  %v463_v44 = vld [vmem:[#allocation2 + $0x111] sm:$0xff]  ;;  %v464_v45 = vld [vmem:[#allocation2 + $0x119] sm:$0xff] }
 0x121   : > { %862 = vrot.lane.b32.xlu0 %v485_v39, %s4417_s17  ;;  %v782_v39 = vld [vmem:[#allocation2 + $0x12e] sm:$0xff] }
 0x122   : > { %v1250_v49 = vpop.permute.xlu1 %1249  ;;  %v806_v43 = vpack.c.bf16 %v782_v39, %v781_v38 }
 0x123   : > { %v1614_v51 = vsel %vm1598_vm9, %v1571_v48, %v1250_v49  ;;  %v849_v54 = vpop.permute.xlu0 %848 }
 0x124   : > { %925 = vrot.lane.b32.xlu1 %v547_v15, %s4419_s30  ;;  %4040 = vmatmul.mubr.msk.bf16.gmra.mxu0 %vm1684_vm10, %v1614_v51  ;;  %v1303_v57 = vsel %vm223_vm0, %v416_v50, %v849_v54  ;;  %v386_v15 = vld [vmem:[#allocation2 + $0x98] sm:$0xff]  ;;  %v487_v50 = vpack.c.bf16 %v464_v45, %v463_v44  ;;  %v387_v51 = vld [vmem:[#allocation2 + $0xa0] sm:$0xff]  ;;  %v528_v54 = vld [vmem:[#allocation2 + $0x12a] sm:$0xff] }
 0x125   : > { %4043 = vmatprep.mubr.msk.bf16.mxu0 %vm4420_vm4, %v4415_v0  ;;  %969 = vrot.lane.b32.xlu0 %v548_v52, %s4416_s16  ;;  %v417_v24 = vpack.c.bf16 %v386_v15, %v385_v14  ;;  %v723_v45 = vld [vmem:[#allocation2 + $0x145] sm:$0xff] }
 0x126   : > { %v912_v58 = vpop.permute.xlu1 %911 }
 0x127   : > { %v1358_v62 = vsel %vm1340_vm2, %v1303_v57, %v912_v58  ;;  %v956_v63 = vpop.permute.xlu0 %955  ;;  %v592_v57 = vld [vmem:[#allocation2 + $0x123] sm:$0xff]  ;;  %v593_v58 = vld [vmem:[#allocation2 + $0x12b] sm:$0xff] }
 0x128   : > { %1032 = vrot.lane.b32.xlu1 %v614_v53, %s4418_s23  ;;  %v1401_v3 = vsel %vm1383_vm5, %v1358_v62, %v956_v63  ;;  %v527_v53 = vld [vmem:[#allocation2 + $0x122] sm:$0xff]  ;;  %v616_v1 = vpack.c.bf16 %v593_v58, %v592_v57 }
 0x129   : > { %1095 = vrot.lane.b32.xlu0 %v676_v22, %s4421_s8  ;;  %v550_v63 = vpack.c.bf16 %v528_v54, %v527_v53 }
 0x12a   : > { %v1019_v4 = vpop.permute.xlu1 %1018 }
 0x12b   : > { %v1444_v9 = vsel %vm1426_vm3, %v1401_v3, %v1019_v4  ;;  %v1082_v10 = vpop.permute.xlu0 %1081  ;;  %v656_v3 = vld [vmem:[#allocation2 + $0x134] sm:$0xff]  ;;  %v657_v4 = vld [vmem:[#allocation2 + $0x13c] sm:$0xff] }
 0x12c   : > { %1139 = vrot.lane.b32.xlu1 %v677_v59, %s4422_s9  ;;  %v1487_v11 = vsel %vm1469_vm6, %v1444_v9, %v1082_v10  ;;  %v679_v7 = vpack.c.bf16 %v657_v4, %v656_v3  ;;  %v722_v9 = vld [vmem:[#allocation2 + $0x13d] sm:$0xff]  ;;  %v554_v3 = vld [vmem:[#allocation2 + $0x14a] sm:$0xff] }
 0x12d   : > { %1202 = vrot.lane.b32.xlu0 %v743_v5, %s4423_s10  ;;  %v745_v16 = vpack.c.bf16 %v722_v9, %v721_v8 }
 0x12e   : > { %v1126_v12 = vpop.permute.xlu1 %1125 }
 0x12f   : > { %v1530_v18 = vsel %vm1512_vm7, %v1487_v11, %v1126_v12  ;;  %v1189_v19 = vpop.permute.xlu0 %1188  ;;  %v783_v12 = vld [vmem:[#allocation2 + $0x136] sm:$0xff] }
 0x130   : > { %1265 = vrot.lane.b32.xlu1 %v805_v6, %s4424_s11  ;;  %v1573_v22 = vsel %vm1555_vm8, %v1530_v18, %v1189_v19  ;;  %v465_v18 = vld [vmem:[#allocation2 + $0x121] sm:$0xff]  ;;  %v466_v19 = vld [vmem:[#allocation2 + $0x129] sm:$0xff] }
 0x131   : > { %864 = vrot.lane.b32.xlu0 %v486_v13, %s4417_s17  ;;  %v784_v13 = vld [vmem:[#allocation2 + $0x13e] sm:$0xff] }
 0x132   : > { %v1252_v23 = vpop.permute.xlu1 %1251  ;;  %v807_v17 = vpack.c.bf16 %v784_v13, %v783_v12 }
 0x133   : > { %v1616_v25 = vsel %vm1598_vm9, %v1573_v22, %v1252_v23  ;;  %v851_v28 = vpop.permute.xlu0 %850 }
 0x134   : > { %927 = vrot.lane.b32.xlu1 %v548_v52, %s4419_s30  ;;  %4044 = vmatmul.mubr.msk.bf16.gmra.mxu0 %vm1684_vm10, %v1616_v25  ;;  %v1306_v31 = vsel %vm223_vm0, %v417_v24, %v851_v28  ;;  %v388_v52 = vld [vmem:[#allocation2 + $0xa8] sm:$0xff]  ;;  %v488_v24 = vpack.c.bf16 %v466_v19, %v465_v18  ;;  %v389_v25 = vld [vmem:[#allocation2 + $0xb0] sm:$0xff]  ;;  %v530_v28 = vld [vmem:[#allocation2 + $0x13a] sm:$0xff] }
 0x135   : > { %4047 = vmatprep.mubr.msk.bf16.mxu0 %vm4420_vm4, %v4415_v0  ;;  %971 = vrot.lane.b32.xlu0 %v549_v26, %s4416_s16  ;;  %v418_v61 = vpack.c.bf16 %v388_v52, %v387_v51 }
 0x136   : > { %v914_v32 = vpop.permute.xlu1 %913 }
 0x137   : > { %v1360_v36 = vsel %vm1340_vm2, %v1306_v31, %v914_v32  ;;  %v958_v37 = vpop.permute.xlu0 %957  ;;  %v594_v31 = vld [vmem:[#allocation2 + $0x133] sm:$0xff]  ;;  %v595_v32 = vld [vmem:[#allocation2 + $0x13b] sm:$0xff] }
 0x138   : > { %1034 = vrot.lane.b32.xlu1 %v615_v27, %s4418_s23  ;;  %v1403_v40 = vsel %vm1383_vm5, %v1360_v36, %v958_v37  ;;  %v529_v27 = vld [vmem:[#allocation2 + $0x132] sm:$0xff]  ;;  %v617_v38 = vpack.c.bf16 %v595_v32, %v594_v31 }
 0x139   : > { %1097 = vrot.lane.b32.xlu0 %v677_v59, %s4421_s8  ;;  %v551_v37 = vpack.c.bf16 %v530_v28, %v529_v27  ;;  %v2148_v31 = vld [vmem:[#allocation3 + $0x9] sm:$0xff] }
 0x13a   : > { %v1021_v41 = vpop.permute.xlu1 %1020 }
 0x13b   : > { %v1446_v46 = vsel %vm1426_vm3, %v1403_v40, %v1021_v41  ;;  %v1084_v47 = vpop.permute.xlu0 %1083  ;;  %v658_v40 = vld [vmem:[#allocation2 + $0x144] sm:$0xff]  ;;  %v659_v41 = vld [vmem:[#allocation2 + $0x14c] sm:$0xff] }
 0x13c   : > { %1141 = vrot.lane.b32.xlu1 %v678_v33, %s4422_s9  ;;  %v1489_v48 = vsel %vm1469_vm6, %v1446_v46, %v1084_v47  ;;  %v680_v44 = vpack.c.bf16 %v659_v41, %v658_v40  ;;  %v724_v46 = vld [vmem:[#allocation2 + $0x14d] sm:$0xff] }
 0x13d   : > { %1204 = vrot.lane.b32.xlu0 %v744_v42, %s4423_s10  ;;  %v746_v53 = vpack.c.bf16 %v724_v46, %v723_v45 }
 0x13e   : > { %v1128_v49 = vpop.permute.xlu1 %1127 }
 0x13f   : > { %v1532_v55 = vsel %vm1512_vm7, %v1489_v48, %v1128_v49  ;;  %v1191_v56 = vpop.permute.xlu0 %1190  ;;  %v785_v49 = vld [vmem:[#allocation2 + $0x146] sm:$0xff] }
 0x140   : > { %1267 = vrot.lane.b32.xlu1 %v806_v43, %s4424_s11  ;;  %v1575_v59 = vsel %vm1555_vm8, %v1532_v55, %v1191_v56  ;;  %v467_v55 = vld [vmem:[#allocation2 + $0x131] sm:$0xff]  ;;  %v468_v56 = vld [vmem:[#allocation2 + $0x139] sm:$0xff] }
 0x141   : > { %866 = vrot.lane.b32.xlu0 %v487_v50, %s4417_s17  ;;  %v786_v50 = vld [vmem:[#allocation2 + $0x14e] sm:$0xff] }
 0x142   : > { %v1254_v60 = vpop.permute.xlu1 %1253  ;;  %v808_v54 = vpack.c.bf16 %v786_v50, %v785_v49 }
 0x143   : > { %v1618_v62 = vsel %vm1598_vm9, %v1575_v59, %v1254_v60  ;;  %v853_v2 = vpop.permute.xlu0 %852 }
 0x144   : > { %929 = vrot.lane.b32.xlu1 %v549_v26, %s4419_s30  ;;  %4048 = vmatmul.mubr.msk.bf16.gmra.mxu0 %vm1684_vm10, %v1618_v62  ;;  %v1309_v5 = vsel %vm223_vm0, %v418_v61, %v853_v2  ;;  %v390_v26 = vld [vmem:[#allocation2 + $0xb8] sm:$0xff]  ;;  %v489_v61 = vpack.c.bf16 %v468_v56, %v467_v55  ;;  %v391_v62 = vld [vmem:[#allocation2 + $0xc0] sm:$0xff] }
 0x145   : > { %4051 = vmatprep.mubr.msk.bf16.mxu0 %vm4420_vm4, %v4415_v0  ;;  %973 = vrot.lane.b32.xlu0 %v550_v63, %s4416_s16  ;;  %v419_v35 = vpack.c.bf16 %v390_v26, %v389_v25  ;;  %v553_v2 = vld [vmem:[#allocation2 + $0x142] sm:$0xff] }
 0x146   : > { %v916_v6 = vpop.permute.xlu1 %915  ;;  %v556_v12 = vpack.c.bf16 %v554_v3, %v553_v2  ;;  %v788_v25 = vld [vmem:[#allocation2 + $0x15e] sm:$0xff]  ;;  %v396_v2 = vld [vmem:[#allocation2 + $0xe8] sm:$0xff] }
 0x147   : > { %v1362_v10 = vsel %vm1340_vm2, %v1309_v5, %v916_v6  ;;  %v960_v11 = vpop.permute.xlu0 %959  ;;  %v596_v6 = vld [vmem:[#allocation2 + $0x143] sm:$0xff] }
 0x148   : > { %1036 = vrot.lane.b32.xlu1 %v616_v1, %s4418_s23  ;;  %v1405_v14 = vsel %vm1383_vm5, %v1362_v10, %v960_v11  ;;  %v4318_v1 = vld [vmem:[%s5740_s1 + $0x80] sm:$0xff]  }
 0x149   : > { %1099 = vrot.lane.b32.xlu0 %v678_v33, %s4421_s8  ;;  %4096 = vmatpush3.bf16.msra.mxu1 %v4318_v1  ;;  %v395_v1 = vld [vmem:[#allocation2 + $0xe0] sm:$0xff] }
 0x14a   : > { %v1023_v15 = vpop.permute.xlu1 %1022  ;;  %4125 = vmatprep.subr.bf16.mxu1 %v4415_v0 }
 0x14b   : > { %v1448_v20 = vsel %vm1426_vm3, %v1405_v14, %v1023_v15  ;;  %v1086_v21 = vpop.permute.xlu0 %1085  ;;  %v682_v15 = vld [vmem:[#allocation2 + $0x154] sm:$0xff] }
 0x14c   : > { %1143 = vrot.lane.b32.xlu1 %v679_v7, %s4422_s9  ;;  %v1491_v22 = vsel %vm1469_vm6, %v1448_v20, %v1086_v21  ;;  %v725_v20 = vld [vmem:[#allocation2 + $0x155] sm:$0xff]  ;;  %v726_v21 = vld [vmem:[#allocation2 + $0x15d] sm:$0xff] }
 0x14d   : > { %1206 = vrot.lane.b32.xlu0 %v745_v16, %s4423_s10  ;;  %v683_v16 = vld [vmem:[#allocation2 + $0x15c] sm:$0xff]  ;;  %v747_v28 = vpack.c.bf16 %v726_v21, %v725_v20 }
 0x14e   : > { %v1130_v23 = vpop.permute.xlu1 %1129  ;;  %v685_v19 = vpack.c.bf16 %v683_v16, %v682_v15 }
 0x14f   : > { %v1534_v29 = vsel %vm1512_vm7, %v1491_v22, %v1130_v23  ;;  %v1193_v30 = vpop.permute.xlu0 %1192 }
 0x150   : > { %1269 = vrot.lane.b32.xlu1 %v807_v17, %s4424_s11  ;;  %v1577_v33 = vsel %vm1555_vm8, %v1534_v29, %v1193_v30  ;;  %v2147_v30 = vld [vmem:[#allocation3 + $0x1] sm:$0xff] }
 0x151   : > { %868 = vrot.lane.b32.xlu0 %v488_v24, %s4417_s17  ;;  %v787_v24 = vld [vmem:[#allocation2 + $0x156] sm:$0xff]  ;;  %v2160_v40 = vpack.c.bf16 %v2148_v31, %v2147_v30 }
 0x152   : > { %v1256_v34 = vpop.permute.xlu1 %1255  ;;  %v809_v29 = vpack.c.bf16 %v788_v25, %v787_v24 }
 0x153   : > { %v1620_v36 = vsel %vm1598_vm9, %v1577_v33, %v1256_v34  ;;  %v855_v39 = vpop.permute.xlu0 %854  ;;  %v2167_v34 = vld [vmem:[#allocation3 + $0x2] sm:$0xff] }
 0x154   : > { %931 = vrot.lane.b32.xlu1 %v550_v63, %s4419_s30  ;;  %4052 = vmatmul.mubr.msk.bf16.gmra.mxu0 %vm1684_vm10, %v1620_v36  ;;  %v1312_v42 = vsel %vm223_vm0, %v419_v35, %v855_v39  ;;  %v392_v63 = vld [vmem:[#allocation2 + $0xc8] sm:$0xff]  ;;  %v5029_v35 = vld [vmem:[#allocation3 + $0xa] sm:$0xff] }
 0x155   : > { %4055 = vmatprep.mubr.msk.bf16.mxu0 %vm4420_vm4, %v4415_v0  ;;  %975 = vrot.lane.b32.xlu0 %v551_v37, %s4416_s16  ;;  %v420_v10 = vpack.c.bf16 %v392_v63, %v391_v62  ;;  %v394_v39 = vld [vmem:[#allocation2 + $0xd8] sm:$0xff]  ;;  %v2180_v41 = vpack.c.bf16 %v5029_v35, %v2167_v34 }
 0x156   : > { %v918_v43 = vpop.permute.xlu1 %917 }
 0x157   : > { %v1364_v47 = vsel %vm1340_vm2, %v1312_v42, %v918_v43  ;;  %v962_v48 = vpop.permute.xlu0 %961 }
 0x158   : > { %1038 = vrot.lane.b32.xlu1 %v617_v38, %s4418_s23  ;;  %v1407_v51 = vsel %vm1383_vm5, %v1364_v47, %v962_v48  ;;  %v393_v38 = vld [vmem:[#allocation2 + $0xd0] sm:$0xff] }
 0x159   : > { %1101 = vrot.lane.b32.xlu0 %v679_v7, %s4421_s8  ;;  %v597_v7 = vld [vmem:[#allocation2 + $0x14b] sm:$0xff]  ;;  %v421_v46 = vpack.c.bf16 %v394_v39, %v393_v38 }
 0x15a   : > { %v1025_v52 = vpop.permute.xlu1 %1024  ;;  %v618_v13 = vpack.c.bf16 %v597_v7, %v596_v6  ;;  %v422_v7 = vpack.c.bf16 %v396_v2, %v395_v1 }
 0x15b   : > { %v1450_v57 = vsel %vm1426_vm3, %v1407_v51, %v1025_v52  ;;  %v1088_v58 = vpop.permute.xlu0 %1087  ;;  %v5047_v51 = vld [vmem:[%s5741_s2] ss:$0 sm:$0xff] }
 0x15c   : > { %1145 = vrot.lane.b32.xlu1 %v680_v44, %s4422_s9  ;;  %v1493_v59 = vsel %vm1469_vm6, %v1450_v57, %v1088_v58 }
 0x15d   : > { %1208 = vrot.lane.b32.xlu0 %v746_v53, %s4423_s10 }
 0x15e   : > { %v1132_v60 = vpop.permute.xlu1 %1131 }
 0x15f   : > { %v1536_v4 = vsel %vm1512_vm7, %v1493_v59, %v1132_v60  ;;  %v1195_v5 = vpop.permute.xlu0 %1194 }
 0x160   : > { %1271 = vrot.lane.b32.xlu1 %v808_v54, %s4424_s11  ;;  %v1579_v8 = vsel %vm1555_vm8, %v1536_v4, %v1195_v5 }
 0x161   : > { %870 = vrot.lane.b32.xlu0 %v489_v61, %s4417_s17 }
 0x162   : > { %v1258_v9 = vpop.permute.xlu1 %1257 }
 0x163   : > { %v1622_v11 = vsel %vm1598_vm9, %v1579_v8, %v1258_v9  ;;  %v857_v14 = vpop.permute.xlu0 %856 }
 0x164   : > { %933 = vrot.lane.b32.xlu1 %v551_v37, %s4419_s30  ;;  %4056 = vmatmul.mubr.msk.bf16.gmra.mxu0 %vm1684_vm10, %v1622_v11  ;;  %v1315_v17 = vsel %vm223_vm0, %v420_v10, %v857_v14 }
 0x165   : > { %4059 = vmatprep.mubr.msk.bf16.mxu0 %vm4420_vm4, %v4415_v0  ;;  %977 = vrot.lane.b32.xlu0 %v556_v12, %s4416_s16 }
 0x166   : > { %v920_v18 = vpop.permute.xlu1 %919 }
 0x167   : > { %v1366_v22 = vsel %vm1340_vm2, %v1315_v17, %v920_v18  ;;  %v964_v23 = vpop.permute.xlu0 %963 }
 0x168   : > { %1040 = vrot.lane.b32.xlu1 %v618_v13, %s4418_s23  ;;  %v1409_v26 = vsel %vm1383_vm5, %v1366_v22, %v964_v23 }
 0x169   : > { %1103 = vrot.lane.b32.xlu0 %v680_v44, %s4421_s8 }
 0x16a   : > { %v1027_v27 = vpop.permute.xlu1 %1026 }
 0x16b   : > { %v1452_v32 = vsel %vm1426_vm3, %v1409_v26, %v1027_v27  ;;  %v1090_v33 = vpop.permute.xlu0 %1089 }
 0x16c   : > { %1147 = vrot.lane.b32.xlu1 %v685_v19, %s4422_s9  ;;  %v1495_v36 = vsel %vm1469_vm6, %v1452_v32, %v1090_v33 }
 0x16d   : > { %1210 = vrot.lane.b32.xlu0 %v747_v28, %s4423_s10  ;;  %v397_v28 = vld [vmem:[#allocation2 + $0xf0] sm:$0xff] }
 0x16e   : > { %v1134_v37 = vpop.permute.xlu1 %1133 }
 0x16f   : > { %v1538_v42 = vsel %vm1512_vm7, %v1495_v36, %v1134_v37  ;;  %v1197_v43 = vpop.permute.xlu0 %1196 }
 0x170   : > { %1273 = vrot.lane.b32.xlu1 %v809_v29, %s4424_s11  ;;  %v1581_v44 = vsel %vm1555_vm8, %v1538_v42, %v1197_v43  ;;  %v398_v29 = vld [vmem:[#allocation2 + $0xf8] sm:$0xff] }
 0x171   : > { %2292 = vrot.lane.b32.xlu0 %v2160_v40, %s4419_s30  ;;  %v423_v34 = vpack.c.bf16 %v398_v29, %v397_v28 }
 0x172   : > { %v1260_v45 = vpop.permute.xlu1 %1259 }
 0x173   : > { %v1624_v47 = vsel %vm1598_vm9, %v1581_v44, %v1260_v45  ;;  %v859_v48 = vpop.permute.xlu0 %858 }
 0x174   : > { %4060 = vmatmul.mubr.msk.bf16.gmra.mxu0 %vm1684_vm10, %v1624_v47  ;;  %2313 = vrot.lane.b32.xlu1 %v2180_v41, %s4418_s23  ;;  %v1318_v49 = vsel %vm223_vm0, %v421_v46, %v859_v48 }
 0x175   : > { %4063 = vmatprep.mubr.msk.bf16.mxu0 %vm4420_vm4, %v4415_v0 }
 0x176   : > { %v922_v50 = vpop.permute.xlu1 %921 }
 0x177   : > { %v1368_v53 = vsel %vm1340_vm2, %v1318_v49, %v922_v50  ;;  %v966_v54 = vpop.permute.xlu0 %965 }
 0x178   : > { %v1765_v52 = vpop.f32.mrf.mxu0  ;;  %v1411_v55 = vsel %vm1383_vm5, %v1368_v53, %v966_v54 }
 0x17a   : > { %v4013_v56 = vpop.f32.mrf.mxu0  ;;  %v1029_v57 = vpop.permute.xlu1 %1028 }
 0x17b   : > { %v1454_v59 = vsel %vm1426_vm3, %v1411_v55, %v1029_v57  ;;  %v1092_v60 = vpop.permute.xlu0 %1091  ;;  %v399_v57 = vld [vmem:[#allocation2 + $0x100] sm:$0xff] }
 0x17c   : > { %v1768_v58 = vpop.f32.mrf.mxu0  ;;  %v1497_v61 = vsel %vm1469_vm6, %v1454_v59, %v1092_v60 }
 0x17d   : > { %v400_v58 = vld [vmem:[#allocation2 + $0x108] sm:$0xff] }
 0x17e   : > { %v4014_v62 = vpop.f32.mrf.mxu0  ;;  %v1136_v63 = vpop.permute.xlu1 %1135 }
 0x17f   : > { %v1540_v3 = vsel %vm1512_vm7, %v1497_v61, %v1136_v63  ;;  %v1199_v4 = vpop.permute.xlu0 %1198  ;;  %v424_v63 = vpack.c.bf16 %v400_v58, %v399_v57 }
 0x180   : > { %v1583_v5 = vsel %vm1555_vm8, %v1540_v3, %v1199_v4 }
 0x182   : > { %v1262_v6 = vpop.permute.xlu1 %1261 }
 0x183   : > { %v1626_v8 = vsel %vm1598_vm9, %v1583_v5, %v1262_v6  ;;  %v861_v11 = vpop.permute.xlu0 %860 }
 0x184   : > { %v1773_v9 = vpop.f32.mrf.mxu0  ;;  %4064 = vmatmul.mubr.msk.bf16.gmra.mxu0 %vm1684_vm10, %v1626_v8  ;;  %v1321_v12 = vsel %vm223_vm0, %v422_v7, %v861_v11 }
 0x185   : > { %v1774_v10 = vadd.f32 %v5047_v51, %v1773_v9  ;;  %4067 = vmatprep.mubr.msk.bf16.mxu0 %vm4420_vm4, %v4415_v0 }
 0x186   : > { %v924_v13 = vpop.permute.xlu1 %923  ;;  %v4017_v14 = vpop.f32.mrf.mxu0 }
 0x187   : > { %v1933_v15 = vmax.f32 %v1774_v10, 0.0  ;;  %v1370_v17 = vsel %vm1340_vm2, %v1321_v12, %v924_v13  ;;  %v968_v19 = vpop.permute.xlu0 %967 }
 0x188   : > { %v1776_v16 = vpop.f32.mrf.mxu0  ;;  %v1413_v20 = vsel %vm1383_vm5, %v1370_v17, %v968_v19 }
 0x189   : > { %1974 = vst.msk [vmem:[#allocation5 + $0x10] sm:$0xff] %vm1340_vm2, %v1933_v15  ;;  %v1777_v18 = vadd.f32 %v5047_v51, %v1776_v16 }
 0x18a   : > { %v1031_v21 = vpop.permute.xlu1 %1030  ;;  %v4018_v22 = vpop.f32.mrf.mxu0 }
 0x18b   : > { %v1934_v23 = vmax.f32 %v1777_v18, 0.0  ;;  %v1456_v24 = vsel %vm1426_vm3, %v1413_v20, %v1031_v21  ;;  %v1094_v25 = vpop.permute.xlu0 %1093 }
 0x18c   : > { %v1499_v26 = vsel %vm1469_vm6, %v1456_v24, %v1094_v25  ;;  %v402_v24 = vld [vmem:[#allocation2 + $0x118] sm:$0xff] }
 0x18d   : > { %1975 = vst.msk [vmem:[#allocation5 + $0x18] sm:$0xff] %vm1340_vm2, %v1934_v23  ;;  %v401_v23 = vld [vmem:[#allocation2 + $0x110] sm:$0xff] }
 0x18e   : > { %v1138_v27 = vpop.permute.xlu1 %1137 }
 0x18f   : > { %v1542_v30 = vsel %vm1512_vm7, %v1499_v26, %v1138_v27  ;;  %v1201_v31 = vpop.permute.xlu0 %1200 }
 0x190   : > { %v1585_v32 = vsel %vm1555_vm8, %v1542_v30, %v1201_v31 }
 0x192   : > { %v1264_v33 = vpop.permute.xlu1 %1263 }
 0x193   : > { %v1628_v36 = vsel %vm1598_vm9, %v1585_v32, %v1264_v33  ;;  %v863_v39 = vpop.permute.xlu0 %862  ;;  %v425_v33 = vpack.c.bf16 %v402_v24, %v401_v23 }
 0x194   : > { %v1781_v37 = vpop.f32.mrf.mxu0  ;;  %4068 = vmatmul.mubr.msk.bf16.gmra.mxu0 %vm1684_vm10, %v1628_v36  ;;  %v1324_v40 = vsel %vm223_vm0, %v423_v34, %v863_v39 }
 0x195   : > { %v1782_v38 = vadd.f32 %v5047_v51, %v1781_v37  ;;  %4071 = vmatprep.mubr.msk.bf16.mxu0 %vm4420_vm4, %v4415_v0 }
 0x196   : > { %v926_v41 = vpop.permute.xlu1 %925  ;;  %v4021_v42 = vpop.f32.mrf.mxu0 }
 0x197   : > { %v1935_v43 = vmax.f32 %v1782_v38, 0.0  ;;  %v1372_v45 = vsel %vm1340_vm2, %v1324_v40, %v926_v41  ;;  %v970_v47 = vpop.permute.xlu0 %969 }
 0x198   : > { %v1784_v44 = vpop.f32.mrf.mxu0  ;;  %v1415_v48 = vsel %vm1383_vm5, %v1372_v45, %v970_v47 }
 0x199   : > { %1976 = vst.msk [vmem:[#allocation5 + $0x20] sm:$0xff] %vm1340_vm2, %v1935_v43  ;;  %v1785_v46 = vadd.f32 %v5047_v51, %v1784_v44 }
 0x19a   : > { %v1033_v49 = vpop.permute.xlu1 %1032  ;;  %v4022_v50 = vpop.f32.mrf.mxu0 }
 0x19b   : > { %v1936_v52 = vmax.f32 %v1785_v46, 0.0  ;;  %v1458_v53 = vsel %vm1426_vm3, %v1415_v48, %v1033_v49  ;;  %v1096_v54 = vpop.permute.xlu0 %1095 }
 0x19c   : > { %v1501_v55 = vsel %vm1469_vm6, %v1458_v53, %v1096_v54 }
 0x19d   : > { %1977 = vst.msk [vmem:[#allocation5 + $0x28] sm:$0xff] %vm1340_vm2, %v1936_v52  ;;  %v2196_v52 = vld [vmem:[#allocation3 + $0xb] sm:$0xff] }
 0x19e   : > { %v1140_v56 = vpop.permute.xlu1 %1139 }
 0x19f   : > { %v1544_v59 = vsel %vm1512_vm7, %v1501_v55, %v1140_v56  ;;  %v1203_v60 = vpop.permute.xlu0 %1202 }
 0x1a0   : > { %v1587_v61 = vsel %vm1555_vm8, %v1544_v59, %v1203_v60  ;;  %v2032_v19 = vld [vmem:[#allocation5 + $0x13] ss:$2 sm:$0xff]  ;;  %v2034_v20 = vld [vmem:[#allocation5 + $0x14] ss:$2 sm:$0xff] }
 0x1a1   : > { %v2039_v27 = vmax.f32 %v2032_v19, %v2034_v20 }
 0x1a2   : > { %v1266_v62 = vpop.permute.xlu1 %1265 }
 0x1a3   : > { %v1630_v1 = vsel %vm1598_vm9, %v1587_v61, %v1266_v62  ;;  %v865_v4 = vpop.permute.xlu0 %864  ;;  %v2216_v62 = vld [vmem:[#allocation3 + $0xc] sm:$0xff] }
 0x1a4   : > { %v1789_v2 = vpop.f32.mrf.mxu0  ;;  %4072 = vmatmul.mubr.msk.bf16.gmra.mxu0 %vm1684_vm10, %v1630_v1  ;;  %v1327_v5 = vsel %vm223_vm0, %v424_v63, %v865_v4  ;;  %v403_v1 = vld [vmem:[#allocation2 + $0x120] sm:$0xff] }
 0x1a5   : > { %v1790_v3 = vadd.f32 %v5047_v51, %v1789_v2  ;;  %4075 = vmatprep.mubr.msk.bf16.mxu0 %vm4420_vm4, %v4415_v0  ;;  %v404_v2 = vld [vmem:[#allocation2 + $0x128] sm:$0xff] }
 0x1a6   : > { %v928_v6 = vpop.permute.xlu1 %927  ;;  %v4025_v7 = vpop.f32.mrf.mxu0 }
 0x1a7   : > { %v1937_v8 = vmax.f32 %v1790_v3, 0.0  ;;  %v1374_v10 = vsel %vm1340_vm2, %v1327_v5, %v928_v6  ;;  %v972_v12 = vpop.permute.xlu0 %971  ;;  %v426_v7 = vpack.c.bf16 %v404_v2, %v403_v1 }
 0x1a8   : > { %v1792_v9 = vpop.f32.mrf.mxu0  ;;  %v1417_v13 = vsel %vm1383_vm5, %v1374_v10, %v972_v12 }
 0x1a9   : > { %1978 = vst.msk [vmem:[#allocation5 + $0x30] sm:$0xff] %vm1340_vm2, %v1937_v8  ;;  %v1793_v11 = vadd.f32 %v5047_v51, %v1792_v9 }
 0x1aa   : > { %v1035_v14 = vpop.permute.xlu1 %1034  ;;  %v4026_v15 = vpop.f32.mrf.mxu0 }
 0x1ab   : > { %v1938_v16 = vmax.f32 %v1793_v11, 0.0  ;;  %v1460_v17 = vsel %vm1426_vm3, %v1417_v13, %v1035_v14  ;;  %v1098_v18 = vpop.permute.xlu0 %1097 }
 0x1ac   : > { %v1503_v21 = vsel %vm1469_vm6, %v1460_v17, %v1098_v18 }
 0x1ad   : > { %1979 = vst.msk [vmem:[#allocation5 + $0x38] sm:$0xff] %vm1340_vm2, %v1938_v16 }
 0x1ae   : > { %v1142_v22 = vpop.permute.xlu1 %1141 }
 0x1af   : > { %v1546_v29 = vsel %vm1512_vm7, %v1503_v21, %v1142_v22  ;;  %v1205_v30 = vpop.permute.xlu0 %1204 }
 0x1b0   : > { %v2036_v25 = vld [vmem:[#allocation5 + $0x25] ss:$2 sm:$0xff]  ;;  %v2038_v26 = vld [vmem:[#allocation5 + $0x26] ss:$2 sm:$0xff]  ;;  %v1589_v31 = vsel %vm1555_vm8, %v1546_v29, %v1205_v30 }
 0x1b1   : > { %v2040_v28 = vmax.f32 %v2036_v25, %v2038_v26  ;;  %v406_v29 = vld [vmem:[#allocation2 + $0x138] sm:$0xff] }
 0x1b2   : > { %v1268_v32 = vpop.permute.xlu1 %1267 }
 0x1b3   : > { %v2041_v34 = vmax.f32 %v2039_v27, %v2040_v28  ;;  %v1632_v36 = vsel %vm1598_vm9, %v1589_v31, %v1268_v32  ;;  %v867_v39 = vpop.permute.xlu0 %866  ;;  %v405_v28 = vld [vmem:[#allocation2 + $0x130] sm:$0xff] }
 0x1b4   : > { %v1797_v37 = vpop.f32.mrf.mxu0  ;;  %4076 = vmatmul.mubr.msk.bf16.gmra.mxu0 %vm1684_vm10, %v1632_v36  ;;  %v1330_v40 = vsel %vm223_vm0, %v425_v33, %v867_v39 }
 0x1b5   : > { %2042 = vst.msk [vmem:[#allocation3 + $0x16] sm:$0xff] %vm1340_vm2, %v2041_v34  ;;  %v1798_v38 = vadd.f32 %v5047_v51, %v1797_v37  ;;  %4079 = vmatprep.mubr.msk.bf16.mxu0 %vm4420_vm4, %v4415_v0  ;;  %v427_v37 = vpack.c.bf16 %v406_v29, %v405_v28 }
 0x1b6   : > { %v930_v41 = vpop.permute.xlu1 %929  ;;  %v4029_v42 = vpop.f32.mrf.mxu0 }
 0x1b7   : > { %v1939_v43 = vmax.f32 %v1798_v38, 0.0  ;;  %v1376_v45 = vsel %vm1340_vm2, %v1330_v40, %v930_v41  ;;  %v974_v47 = vpop.permute.xlu0 %973 }
 0x1b8   : > { %v1800_v44 = vpop.f32.mrf.mxu0  ;;  %v1419_v48 = vsel %vm1383_vm5, %v1376_v45, %v974_v47 }
 0x1b9   : > { %1980 = vst.msk [vmem:[#allocation5 + $0x40] sm:$0xff] %vm1340_vm2, %v1939_v43  ;;  %v1801_v46 = vadd.f32 %v5047_v51, %v1800_v44 }
 0x1ba   : > { %v1037_v49 = vpop.permute.xlu1 %1036  ;;  %v4030_v50 = vpop.f32.mrf.mxu0 }
 0x1bb   : > { %v1940_v53 = vmax.f32 %v1801_v46, 0.0  ;;  %v1462_v56 = vsel %vm1426_vm3, %v1419_v48, %v1037_v49  ;;  %v1100_v57 = vpop.permute.xlu0 %1099 }
 0x1bc   : > { %v2197_v54 = vld [vmem:[#allocation3 + $0x13] sm:$0xff]  ;;  %v1505_v60 = vsel %vm1469_vm6, %v1462_v56, %v1100_v57 }
 0x1bd   : > { %v5111_v55 = vld [vmem:[#allocation3 + $0x12] sm:$0xff]  ;;  %1981 = vst.msk [vmem:[#allocation5 + $0x48] sm:$0xff] %vm1340_vm2, %v1940_v53  ;;  %v2209_v58 = vpack.c.bf16 %v2197_v54, %v2196_v52 }
 0x1be   : > { %v2189_v59 = vpack.c.bf16 %v5111_v55, %v5029_v35  ;;  %v1144_v61 = vpop.permute.xlu1 %1143  ;;  %v5118_v63 = vld [vmem:[#allocation3 + $0x14] sm:$0xff] }
 0x1bf   : > { %2355 = vrot.lane.b32.xlu1 %v2209_v58, %s4424_s11  ;;  %v1548_v3 = vsel %vm1512_vm7, %v1505_v60, %v1144_v61  ;;  %v1207_v4 = vpop.permute.xlu0 %1206  ;;  %v2229_v5 = vpack.c.bf16 %v5118_v63, %v2216_v62 }
 0x1c0   : > { %2334 = vrot.lane.b32.xlu0 %v2189_v59, %s4422_s9  ;;  %v1591_v6 = vsel %vm1555_vm8, %v1548_v3, %v1207_v4  ;;  %v2044_v32 = vld [vmem:[#allocation5 + $0x37] ss:$2 sm:$0xff]  ;;  %v2046_v33 = vld [vmem:[#allocation5 + $0x38] ss:$2 sm:$0xff] }
 0x1c1   : > { %v2051_v42 = vmax.f32 %v2044_v32, %v2046_v33  ;;  %v2265_v3 = vld [vmem:[#allocation3 + $0x16] sm:$0xff] }
 0x1c2   : > { %v1270_v35 = vpop.permute.xlu1 %1269  ;;  %v2245_v4 = vld [vmem:[#allocation3 + $0x15] sm:$0xff] }
 0x1c3   : > { %v1634_v8 = vsel %vm1598_vm9, %v1591_v6, %v1270_v35  ;;  %v869_v11 = vpop.permute.xlu0 %868 }
 0x1c4   : > { %2376 = vrot.lane.b32.xlu0 %v2229_v5, %s4425_s25  ;;  %v1805_v9 = vpop.f32.mrf.mxu0  ;;  %4080 = vmatmul.mubr.msk.bf16.gmra.mxu0 %vm1684_vm10, %v1634_v8  ;;  %v1333_v12 = vsel %vm223_vm0, %v426_v7, %v869_v11 }
 0x1c5   : > { %v1806_v10 = vadd.f32 %v5047_v51, %v1805_v9  ;;  %4083 = vmatprep.mubr.msk.bf16.mxu0 %vm4420_vm4, %v4415_v0 }
 0x1c6   : > { %v932_v13 = vpop.permute.xlu1 %931  ;;  %v4033_v14 = vpop.f32.mrf.mxu0 }
 0x1c7   : > { %v1941_v15 = vmax.f32 %v1806_v10, 0.0  ;;  %v1378_v17 = vsel %vm1340_vm2, %v1333_v12, %v932_v13  ;;  %v976_v19 = vpop.permute.xlu0 %975 }
 0x1c8   : > { %v1808_v16 = vpop.f32.mrf.mxu0  ;;  %v1421_v20 = vsel %vm1383_vm5, %v1378_v17, %v976_v19  ;;  %v2149_v19 = vld [vmem:[#allocation3 + $0x11] sm:$0xff] }
 0x1c9   : > { %1982 = vst.msk [vmem:[#allocation5 + $0x50] sm:$0xff] %vm1340_vm2, %v1941_v15  ;;  %v1809_v18 = vadd.f32 %v5047_v51, %v1808_v16 }
 0x1ca   : > { %v1039_v21 = vpop.permute.xlu1 %1038  ;;  %v4034_v22 = vpop.f32.mrf.mxu0 }
 0x1cb   : > { %v1942_v23 = vmax.f32 %v1809_v18, 0.0  ;;  %v1464_v24 = vsel %vm1426_vm3, %v1421_v20, %v1039_v21  ;;  %v1102_v25 = vpop.permute.xlu0 %1101 }
 0x1cc   : > { %v1507_v26 = vsel %vm1469_vm6, %v1464_v24, %v1102_v25 }
 0x1cd   : > { %1983 = vst.msk [vmem:[#allocation5 + $0x58] sm:$0xff] %vm1340_vm2, %v1942_v23 }
 0x1ce   : > { %v1146_v27 = vpop.permute.xlu1 %1145 }
 0x1cf   : > { %v1550_v30 = vsel %vm1512_vm7, %v1507_v26, %v1146_v27  ;;  %v1209_v31 = vpop.permute.xlu0 %1208 }
 0x1d0   : > { %v1593_v34 = vsel %vm1555_vm8, %v1550_v30, %v1209_v31  ;;  %v2048_v39 = vld [vmem:[#allocation5 + $0x49] ss:$2 sm:$0xff] }
 0x1d2   : > { %v1272_v36 = vpop.permute.xlu1 %1271 }
 0x1d3   : > { %v1636_v38 = vsel %vm1598_vm9, %v1593_v34, %v1272_v36  ;;  %v871_v45 = vpop.permute.xlu0 %870 }
 0x1d4   : > { %v2050_v40 = vld [vmem:[#allocation5 + $0x4a] ss:$2 sm:$0xff]  ;;  %v1813_v41 = vpop.f32.mrf.mxu0  ;;  %4084 = vmatmul.mubr.msk.bf16.gmra.mxu0 %vm1684_vm10, %v1636_v38  ;;  %v1336_v46 = vsel %vm223_vm0, %v427_v37, %v871_v45 }
 0x1d5   : > { %v2052_v43 = vmax.f32 %v2048_v39, %v2050_v40  ;;  %v1814_v44 = vadd.f32 %v5047_v51, %v1813_v41  ;;  %4087 = vmatprep.mubr.msk.bf16.mxu0 %vm4420_vm4, %v4415_v0 }
 0x1d6   : > { %v934_v47 = vpop.permute.xlu1 %933  ;;  %v4037_v48 = vpop.f32.mrf.mxu0 }
 0x1d7   : > { %v2053_v49 = vmax.f32 %v2051_v42, %v2052_v43  ;;  %v1943_v50 = vmax.f32 %v1814_v44, 0.0  ;;  %v1380_v53 = vsel %vm1340_vm2, %v1336_v46, %v934_v47  ;;  %v978_v56 = vpop.permute.xlu0 %977 }
 0x1d8   : > { %v1816_v52 = vpop.f32.mrf.mxu0  ;;  %v1423_v57 = vsel %vm1383_vm5, %v1380_v53, %v978_v56 }
 0x1d9   : > { %2054 = vst.msk [vmem:[#allocation3 + $0x20] sm:$0xff] %vm1340_vm2, %v2053_v49  ;;  %1984 = vst.msk [vmem:[#allocation5 + $0x60] sm:$0xff] %vm1340_vm2, %v1943_v50  ;;  %v1817_v54 = vadd.f32 %v5047_v51, %v1816_v52 }
 0x1da   : > { %v1041_v58 = vpop.permute.xlu1 %1040  ;;  %v4038_v59 = vpop.f32.mrf.mxu0 }
 0x1db   : > { %v1944_v60 = vmax.f32 %v1817_v54, 0.0  ;;  %v1466_v61 = vsel %vm1426_vm3, %v1423_v57, %v1041_v58  ;;  %v1104_v62 = vpop.permute.xlu0 %1103 }
 0x1dc   : > { %v1509_v1 = vsel %vm1469_vm6, %v1466_v61, %v1104_v62 }
 0x1dd   : > { %1985 = vst.msk [vmem:[#allocation5 + $0x68] sm:$0xff] %vm1340_vm2, %v1944_v60 }
 0x1de   : > { %v1148_v2 = vpop.permute.xlu1 %1147 }
 0x1df   : > { %v1552_v7 = vsel %vm1512_vm7, %v1509_v1, %v1148_v2  ;;  %v1211_v8 = vpop.permute.xlu0 %1210 }
 0x1e0   : > { %v2266_v5 = vld [vmem:[#allocation3 + $0x1e] sm:$0xff]  ;;  %v1595_v12 = vsel %vm1555_vm8, %v1552_v7, %v1211_v8 }
 0x1e1   : > { %v2246_v6 = vld [vmem:[#allocation3 + $0x1d] sm:$0xff]  ;;  %v2278_v9 = vpack.c.bf16 %v2266_v5, %v2265_v3 }
 0x1e2   : > { %v2218_v35 = vld [vmem:[#allocation3 + $0x1c] sm:$0xff]  ;;  %v2258_v10 = vpack.c.bf16 %v2246_v6, %v2245_v4  ;;  %v1274_v13 = vpop.permute.xlu1 %1273 }
 0x1e3   : > { %v2238_v11 = vpack.c.bf16 %v2218_v35, %v5118_v63  ;;  %v2170_v14 = vld [vmem:[#allocation3 + $0x1a] sm:$0xff]  ;;  %v1638_v15 = vsel %vm1598_vm9, %v1595_v12, %v1274_v13  ;;  %4098 = vmatmul.mubr.msk.bf16.vlgmr.msra.gmra.mxu1 %vm1340_vm2, %v2278_v9  ;;  %v2171_v23 = vld [vmem:[#allocation3 + $0x22] sm:$0xff] }
 0x1e4   : > { %2418 = vrot.lane.b32.xlu0 %v2258_v10, %s4426_s26  ;;  %v2150_v16 = vld [vmem:[#allocation3 + $0x19] sm:$0xff]  ;;  %v1821_v17 = vpop.f32.mrf.mxu0  ;;  %4088 = vmatmul.mubr.msk.bf16.gmra.mxu0 %vm1684_vm10, %v1638_v15  ;;  %v2181_v18 = vpack.c.bf16 %v2170_v14, %v5111_v55  ;;  %v2190_v26 = vpack.c.bf16 %v2171_v23, %v2170_v14  ;;  %v2151_v61 = vld [vmem:[#allocation3 + $0x21] sm:$0xff] }
 0x1e5   : > { %2397 = vrot.lane.b32.xlu1 %v2238_v11, %s4427_s6  ;;  %v1822_v63 = vadd.f32 %v5047_v51, %v1821_v17  ;;  %4101 = vmatprep.mubr.msk.bf16.mxu1 %vm4420_vm4, %v4415_v0  ;;  %v2161_v21 = vpack.c.bf16 %v2150_v16, %v2149_v19  ;;  %v2056_v28 = vld [vmem:[#allocation5 + $0x5b] ss:$2 sm:$0xff]  ;;  %v2058_v29 = vld [vmem:[#allocation5 + $0x5c] ss:$2 sm:$0xff] }
 0x1e6   : > { %4091 = vmatprep.mubr.msk.bf16.mxu0 %vm4420_vm4, %v4415_v0  ;;  %v4041_v20 = vpop.f32.mrf.mxu0  ;;  %v2063_v33 = vmax.f32 %v2056_v28, %v2058_v29  ;;  %v2198_v45 = vld [vmem:[#allocation3 + $0x1b] sm:$0xff] }
 0x1e7   : > { %v1945_v22 = vmax.f32 %v1822_v63, 0.0 }
 0x1e8   : > { %2315 = vrot.lane.b32.xlu0 %v2181_v18, %s4418_s23  ;;  %v1824_v24 = vpop.f32.mrf.mxu0 }
 0x1e9   : > { %2294 = vrot.lane.b32.xlu1 %v2161_v21, %s4419_s30  ;;  %1986 = vst.msk [vmem:[#allocation5 + $0x70] sm:$0xff] %vm1340_vm2, %v1945_v22  ;;  %v1825_v55 = vadd.f32 %v5047_v51, %v1824_v24 }
 0x1ea   : > { %v4042_v25 = vpop.f32.mrf.mxu0 }
 0x1eb   : > { %v1946_v27 = vmax.f32 %v1825_v55, 0.0 }
 0x1ed   : > { %2336 = vrot.lane.b32.xlu1 %v2190_v26, %s4422_s9  ;;  %1987 = vst.msk [vmem:[#allocation5 + $0x78] sm:$0xff] %vm1340_vm2, %v1946_v27 }
 0x1f4   : > { %v2060_v30 = vld [vmem:[#allocation5 + $0x6d] ss:$2 sm:$0xff]  ;;  %v2062_v31 = vld [vmem:[#allocation5 + $0x6e] ss:$2 sm:$0xff]  ;;  %v1829_v32 = vpop.f32.mrf.mxu0 }
 0x1f5   : > { %v2064_v34 = vmax.f32 %v2060_v30, %v2062_v31  ;;  %v1830_v36 = vadd.f32 %v5047_v51, %v1829_v32 }
 0x1f6   : > { %v4045_v37 = vpop.f32.mrf.mxu0 }
 0x1f7   : > { %v2065_v38 = vmax.f32 %v2063_v33, %v2064_v34  ;;  %v1947_v39 = vmax.f32 %v1830_v36, 0.0 }
 0x1f8   : > { %v1832_v40 = vpop.f32.mrf.mxu0 }
 0x1f9   : > { %2066 = vst.msk [vmem:[#allocation3 + $0x2a] sm:$0xff] %vm1340_vm2, %v2065_v38  ;;  %1988 = vst.msk [vmem:[#allocation5 + $0x80] sm:$0xff] %vm1340_vm2, %v1947_v39  ;;  %v1833_v41 = vadd.f32 %v5047_v51, %v1832_v40  ;;  %v4319_v40 = vld [vmem:[%s5740_s1 + $0x78] sm:$0xff]  }
 0x1fa   : > { %v4046_v42 = vpop.f32.mrf.mxu0  ;;  %4126 = vmatpush3.bf16.msra.mxu1 %v4319_v40 }
 0x1fb   : > { %v1948_v43 = vmax.f32 %v1833_v41, 0.0  ;;  %4127 = vmatprep.subr.bf16.mxu1 %v4415_v0 }
 0x1fd   : > { %1989 = vst.msk [vmem:[#allocation5 + $0x88] sm:$0xff] %vm1340_vm2, %v1948_v43  ;;  %v4320_v43 = vld [vmem:[%s5740_s1 + $0x70] sm:$0xff]  }
 0x1fe   : > { %4128 = vmatpush3.bf16.msra.mxu1 %v4320_v43 }
 0x1ff   : > { %4129 = vmatprep.subr.bf16.mxu1 %v4415_v0 }
 0x200   : > { %v2219_v44 = vld [vmem:[#allocation3 + $0x24] sm:$0xff]  ;;  %v5180_v49 = vld [vmem:[#allocation3 + $0x2c] sm:$0xff] }
 0x201   : > { %v2199_v46 = vld [vmem:[#allocation3 + $0x23] sm:$0xff]  ;;  %v2230_v47 = vpack.c.bf16 %v2219_v44, %v2218_v35  ;;  %v2239_v54 = vpack.c.bf16 %v5180_v49, %v2219_v44  ;;  %v2200_v34 = vld [vmem:[#allocation3 + $0x2b] sm:$0xff] }
 0x202   : > { %v2210_v48 = vpack.c.bf16 %v2199_v46, %v2198_v45  ;;  %v2172_v50 = vld [vmem:[#allocation3 + $0x2a] sm:$0xff] }
 0x203   : > { %2378 = vrot.lane.b32.xlu1 %v2230_v47, %s4425_s25  ;;  %v2182_v56 = vpack.c.bf16 %v2172_v50, %v2171_v23  ;;  %v2152_v58 = vld [vmem:[#allocation3 + $0x29] sm:$0xff] }
 0x204   : > { %2357 = vrot.lane.b32.xlu0 %v2210_v48, %s4424_s11  ;;  %v1837_v52 = vpop.f32.mrf.mxu0  ;;  %v2162_v1 = vpack.c.bf16 %v2152_v58, %v2151_v61  ;;  %v2068_v11 = vld [vmem:[#allocation5 + $0x7f] ss:$2 sm:$0xff]  ;;  %v2070_v12 = vld [vmem:[#allocation5 + $0x80] ss:$2 sm:$0xff] }
 0x205   : > { %v1838_v53 = vadd.f32 %v5047_v51, %v1837_v52  ;;  %v2075_v15 = vmax.f32 %v2068_v11, %v2070_v12  ;;  %v2267_v55 = vld [vmem:[#allocation3 + $0x26] sm:$0xff] }
 0x206   : > { %v4049_v57 = vpop.f32.mrf.mxu0  ;;  %v2247_v25 = vld [vmem:[#allocation3 + $0x25] sm:$0xff] }
 0x207   : > { %v1949_v59 = vmax.f32 %v1838_v53, 0.0  ;;  %2317 = vrot.lane.b32.xlu1 %v2182_v56, %s4418_s23  ;;  %v4321_v53 = vld [vmem:[%s5740_s1 + $0x68] sm:$0xff]  }
 0x208   : > { %2399 = vrot.lane.b32.xlu0 %v2239_v54, %s4427_s6  ;;  %v1840_v60 = vpop.f32.mrf.mxu0  ;;  %4130 = vmatpush3.bf16.msra.mxu1 %v4321_v53 }
 0x209   : > { %1990 = vst.msk [vmem:[#allocation5 + $0x90] sm:$0xff] %vm1340_vm2, %v1949_v59  ;;  %v1841_v62 = vadd.f32 %v5047_v51, %v1840_v60  ;;  %4131 = vmatprep.subr.bf16.mxu1 %v4415_v0  ;;  %v4322_v59 = vld [vmem:[%s5740_s1 + $0x60] sm:$0xff]  }
 0x20a   : > { %v4050_v2 = vpop.f32.mrf.mxu0 }
 0x20b   : > { %v1950_v3 = vmax.f32 %v1841_v62, 0.0  ;;  %v4323_v2 = vld [vmem:[%s5740_s1 + $0x58] sm:$0xff]  }
 0x20c   : > { %2296 = vrot.lane.b32.xlu0 %v2162_v1, %s4419_s30  ;;  %4132 = vmatpush3.bf16.msra.mxu1 %v4322_v59 }
 0x20d   : > { %1991 = vst.msk [vmem:[#allocation5 + $0x98] sm:$0xff] %vm1340_vm2, %v1950_v3  ;;  %4133 = vmatprep.subr.bf16.mxu1 %v4415_v0 }
 0x210   : > { %4134 = vmatpush3.bf16.msra.mxu1 %v4323_v2 }
 0x211   : > { %4135 = vmatprep.subr.bf16.mxu1 %v4415_v0 }
 0x214   : > { %v1845_v4 = vpop.f32.mrf.mxu0  ;;  %v2072_v13 = vld [vmem:[#allocation5 + $0x91] ss:$2 sm:$0xff] }
 0x215   : > { %v1846_v5 = vadd.f32 %v5047_v51, %v1845_v4 }
 0x216   : > { %v4053_v6 = vpop.f32.mrf.mxu0 }
 0x217   : > { %v1951_v35 = vmax.f32 %v1846_v5, 0.0 }
 0x218   : > { %v1848_v7 = vpop.f32.mrf.mxu0 }
 0x219   : > { %1992 = vst.msk [vmem:[#allocation5 + $0xa0] sm:$0xff] %vm1340_vm2, %v1951_v35  ;;  %v1849_v8 = vadd.f32 %v5047_v51, %v1848_v7 }
 0x21a   : > { %v4054_v9 = vpop.f32.mrf.mxu0 }
 0x21b   : > { %v1952_v10 = vmax.f32 %v1849_v8, 0.0 }
 0x21d   : > { %1993 = vst.msk [vmem:[#allocation5 + $0xa8] sm:$0xff] %vm1340_vm2, %v1952_v10 }
 0x220   : > { %v2074_v14 = vld [vmem:[#allocation5 + $0x92] ss:$2 sm:$0xff] }
 0x221   : > { %v2076_v16 = vmax.f32 %v2072_v13, %v2074_v14  ;;  %v4324_v14 = vld [vmem:[%s5740_s1 + $0x50] sm:$0xff]  }
 0x222   : > { %4136 = vmatpush3.bf16.msra.mxu1 %v4324_v14 }
 0x223   : > { %v2077_v17 = vmax.f32 %v2075_v15, %v2076_v16  ;;  %4137 = vmatprep.subr.bf16.mxu1 %v4415_v0 }
 0x224   : > { %v1853_v63 = vpop.f32.mrf.mxu0 }
 0x225   : > { %2078 = vst.msk [vmem:[#allocation3 + $0x34] sm:$0xff] %vm1340_vm2, %v2077_v17  ;;  %v1854_v18 = vadd.f32 %v5047_v51, %v1853_v63  ;;  %v4325_v63 = vld [vmem:[%s5740_s1 + $0x48] sm:$0xff]  }
 0x226   : > { %v4057_v19 = vpop.f32.mrf.mxu0  ;;  %4138 = vmatpush3.bf16.msra.mxu1 %v4325_v63 }
 0x227   : > { %v1953_v20 = vmax.f32 %v1854_v18, 0.0  ;;  %4139 = vmatprep.subr.bf16.mxu1 %v4415_v0 }
 0x228   : > { %v1856_v21 = vpop.f32.mrf.mxu0 }
 0x229   : > { %1994 = vst.msk [vmem:[#allocation5 + $0xb0] sm:$0xff] %vm1340_vm2, %v1953_v20  ;;  %v1857_v22 = vadd.f32 %v5047_v51, %v1856_v21  ;;  %v4326_v21 = vld [vmem:[%s5740_s1 + $0x40] sm:$0xff]  }
 0x22a   : > { %v4058_v23 = vpop.f32.mrf.mxu0  ;;  %4140 = vmatpush3.bf16.msra.mxu1 %v4326_v21 }
 0x22b   : > { %v1954_v24 = vmax.f32 %v1857_v22, 0.0  ;;  %4169 = vmatprep.subr.bf16.mxu1 %v4415_v0 }
 0x22c   : > { %v2268_v26 = vld [vmem:[#allocation3 + $0x2e] sm:$0xff]  ;;  %v2269_v6 = vld [vmem:[#allocation3 + $0x36] sm:$0xff] }
 0x22d   : > { %v2248_v27 = vld [vmem:[#allocation3 + $0x2d] sm:$0xff]  ;;  %1995 = vst.msk [vmem:[#allocation5 + $0xb8] sm:$0xff] %vm1340_vm2, %v1954_v24  ;;  %v2279_v29 = vpack.c.bf16 %v2268_v26, %v2267_v55  ;;  %v2249_v35 = vld [vmem:[#allocation3 + $0x35] sm:$0xff] }
 0x22e   : > { %v5200_v28 = vld [vmem:[#allocation3 + $0x32] sm:$0xff]  ;;  %v2259_v30 = vpack.c.bf16 %v2248_v27, %v2247_v25 }
 0x22f   : > { %v2191_v31 = vpack.c.bf16 %v5200_v28, %v2172_v50  ;;  %v2201_v32 = vld [vmem:[#allocation3 + $0x33] sm:$0xff]  ;;  %4102 = vmatmul.mubr.msk.bf16.gmra.mxu1 %vm1340_vm2, %v2279_v29 }
 0x230   : > { %2420 = vrot.lane.b32.xlu1 %v2259_v30, %s4426_s26  ;;  %v5206_v33 = vld [vmem:[#allocation3 + $0x34] sm:$0xff]  ;;  %4105 = vmatprep.mubr.msk.bf16.mxu1 %vm4420_vm4, %v4415_v0  ;;  %v2211_v36 = vpack.c.bf16 %v2201_v32, %v2200_v34 }
 0x231   : > { %2338 = vrot.lane.b32.xlu0 %v2191_v31, %s4422_s9  ;;  %v2231_v37 = vpack.c.bf16 %v5206_v33, %v5180_v49  ;;  %v2080_v48 = vld [vmem:[#allocation5 + $0xa3] ss:$2 sm:$0xff]  ;;  %v2082_v49 = vld [vmem:[#allocation5 + $0xa4] ss:$2 sm:$0xff]  ;;  %v2153_v17 = vld [vmem:[#allocation3 + $0x31] sm:$0xff] }
 0x232   : > { %v2087_v54 = vmax.f32 %v2080_v48, %v2082_v49 }
 0x234   : > { %2359 = vrot.lane.b32.xlu1 %v2211_v36, %s4424_s11  ;;  %v1861_v38 = vpop.f32.mrf.mxu0 }
 0x235   : > { %2380 = vrot.lane.b32.xlu0 %v2231_v37, %s4425_s25  ;;  %v1862_v39 = vadd.f32 %v5047_v51, %v1861_v38 }
 0x236   : > { %v4061_v41 = vpop.f32.mrf.mxu0 }
 0x237   : > { %v1955_v42 = vmax.f32 %v1862_v39, 0.0 }
 0x238   : > { %v1864_v44 = vpop.f32.mrf.mxu0 }
 0x239   : > { %1996 = vst.msk [vmem:[#allocation5 + $0xc0] sm:$0xff] %vm1340_vm2, %v1955_v42  ;;  %v1865_v45 = vadd.f32 %v5047_v51, %v1864_v44 }
 0x23a   : > { %v4062_v46 = vpop.f32.mrf.mxu0 }
 0x23b   : > { %v1956_v47 = vmax.f32 %v1865_v45, 0.0 }
 0x23d   : > { %1997 = vst.msk [vmem:[#allocation5 + $0xc8] sm:$0xff] %vm1340_vm2, %v1956_v47 }
 0x240   : > { %v2084_v50 = vld [vmem:[#allocation5 + $0xb5] ss:$2 sm:$0xff]  ;;  %v2086_v52 = vld [vmem:[#allocation5 + $0xb6] ss:$2 sm:$0xff] }
 0x241   : > { %v2088_v56 = vmax.f32 %v2084_v50, %v2086_v52 }
 0x243   : > { %v2089_v57 = vmax.f32 %v2087_v54, %v2088_v56 }
 0x244   : > { %v1869_v58 = vpop.f32.mrf.mxu0 }
 0x245   : > { %2090 = vst.msk [vmem:[#allocation3 + $0x3e] sm:$0xff] %vm1340_vm2, %v2089_v57  ;;  %v1870_v60 = vadd.f32 %v5047_v51, %v1869_v58 }
 0x246   : > { %v4065_v61 = vpop.f32.mrf.mxu0 }
 0x247   : > { %v1957_v62 = vmax.f32 %v1870_v60, 0.0 }
 0x248   : > { %v1872_v1 = vpop.f32.mrf.mxu0 }
 0x249   : > { %1998 = vst.msk [vmem:[#allocation5 + $0xd0] sm:$0xff] %vm1340_vm2, %v1957_v62  ;;  %v1873_v3 = vadd.f32 %v5047_v51, %v1872_v1 }
 0x24a   : > { %v4066_v4 = vpop.f32.mrf.mxu0 }
 0x24b   : > { %v1958_v5 = vmax.f32 %v1873_v3, 0.0 }
 0x24c   : > { %v2270_v7 = vld [vmem:[#allocation3 + $0x3e] sm:$0xff] }
 0x24d   : > { %v2250_v8 = vld [vmem:[#allocation3 + $0x3d] sm:$0xff]  ;;  %1999 = vst.msk [vmem:[#allocation5 + $0xd8] sm:$0xff] %vm1340_vm2, %v1958_v5  ;;  %v2280_v10 = vpack.c.bf16 %v2270_v7, %v2269_v6 }
 0x24e   : > { %v5244_v9 = vld [vmem:[#allocation3 + $0x3c] sm:$0xff]  ;;  %v2260_v11 = vpack.c.bf16 %v2250_v8, %v2249_v35 }
 0x24f   : > { %v2240_v12 = vpack.c.bf16 %v5244_v9, %v5206_v33  ;;  %v2174_v13 = vld [vmem:[#allocation3 + $0x3a] sm:$0xff]  ;;  %4106 = vmatmul.mubr.msk.bf16.gmra.mxu1 %vm1340_vm2, %v2280_v10 }
 0x250   : > { %2422 = vrot.lane.b32.xlu0 %v2260_v11, %s4426_s26  ;;  %v2154_v15 = vld [vmem:[#allocation3 + $0x39] sm:$0xff]  ;;  %4109 = vmatprep.mubr.msk.bf16.mxu1 %vm4420_vm4, %v4415_v0  ;;  %v2183_v16 = vpack.c.bf16 %v2174_v13, %v5200_v28 }
 0x251   : > { %2401 = vrot.lane.b32.xlu1 %v2240_v12, %s4427_s6  ;;  %v2163_v18 = vpack.c.bf16 %v2154_v15, %v2153_v17  ;;  %v2092_v27 = vld [vmem:[#allocation5 + $0xc7] ss:$2 sm:$0xff]  ;;  %v2094_v28 = vld [vmem:[#allocation5 + $0xc8] ss:$2 sm:$0xff] }
 0x252   : > { %v2099_v32 = vmax.f32 %v2092_v27, %v2094_v28  ;;  %v2202_v43 = vld [vmem:[#allocation3 + $0x3b] sm:$0xff] }
 0x254   : > { %2319 = vrot.lane.b32.xlu0 %v2183_v16, %s4418_s23  ;;  %v1877_v19 = vpop.f32.mrf.mxu0 }
 0x255   : > { %2298 = vrot.lane.b32.xlu1 %v2163_v18, %s4419_s30  ;;  %v1878_v20 = vadd.f32 %v5047_v51, %v1877_v19 }
 0x256   : > { %v4069_v22 = vpop.f32.mrf.mxu0 }
 0x257   : > { %v1959_v23 = vmax.f32 %v1878_v20, 0.0 }
 0x258   : > { %v1880_v24 = vpop.f32.mrf.mxu0 }
 0x259   : > { %2000 = vst.msk [vmem:[#allocation5 + $0xe0] sm:$0xff] %vm1340_vm2, %v1959_v23  ;;  %v1881_v55 = vadd.f32 %v5047_v51, %v1880_v24 }
 0x25a   : > { %v4070_v25 = vpop.f32.mrf.mxu0 }
 0x25b   : > { %v1960_v26 = vmax.f32 %v1881_v55, 0.0 }
 0x25d   : > { %2001 = vst.msk [vmem:[#allocation5 + $0xe8] sm:$0xff] %vm1340_vm2, %v1960_v26  ;;  %v4351_v26 = vld [vmem:[%s5741_s2] ss:$0 sm:$0xff] }
 0x260   : > { %v2096_v29 = vld [vmem:[#allocation5 + $0xd9] ss:$2 sm:$0xff] }
 0x264   : > { %v2098_v30 = vld [vmem:[#allocation5 + $0xda] ss:$2 sm:$0xff]  ;;  %v1885_v31 = vpop.f32.mrf.mxu0 }
 0x265   : > { %v2100_v33 = vmax.f32 %v2096_v29, %v2098_v30  ;;  %v1886_v34 = vadd.f32 %v5047_v51, %v1885_v31 }
 0x266   : > { %v4073_v36 = vpop.f32.mrf.mxu0 }
 0x267   : > { %v2101_v37 = vmax.f32 %v2099_v32, %v2100_v33  ;;  %v1961_v38 = vmax.f32 %v1886_v34, 0.0 }
 0x268   : > { %v1888_v39 = vpop.f32.mrf.mxu0 }
 0x269   : > { %2102 = vst.msk [vmem:[#allocation3 + $0x48] sm:$0xff] %vm1340_vm2, %v2101_v37  ;;  %2002 = vst.msk [vmem:[#allocation5 + $0xf0] sm:$0xff] %vm1340_vm2, %v1961_v38  ;;  %v1889_v40 = vadd.f32 %v5047_v51, %v1888_v39 }
 0x26a   : > { %v4074_v41 = vpop.f32.mrf.mxu0 }
 0x26b   : > { %v1962_v42 = vmax.f32 %v1889_v40, 0.0 }
 0x26d   : > { %2003 = vst.msk [vmem:[#allocation5 + $0xf8] sm:$0xff] %vm1340_vm2, %v1962_v42 }
 0x270   : > { %v2203_v44 = vld [vmem:[#allocation3 + $0x43] sm:$0xff] }
 0x271   : > { %v2175_v45 = vld [vmem:[#allocation3 + $0x42] sm:$0xff]  ;;  %v2212_v46 = vpack.c.bf16 %v2203_v44, %v2202_v43  ;;  %v2176_v58 = vld [vmem:[#allocation3 + $0x4a] sm:$0xff] }
 0x272   : > { %v2192_v47 = vpack.c.bf16 %v2175_v45, %v2174_v13  ;;  %v2223_v48 = vld [vmem:[#allocation3 + $0x44] sm:$0xff]  ;;  %v2184_v62 = vpack.c.bf16 %v2176_v58, %v2175_v45 }
 0x273   : > { %v2155_v49 = vld [vmem:[#allocation3 + $0x41] sm:$0xff]  ;;  %v2156_v50 = vld [vmem:[#allocation3 + $0x49] sm:$0xff]  ;;  %2361 = vrot.lane.b32.xlu0 %v2212_v46, %s4424_s11  ;;  %v2232_v54 = vpack.c.bf16 %v2223_v48, %v5244_v9 }
 0x274   : > { %2340 = vrot.lane.b32.xlu1 %v2192_v47, %s4422_s9  ;;  %v1893_v52 = vpop.f32.mrf.mxu0  ;;  %v2164_v56 = vpack.c.bf16 %v2156_v50, %v2155_v49  ;;  %v2104_v3 = vld [vmem:[#allocation5 + $0xeb] ss:$2 sm:$0xff]  ;;  %v2106_v4 = vld [vmem:[#allocation5 + $0xec] ss:$2 sm:$0xff] }
 0x275   : > { %v1894_v53 = vadd.f32 %v5047_v51, %v1893_v52  ;;  %v2111_v7 = vmax.f32 %v2104_v3, %v2106_v4  ;;  %v2271_v17 = vld [vmem:[#allocation3 + $0x46] sm:$0xff]  ;;  %v2293_v52 = vpop.permute.xlu0 %2292 }
 0x276   : > { %v4077_v57 = vpop.f32.mrf.mxu0  ;;  %v2251_v63 = vld [vmem:[#allocation3 + $0x45] sm:$0xff] }
 0x277   : > { %v1963_v59 = vmax.f32 %v1894_v53, 0.0  ;;  %2300 = vrot.lane.b32.xlu0 %v2164_v56, %s4419_s30 }
 0x278   : > { %2382 = vrot.lane.b32.xlu1 %v2232_v54, %s4425_s25  ;;  %v1896_v60 = vpop.f32.mrf.mxu0 }
 0x279   : > { %2004 = vst.msk [vmem:[#allocation5 + $0x100] sm:$0xff] %vm1340_vm2, %v1963_v59  ;;  %v1897_v61 = vadd.f32 %v5047_v51, %v1896_v60  ;;  %v2335_v60 = vpop.permute.xlu0 %2334 }
 0x27a   : > { %v4078_v1 = vpop.f32.mrf.mxu0 }
 0x27b   : > { %v1964_v2 = vmax.f32 %v1897_v61, 0.0 }
 0x27c   : > { %2321 = vrot.lane.b32.xlu1 %v2184_v62, %s4418_s23 }
 0x27d   : > { %2005 = vst.msk [vmem:[#allocation5 + $0x108] sm:$0xff] %vm1340_vm2, %v1964_v2  ;;  %v5315_v62 = vpop.permute.xlu0 %2376 }
 0x284   : > { %v2108_v5 = vld [vmem:[#allocation5 + $0xfd] ss:$2 sm:$0xff]  ;;  %v2110_v6 = vld [vmem:[#allocation5 + $0xfe] ss:$2 sm:$0xff]  ;;  %v1901_v35 = vpop.f32.mrf.mxu0 }
 0x285   : > { %v2112_v8 = vmax.f32 %v2108_v5, %v2110_v6  ;;  %v1902_v9 = vadd.f32 %v5047_v51, %v1901_v35 }
 0x286   : > { %v4081_v10 = vpop.f32.mrf.mxu0 }
 0x287   : > { %v2113_v11 = vmax.f32 %v2111_v7, %v2112_v8  ;;  %v1965_v12 = vmax.f32 %v1902_v9, 0.0  ;;  %v5319_v9 = vpop.permute.xlu0 %2418 }
 0x288   : > { %v1904_v13 = vpop.f32.mrf.mxu0 }
 0x289   : > { %2114 = vst.msk [vmem:[#allocation3 + $0x52] sm:$0xff] %vm1340_vm2, %v2113_v11  ;;  %2006 = vst.msk [vmem:[#allocation5 + $0x110] sm:$0xff] %vm1340_vm2, %v1965_v12  ;;  %v1905_v14 = vadd.f32 %v5047_v51, %v1904_v13  ;;  %v2275_v12 = vld [vmem:[#allocation3 + $0x66] sm:$0xff]  ;;  %v2276_v13 = vld [vmem:[#allocation3 + $0x6e] sm:$0xff] }
 0x28a   : > { %v4082_v15 = vpop.f32.mrf.mxu0 }
 0x28b   : > { %v1966_v16 = vmax.f32 %v1905_v14, 0.0  ;;  %v2127_v14 = vld [vmem:[#allocation3] sm:$0xff]  ;;  %v2128_v15 = vld [vmem:[#allocation3 + $0x8] sm:$0xff] }
 0x28d   : > { %2007 = vst.msk [vmem:[#allocation5 + $0x118] sm:$0xff] %vm1340_vm2, %v1966_v16 }
 0x290   : > { %v2272_v18 = vld [vmem:[#allocation3 + $0x4e] sm:$0xff] }
 0x291   : > { %v2252_v19 = vld [vmem:[#allocation3 + $0x4d] sm:$0xff]  ;;  %v2281_v21 = vpack.c.bf16 %v2272_v18, %v2271_v17 }
 0x292   : > { %v2224_v20 = vld [vmem:[#allocation3 + $0x4c] sm:$0xff]  ;;  %v2261_v22 = vpack.c.bf16 %v2252_v19, %v2251_v63  ;;  %v2225_v32 = vld [vmem:[#allocation3 + $0x54] sm:$0xff]  ;;  %v2283_v19 = vpack.c.bf16 %v2276_v13, %v2275_v12 }
 0x293   : > { %v2241_v23 = vpack.c.bf16 %v2224_v20, %v2223_v48  ;;  %v2204_v24 = vld [vmem:[#allocation3 + $0x4b] sm:$0xff]  ;;  %v2205_v55 = vld [vmem:[#allocation3 + $0x53] sm:$0xff]  ;;  %4110 = vmatmul.mubr.msk.bf16.gmra.mxu1 %vm1340_vm2, %v2281_v21  ;;  %v2233_v37 = vpack.c.bf16 %v2225_v32, %v2224_v20 }
 0x294   : > { %2424 = vrot.lane.b32.xlu1 %v2261_v22, %s4426_s26  ;;  %v5295_v25 = vld [vmem:[#allocation3 + $0x52] sm:$0xff]  ;;  %v1909_v51 = vpop.f32.mrf.mxu0  ;;  %4113 = vmatprep.mubr.msk.bf16.mxu1 %vm4420_vm4, %v4415_v0  ;;  %v2213_v28 = vpack.c.bf16 %v2205_v55, %v2204_v24  ;;  %v2316_v24 = vpop.permute.xlu0 %2315 }
 0x295   : > { %2403 = vrot.lane.b32.xlu0 %v2241_v23, %s4427_s6  ;;  %v1910_v27 = vadd.f32 %v4351_v26, %v1909_v51  ;;  %v2193_v30 = vpack.c.bf16 %v5295_v25, %v2176_v58  ;;  %v2116_v49 = vld [vmem:[#allocation5 + $0x10f] ss:$2 sm:$0xff]  ;;  %v2118_v50 = vld [vmem:[#allocation5 + $0x110] ss:$2 sm:$0xff]  ;;  %v2314_v58 = vpop.permute.xlu1 %2313  ;;  %v2140_v23 = vpack.c.bf16 %v2128_v15, %v2127_v14 }
 0x296   : > { %v4085_v29 = vpop.f32.mrf.mxu0  ;;  %v2123_v56 = vmax.f32 %v2116_v49, %v2118_v50  ;;  %v2157_v16 = vld [vmem:[#allocation3 + $0x51] sm:$0xff] }
 0x297   : > { %v1967_v31 = vmax.f32 %v1910_v27, 0.0  ;;  %v2236_v55 = vld [vmem:[#allocation3 + $0x6c] sm:$0xff]  ;;  %v2227_v27 = vld [vmem:[#allocation3 + $0x64] sm:$0xff] }
 0x298   : > { %2363 = vrot.lane.b32.xlu1 %v2213_v28, %s4424_s11  ;;  %v1912_v33 = vpop.f32.mrf.mxu0  ;;  %v2434_v28 = vsel %vm1340_vm2, %v2140_v23, %v2293_v52  ;;  %v2243_v29 = vpack.c.bf16 %v2236_v55, %v2227_v27  ;;  %v2228_v52 = vld [vmem:[#allocation3 + $0x6c] sm:$0xf] }
 0x299   : > { %2342 = vrot.lane.b32.xlu0 %v2193_v30, %s4422_s9  ;;  %2008 = vst.msk [vmem:[#allocation5 + $0x120] sm:$0xff] %vm1340_vm2, %v1967_v31  ;;  %v1913_v34 = vadd.f32 %v4351_v26, %v1912_v33  ;;  %v5313_v61 = vpop.permute.xlu1 %2355  ;;  %v2277_v30 = vld [vmem:[#allocation3 + $0x76] sm:$0xf]  ;;  %v2358_v31 = vpop.permute.xlu0 %2357  ;;  %v2255_v33 = vld [vmem:[#allocation3 + $0x65] sm:$0xff] }
 0x29a   : > { %v4086_v36 = vpop.f32.mrf.mxu0 }
 0x29b   : > { %v1968_v38 = vmax.f32 %v1913_v34, 0.0  ;;  %v2256_v34 = vld [vmem:[#allocation3 + $0x6d] sm:$0xff] }
 0x29d   : > { %2384 = vrot.lane.b32.xlu0 %v2233_v37, %s4425_s25  ;;  %2009 = vst.msk [vmem:[#allocation5 + $0x128] sm:$0xff] %vm1340_vm2, %v1968_v38  ;;  %v5317_v1 = vpop.permute.xlu1 %2397  ;;  %v2454_v37 = vsel %vm1426_vm3, %v2434_v28, %v2314_v58  ;;  %v2284_v38 = vpack.c.bf16 %v2277_v30, %v2277_v30 }
 0x2a1   : > { %v2295_v17 = vpop.permute.xlu1 %2294 }
 0x2a3   : > { %v2628_v39 = vpop.f32.mrf.mxu1 }
 0x2a4   : > { %v1917_v40 = vpop.f32.mrf.mxu0  ;;  %v2120_v53 = vld [vmem:[#allocation5 + $0x121] ss:$2 sm:$0xff] }
 0x2a5   : > { %v1918_v41 = vadd.f32 %v4351_v26, %v1917_v40  ;;  %v4099_v42 = vpop.f32.mrf.mxu1 }
 0x2a6   : > { %v4089_v43 = vpop.f32.mrf.mxu0  ;;  %v2208_v42 = vld [vmem:[#allocation3 + $0x6b] sm:$0xf] }
 0x2a7   : > { %v1969_v44 = vmax.f32 %v1918_v41, 0.0  ;;  %v5309_v45 = vpop.f32.mrf.mxu1  ;;  %v2263_v41 = vpack.c.bf16 %v2256_v34, %v2255_v33  ;;  %v2468_v43 = vsel %vm1512_vm7, %v2454_v37, %v2335_v60  ;;  %v2215_v49 = vpack.c.bf16 %v2208_v42, %v2208_v42  ;;  %v2133_v33 = vld [vmem:[#allocation3 + $0x30] sm:$0xff] }
 0x2a8   : > { %v1920_v46 = vpop.f32.mrf.mxu0  ;;  %v2482_v50 = vsel %vm1598_vm9, %v2468_v43, %v5313_v61  ;;  %v2235_v61 = vpack.c.bf16 %v2228_v52, %v2228_v52 }
 0x2a9   : > { %2010 = vst.msk [vmem:[#allocation5 + $0x130] sm:$0xff] %vm1340_vm2, %v1969_v44  ;;  %v4100_v47 = vpop.f32.mrf.mxu1  ;;  %v2129_v44 = vld [vmem:[#allocation3 + $0x10] sm:$0xff]  ;;  %v2130_v46 = vld [vmem:[#allocation3 + $0x18] sm:$0xff] }
 0x2aa   : > { %v4090_v48 = vpop.f32.mrf.mxu0  ;;  %v2400_v47 = vpop.permute.xlu0 %2399 }
 0x2b0   : > { %v2122_v54 = vld [vmem:[#allocation5 + $0x122] ss:$2 sm:$0xff] }
 0x2b1   : > { %v2124_v57 = vmax.f32 %v2120_v53, %v2122_v54  ;;  %v2497_v53 = vsel %vm2495_vm12, %v2482_v50, %v5315_v62  ;;  %v2141_v54 = vpack.c.bf16 %v2130_v46, %v2129_v44 }
 0x2b2   : > { %v2512_v58 = vsel %vm2510_vm13, %v2497_v53, %v5317_v1 }
 0x2b3   : > { %v2125_v59 = vmax.f32 %v2123_v56, %v2124_v57  ;;  %v2437_v60 = vsel %vm1340_vm2, %v2141_v54, %v2295_v17  ;;  %v2527_v62 = vsel %vm2525_vm14, %v2512_v58, %v5319_v9  ;;  %v2135_v58 = vld [vmem:[#allocation3 + $0x40] sm:$0xff] }
 0x2b4   : > { %v2456_v1 = vsel %vm1426_vm3, %v2437_v60, %v2316_v24 }
 0x2b5   : > { %2126 = vst.msk [vmem:[#allocation3 + $0x5c] sm:$0xff] %vm1340_vm2, %v2125_v59 }
 0x2bc   : > { %v2273_v2 = vld [vmem:[#allocation3 + $0x56] sm:$0xff]  ;;  %v2274_v3 = vld [vmem:[#allocation3 + $0x5e] sm:$0xff] }
 0x2bd   : > { %v2253_v4 = vld [vmem:[#allocation3 + $0x55] sm:$0xff]  ;;  %v2282_v5 = vpack.c.bf16 %v2274_v3, %v2273_v2  ;;  %v2254_v6 = vld [vmem:[#allocation3 + $0x5d] sm:$0xff]  ;;  %v2132_v2 = vld [vmem:[#allocation3 + $0x28] sm:$0xff]  ;;  %v2297_v3 = vpop.permute.xlu0 %2296 }
 0x2be   : > { %v2226_v35 = vld [vmem:[#allocation3 + $0x5c] sm:$0xff]  ;;  %v2262_v7 = vpack.c.bf16 %v2254_v6, %v2253_v4  ;;  %v2237_v4 = vld [vmem:[#allocation3 + $0x74] sm:$0xf] }
 0x2bf   : > { %v2242_v8 = vpack.c.bf16 %v2226_v35, %v2225_v32  ;;  %4114 = vmatmul.mubr.msk.bf16.gmra.mxu1 %vm1340_vm2, %v2282_v5  ;;  %v2178_v10 = vld [vmem:[#allocation3 + $0x5a] sm:$0xff]  ;;  %v2207_v21 = vld [vmem:[#allocation3 + $0x63] sm:$0xff]  ;;  %v2234_v36 = vpack.c.bf16 %v2227_v27, %v2226_v35  ;;  %v2257_v5 = vld [vmem:[#allocation3 + $0x75] sm:$0xf] }
 0x2c0   : > { %v2158_v11 = vld [vmem:[#allocation3 + $0x59] sm:$0xff]  ;;  %2426 = vrot.lane.b32.xlu0 %v2262_v7, %s4426_s26  ;;  %4117 = vmatprep.mubr.msk.bf16.mxu1 %vm4420_vm4, %v4415_v0  ;;  %v2185_v63 = vpack.c.bf16 %v2178_v10, %v5295_v25  ;;  %v2187_v22 = vld [vmem:[#allocation3 + $0x62] sm:$0xff]  ;;  %v2337_v25 = vpop.permute.xlu1 %2336  ;;  %v2188_v32 = vld [vmem:[#allocation3 + $0x6a] sm:$0xf]  ;;  %v2264_v12 = vpack.c.bf16 %v2257_v5, %v2257_v5 }
 0x2c1   : > { %2405 = vrot.lane.b32.xlu1 %v2242_v8, %s4427_s6  ;;  %v2165_v18 = vpack.c.bf16 %v2158_v11, %v2157_v16  ;;  %v2206_v20 = vld [vmem:[#allocation3 + $0x5b] sm:$0xff]  ;;  %v2194_v26 = vpack.c.bf16 %v2187_v22, %v2178_v10  ;;  %v2195_v40 = vpack.c.bf16 %v2188_v32, %v2188_v32  ;;  %v2470_v10 = vsel %vm1512_vm7, %v2456_v1, %v2337_v25  ;;  %v2339_v14 = vpop.permute.xlu0 %2338 }
 0x2c2   : > { %v2214_v51 = vpack.c.bf16 %v2207_v21, %v2206_v20  ;;  %v2159_v48 = vld [vmem:[#allocation3 + $0x61] sm:$0xf]  ;;  %v2244_v11 = vpack.c.bf16 %v2237_v4, %v2237_v4  ;;  %v2484_v13 = vsel %vm1598_vm9, %v2470_v10, %v2358_v31  ;;  %v2134_v32 = vld [vmem:[#allocation3 + $0x38] sm:$0xff]  ;;  %v2137_v10 = vld [vmem:[#allocation3 + $0x50] sm:$0xff] }
 0x2c3   : > { %v2166_v57 = vpack.c.bf16 %v2159_v48, %v2159_v48  ;;  %v2179_v59 = vld [vmem:[#allocation3 + $0x62] sm:$0xf] }
 0x2c4   : > { %2323 = vrot.lane.b32.xlu0 %v2185_v63, %s4418_s23  ;;  %v2379_v39 = vpop.permute.xlu1 %2378  ;;  %v2131_v6 = vld [vmem:[#allocation3 + $0x20] sm:$0xff]  ;;  %v2186_v7 = vpack.c.bf16 %v2179_v59, %v2179_v59 }
 0x2c5   : > { %2302 = vrot.lane.b32.xlu1 %v2165_v18, %s4419_s30  ;;  %v2142_v8 = vpack.c.bf16 %v2132_v2, %v2131_v6  ;;  %v2499_v15 = vsel %vm2495_vm12, %v2484_v13, %v2379_v39  ;;  %v2381_v21 = vpop.permute.xlu0 %2380 }
 0x2c6   : > { %v2514_v17 = vsel %vm2510_vm13, %v2499_v15, %v2400_v47 }
 0x2c7   : > { %4118 = vmatmul.mubr.msk.bf16.gmra.mxu1 %vm1340_vm2, %v2283_v19  ;;  %v2440_v9 = vsel %vm1340_vm2, %v2142_v8, %v2297_v3 }
 0x2c8   : > { %2365 = vrot.lane.b32.xlu0 %v2214_v51, %s4424_s11  ;;  %4121 = vmatprep.mubr.msk.bf16.mxu1 %vm4420_vm4, %v4415_v0  ;;  %v2318_v56 = vpop.permute.xlu1 %2317 }
 0x2c9   : > { %2344 = vrot.lane.b32.xlu1 %v2194_v26, %s4422_s9  ;;  %v2458_v63 = vsel %vm1426_vm3, %v2440_v9, %v2318_v56  ;;  %v2423_v24 = vpop.permute.xlu0 %2422  ;;  %v2136_v56 = vld [vmem:[#allocation3 + $0x48] sm:$0xff] }
 0x2ca   : > { %v2472_v18 = vsel %vm1512_vm7, %v2458_v63, %v2339_v14  ;;  %v2144_v59 = vpack.c.bf16 %v2136_v56, %v2135_v58 }
 0x2cc   : > { %2407 = vrot.lane.b32.xlu0 %v2243_v29, %s4427_s6  ;;  %v2421_v35 = vpop.permute.xlu1 %2420 }
 0x2cd   : > { %2386 = vrot.lane.b32.xlu1 %v2234_v36, %s4425_s25  ;;  %v2530_v19 = vsel %vm2525_vm14, %v2514_v17, %v2421_v35  ;;  %v2320_v31 = vpop.permute.xlu0 %2319  ;;  %v2143_v36 = vpack.c.bf16 %v2134_v32, %v2133_v33 }
 0x2cf   : > { %4122 = vmatmul.mubr.msk.bf16.gmra.mxu1 %vm1340_vm2, %v2284_v38 }
 0x2d0   : > { %2346 = vrot.lane.b32.xlu0 %v2195_v40, %s4422_s9  ;;  %4141 = vmatprep.mubr.msk.bf16.mxu1 %vm4420_vm4, %v4415_v0  ;;  %v2360_v16 = vpop.permute.xlu1 %2359 }
 0x2d1   : > { %2428 = vrot.lane.b32.xlu1 %v2263_v41, %s4426_s26  ;;  %v2486_v20 = vsel %vm1598_vm9, %v2472_v18, %v2360_v16 }
 0x2d2   : > { %v2501_v23 = vsel %vm2495_vm12, %v2486_v20, %v2381_v21 }
 0x2d4   : > { %2304 = vrot.lane.b32.xlu0 %v2166_v57, %s4419_s30  ;;  %v2402_v22 = vpop.permute.xlu1 %2401 }
 0x2d5   : > { %2367 = vrot.lane.b32.xlu1 %v2215_v49, %s4424_s11  ;;  %v2516_v55 = vsel %vm2510_vm13, %v2501_v23, %v2402_v22 }
 0x2d6   : > { %v2533_v51 = vsel %vm2525_vm14, %v2516_v55, %v2423_v24  ;;  %v2139_v55 = vld [vmem:[#allocation3 + $0x60] sm:$0xf] }
 0x2d7   : > { %4142 = vmatmul.mubr.bf16.vlgmr.msra.gmra.mxu1 %v2527_v62 }
 0x2d8   : > { %2388 = vrot.lane.b32.xlu0 %v2235_v61, %s4425_s25  ;;  %4145 = vmatprep.mubr.msk.bf16.mxu1 %vm4420_vm4, %v4415_v0  ;;  %v2299_v27 = vpop.permute.xlu1 %2298 }
 0x2d9   : > { %2325 = vrot.lane.b32.xlu1 %v2186_v7, %s4418_s23  ;;  %v2443_v38 = vsel %vm1340_vm2, %v2143_v36, %v2299_v27  ;;  %v2138_v7 = vld [vmem:[#allocation3 + $0x58] sm:$0xff] }
 0x2da   : > { %v2460_v39 = vsel %vm1426_vm3, %v2443_v38, %v2320_v31 }
 0x2dc   : > { %2430 = vrot.lane.b32.xlu0 %v2264_v12, %s4426_s26 }
 0x2dd   : > { %2409 = vrot.lane.b32.xlu1 %v2244_v11, %s4427_s6  ;;  %v2145_v11 = vpack.c.bf16 %v2138_v7, %v2137_v10 }
 0x2df   : > { %4146 = vmatmul.mubr.bf16.gmra.mxu1 %v2530_v19 }
 0x2e0   : > { %4149 = vmatprep.mubr.msk.bf16.mxu1 %vm4420_vm4, %v4415_v0 }
 0x2e5   : > { %v2362_v37 = vpop.permute.xlu0 %2361 }
 0x2e6   : > { %v2341_v29 = vpop.permute.xlu1 %2340 }
 0x2e7   : > { %4150 = vmatmul.mubr.bf16.gmra.mxu1 %v2533_v51  ;;  %v2474_v41 = vsel %vm1512_vm7, %v2460_v39, %v2341_v29 }
 0x2e8   : > { %4153 = vmatprep.mubr.msk.bf16.mxu1 %vm4420_vm4, %v4415_v0  ;;  %v2488_v43 = vsel %vm1598_vm9, %v2474_v41, %v2362_v37 }
 0x2e9   : > { %v2301_v42 = vpop.permute.xlu0 %2300 }
 0x2ea   : > { %v2383_v34 = vpop.permute.xlu1 %2382  ;;  %v2446_v60 = vsel %vm1340_vm2, %v2144_v59, %v2301_v42 }
 0x2eb   : > { %v2503_v46 = vsel %vm2495_vm12, %v2488_v43, %v2383_v34 }
 0x2ee   : > { %v2322_v40 = vpop.permute.xlu1 %2321 }
 0x2ef   : > { %v5378_v26 = vpop.f32.mrf.mxu1  ;;  %v2462_v2 = vsel %vm1426_vm3, %v2446_v60, %v2322_v40 }
 0x2f1   : > { %v4103_v28 = vpop.f32.mrf.mxu1 }
 0x2f2   : > { %v2146_v28 = vpack.c.bf16 %v2139_v55, %v2139_v55 }
 0x2f3   : > { %v5380_v25 = vpop.f32.mrf.mxu1 }
 0x2f5   : > { %v4104_v30 = vpop.f32.mrf.mxu1 }
 0x306   : > { %v2425_v44 = vpop.permute.xlu1 %2424 }
 0x307   : > { %v2404_v47 = vpop.permute.xlu0 %2403 }
 0x308   : > { %v2518_v48 = vsel %vm2510_vm13, %v2503_v46, %v2404_v47 }
 0x309   : > { %v2536_v49 = vsel %vm2525_vm14, %v2518_v48, %v2425_v44 }
 0x30a   : > { %4154 = vmatmul.mubr.bf16.gmra.mxu1 %v2536_v49  ;;  %v2364_v61 = vpop.permute.xlu1 %2363 }
 0x30b   : > { %4157 = vmatprep.mubr.msk.bf16.mxu1 %vm4420_vm4, %v4415_v0  ;;  %v2343_v57 = vpop.permute.xlu0 %2342 }
 0x30c   : > { %v2476_v3 = vsel %vm1512_vm7, %v2462_v2, %v2343_v57 }
 0x30d   : > { %v2490_v5 = vsel %vm1598_vm9, %v2476_v3, %v2364_v61  ;;  %v5437_v3 = vld [vmem:[%s5741_s2 + $0x1] ss:$0 sm:$0xff] }
 0x30f   : > { %v5391_v50 = vpop.f32.mrf.mxu1  ;;  %v2385_v4 = vpop.permute.xlu0 %2384 }
 0x310   : > { %v2505_v62 = vsel %vm2495_vm12, %v2490_v5, %v2385_v4 }
 0x311   : > { %v4107_v52 = vpop.f32.mrf.mxu1 }
 0x313   : > { %v5393_v53 = vpop.f32.mrf.mxu1 }
 0x315   : > { %v4108_v54 = vpop.f32.mrf.mxu1 }
 0x332   : > { %v2427_v6 = vpop.permute.xlu0 %2426 }
 0x333   : > { %v2406_v35 = vpop.permute.xlu1 %2405 }
 0x334   : > { %v2520_v1 = vsel %vm2510_vm13, %v2505_v62, %v2406_v35 }
 0x335   : > { %v2539_v8 = vsel %vm2525_vm14, %v2520_v1, %v2427_v6 }
 0x336   : > { %4158 = vmatmul.mubr.bf16.gmra.mxu1 %v2539_v8  ;;  %v2324_v12 = vpop.permute.xlu0 %2323 }
 0x337   : > { %v2303_v13 = vpop.permute.xlu1 %2302  ;;  %4161 = vmatprep.mubr.msk.bf16.mxu1 %vm4420_vm4, %v4415_v0 }
 0x338   : > { %v2449_v14 = vsel %vm1340_vm2, %v2145_v11, %v2303_v13 }
 0x339   : > { %v2464_v16 = vsel %vm1426_vm3, %v2449_v14, %v2324_v12 }
 0x33a   : > { %v2366_v9 = vpop.permute.xlu0 %2365 }
 0x33b   : > { %v2345_v15 = vpop.permute.xlu1 %2344 }
 0x33c   : > { %v2478_v17 = vsel %vm1512_vm7, %v2464_v16, %v2345_v15 }
 0x33d   : > { %v2492_v19 = vsel %vm1598_vm9, %v2478_v17, %v2366_v9 }
 0x33e   : > { %v2408_v63 = vpop.permute.xlu0 %2407 }
 0x33f   : > { %v2387_v18 = vpop.permute.xlu1 %2386 }
 0x340   : > { %v2507_v20 = vsel %vm2495_vm12, %v2492_v19, %v2387_v18 }
 0x341   : > { %v2522_v23 = vsel %vm2510_vm13, %v2507_v20, %v2408_v63 }
 0x342   : > { %v2347_v21 = vpop.permute.xlu0 %2346 }
 0x343   : > { %v2429_v22 = vpop.permute.xlu1 %2428 }
 0x344   : > { %v2542_v24 = vsel %vm2525_vm14, %v2522_v23, %v2429_v22 }
 0x345   : > { %4162 = vmatmul.mubr.bf16.gmra.mxu1 %v2542_v24 }
 0x346   : > { %4165 = vmatprep.mubr.msk.bf16.mxu1 %vm4420_vm4, %v4415_v0  ;;  %v2305_v51 = vpop.permute.xlu0 %2304 }
 0x347   : > { %v2368_v27 = vpop.permute.xlu1 %2367  ;;  %v2452_v29 = vsel %vm1340_vm2, %v2146_v28, %v2305_v51 }
 0x34a   : > { %v2389_v31 = vpop.permute.xlu0 %2388 }
 0x34b   : > { %v2326_v30 = vpop.permute.xlu1 %2325 }
 0x34c   : > { %v2466_v32 = vsel %vm1426_vm3, %v2452_v29, %v2326_v30 }
 0x34d   : > { %v2480_v33 = vsel %vm1512_vm7, %v2466_v32, %v2347_v21 }
 0x34e   : > { %v2494_v34 = vsel %vm1598_vm9, %v2480_v33, %v2368_v27  ;;  %v2431_v38 = vpop.permute.xlu0 %2430 }
 0x34f   : > { %v2509_v36 = vsel %vm2495_vm12, %v2494_v34, %v2389_v31  ;;  %v2410_v37 = vpop.permute.xlu1 %2409 }
 0x350   : > { %v2524_v39 = vsel %vm2510_vm13, %v2509_v36, %v2410_v37 }
 0x351   : > { %v2545_v40 = vsel %vm2525_vm14, %v2524_v39, %v2431_v38 }
 0x352   : > { %4166 = vmatmul.mubr.bf16.gmra.mxu1 %v2545_v40 }
 0x353   : > { %4185 = vmatprep.mubr.msk.bf16.mxu1 %vm4420_vm4, %v4415_v0  ;;  %v5422_v41 = vpop.f32.mrf.mxu1 }
 0x355   : > { %v4111_v42 = vpop.f32.mrf.mxu1 }
 0x357   : > { %v5424_v43 = vpop.f32.mrf.mxu1 }
 0x359   : > { %v4112_v44 = vpop.f32.mrf.mxu1 }
 0x37f   : > { %v5426_v46 = vpop.f32.mrf.mxu1 }
 0x381   : > { %v4115_v47 = vpop.f32.mrf.mxu1 }
 0x383   : > { %v5428_v48 = vpop.f32.mrf.mxu1 }
 0x385   : > { %v4116_v49 = vpop.f32.mrf.mxu1 }
 0x387   : > { %v5430_v52 = vpop.f32.mrf.mxu1 }
 0x389   : > { %v4119_v54 = vpop.f32.mrf.mxu1 }
 0x38a   : > { %v4328_v54 = vld [vmem:[%s5740_s1 + $0x130] sm:$0xff]  }
 0x38b   : > { %v5432_v56 = vpop.f32.mrf.mxu1 }
 0x38d   : > { %v4120_v57 = vpop.f32.mrf.mxu1 }
 0x38f   : > { %v2676_v58 = vpop.f32.mrf.mxu1 }
 0x390   : > { %v4330_v58 = vld [vmem:[%s5740_s1 + $0x120] sm:$0xff]  }
 0x391   : > { %v4123_v59 = vpop.f32.mrf.mxu1 }
 0x393   : > { %v2679_v60 = vpop.f32.mrf.mxu1 }
 0x395   : > { %v4124_v2 = vpop.f32.mrf.mxu1 }
 0x396   : > { %v4331_v2 = vld [vmem:[%s5740_s1 + $0x118] sm:$0xff]  }
 0x397   : > { %v2764_v61 = vpop.f32.mrf.mxu1 }
 0x399   : > { %v4143_v4 = vpop.f32.mrf.mxu1 }
 0x39a   : > { %v4332_v4 = vld [vmem:[%s5740_s1 + $0x110] sm:$0xff]  }
 0x39b   : > { %v2767_v5 = vpop.f32.mrf.mxu1 }
 0x39c   : > { %v2768_v62 = vadd.f32 %v2767_v5, %v5309_v45  ;;  %v4333_v5 = vld [vmem:[%s5740_s1 + $0x108] sm:$0xff]  }
 0x39d   : > { %v4144_v6 = vpop.f32.mrf.mxu1 }
 0x39e   : > { %v2827_v35 = vadd.f32 %v5437_v3, %v2768_v62  ;;  %v4334_v62 = vld [vmem:[%s5740_s1 + $0x100] sm:$0xff]  }
 0x39f   : > { %v2772_v7 = vpop.f32.mrf.mxu1 }
 0x3a0   : > { %v2840_v1 = vmax.f32 %v2827_v35, 0.0  ;;  %v2773_v8 = vadd.f32 %v2772_v7, %v5378_v26 }
 0x3a1   : > { %v4147_v10 = vpop.f32.mrf.mxu1 }
 0x3a2   : > { %2853 = vst.msk [vmem:[#allocation6 + $0x8] sm:$0xff] %vm1426_vm3, %v2840_v1  ;;  %v2828_v11 = vadd.f32 %v5437_v3, %v2773_v8 }
 0x3a3   : > { %v2775_v12 = vpop.f32.mrf.mxu1 }
 0x3a4   : > { %v2841_v13 = vmax.f32 %v2828_v11, 0.0  ;;  %v2776_v14 = vadd.f32 %v2775_v12, %v5380_v25 }
 0x3a5   : > { %v4148_v9 = vpop.f32.mrf.mxu1 }
 0x3a6   : > { %2854 = vst.msk [vmem:[#allocation6 + $0x10] sm:$0xff] %vm1426_vm3, %v2841_v13  ;;  %v2829_v45 = vadd.f32 %v5437_v3, %v2776_v14 }
 0x3a7   : > { %v2780_v15 = vpop.f32.mrf.mxu1 }
 0x3a8   : > { %v2842_v16 = vmax.f32 %v2829_v45, 0.0  ;;  %v2781_v26 = vadd.f32 %v2780_v15, %v5391_v50 }
 0x3a9   : > { %v4151_v17 = vpop.f32.mrf.mxu1 }
 0x3aa   : > { %2855 = vst.msk [vmem:[#allocation6 + $0x18] sm:$0xff] %vm1426_vm3, %v2842_v16  ;;  %v2830_v63 = vadd.f32 %v5437_v3, %v2781_v26 }
 0x3ab   : > { %v2783_v18 = vpop.f32.mrf.mxu1 }
 0x3ac   : > { %v2843_v19 = vmax.f32 %v2830_v63, 0.0  ;;  %v2784_v25 = vadd.f32 %v2783_v18, %v5393_v53  ;;  %v4327_v53 = vld [vmem:[%s5740_s1 + $0x138] sm:$0xff]  }
 0x3ad   : > { %v4152_v20 = vpop.f32.mrf.mxu1  ;;  %v2875_v22 = vld [vmem:[#allocation6 + $0xb] ss:$2 sm:$0xf]  ;;  %v2877_v23 = vld [vmem:[#allocation6 + $0xc] ss:$2 sm:$0xf]  ;;  %4170 = vmatpush3.bf16.msra.mxu1 %v4327_v53 }
 0x3ae   : > { %2856 = vst.msk [vmem:[#allocation6 + $0x20] sm:$0xff] %vm1426_vm3, %v2843_v19  ;;  %v2831_v21 = vadd.f32 %v5437_v3, %v2784_v25  ;;  %v2882_v50 = vmax.f32 %v2875_v22, %v2877_v23  ;;  %4171 = vmatprep.subr.bf16.mxu1 %v4415_v0 }
 0x3b0   : > { %v2844_v24 = vmax.f32 %v2831_v21, 0.0 }
 0x3b1   : > { %v2879_v55 = vld [vmem:[#allocation6 + $0x15] ss:$2 sm:$0xf]  ;;  %v2881_v51 = vld [vmem:[#allocation6 + $0x16] ss:$2 sm:$0xf]  ;;  %4172 = vmatpush3.bf16.msra.mxu1 %v4328_v54 }
 0x3b2   : > { %v2883_v27 = vmax.f32 %v2879_v55, %v2881_v51  ;;  %2857 = vst.msk [vmem:[#allocation6 + $0x28] sm:$0xff] %vm1426_vm3, %v2844_v24  ;;  %4173 = vmatprep.subr.bf16.mxu1 %v4415_v0  ;;  %v2963_v54 = vld [vmem:[#allocation4 + $0x28] sm:$0xf] }
 0x3b4   : > { %v2884_v28 = vmax.f32 %v2882_v50, %v2883_v27 }
 0x3b5   : > { %v2887_v40 = vld [vmem:[#allocation6 + $0x1f] ss:$2 sm:$0xf]  ;;  %v2889_v42 = vld [vmem:[#allocation6 + $0x20] ss:$2 sm:$0xf] }
 0x3b6   : > { %2885 = vst.msk [vmem:[#allocation4 + $0xe] sm:$0xf] %vm2864_vm1, %v2884_v28 }
 0x3b9   : > { %v2891_v44 = vld [vmem:[#allocation6 + $0x29] ss:$2 sm:$0xf] }
 0x3bd   : > { %v5478_v59 = vld [vmem:[#allocation4 + $0x8] sm:$0xff] }
 0x3be   : > { %v2967_v55 = vld [vmem:[#allocation4 + $0xc] sm:$0xff] }
 0x3ca   : > { %v2788_v29 = vpop.f32.mrf.mxu1 }
 0x3cb   : > { %v2789_v30 = vadd.f32 %v2788_v29, %v5422_v41  ;;  %v2894_v41 = vmax.f32 %v2887_v40, %v2889_v42 }
 0x3cc   : > { %v4155_v31 = vpop.f32.mrf.mxu1 }
 0x3cd   : > { %v2832_v32 = vadd.f32 %v5437_v3, %v2789_v30 }
 0x3ce   : > { %v2791_v33 = vpop.f32.mrf.mxu1 }
 0x3cf   : > { %v2845_v34 = vmax.f32 %v2832_v32, 0.0  ;;  %v2792_v36 = vadd.f32 %v2791_v33, %v5424_v43  ;;  %v4329_v43 = vld [vmem:[%s5740_s1 + $0x128] sm:$0xff]  }
 0x3d0   : > { %v4156_v37 = vpop.f32.mrf.mxu1  ;;  %4174 = vmatpush3.bf16.msra.mxu1 %v4329_v43 }
 0x3d1   : > { %2858 = vst.msk [vmem:[#allocation6 + $0x30] sm:$0xff] %vm1426_vm3, %v2845_v34  ;;  %v2833_v38 = vadd.f32 %v5437_v3, %v2792_v36  ;;  %4175 = vmatprep.subr.bf16.mxu1 %v4415_v0 }
 0x3d3   : > { %v2846_v39 = vmax.f32 %v2833_v38, 0.0 }
 0x3d4   : > { %4176 = vmatpush3.bf16.msra.mxu1 %v4330_v58 }
 0x3d5   : > { %2859 = vst.msk [vmem:[#allocation6 + $0x38] sm:$0xff] %vm1426_vm3, %v2846_v39  ;;  %4177 = vmatprep.subr.bf16.mxu1 %v4415_v0 }
 0x3d8   : > { %v2893_v47 = vld [vmem:[#allocation6 + $0x2a] ss:$2 sm:$0xf]  ;;  %4178 = vmatpush3.bf16.msra.mxu1 %v4331_v2 }
 0x3d9   : > { %v2895_v49 = vmax.f32 %v2891_v44, %v2893_v47  ;;  %4179 = vmatprep.subr.bf16.mxu1 %v4415_v0  ;;  %v2970_v47 = vld [vmem:[#allocation4 + $0x24] sm:$0xff] }
 0x3da   : > { %v2978_v2 = vld [vmem:[#allocation4 + $0x25] sm:$0xff] }
 0x3db   : > { %v2896_v57 = vmax.f32 %v2894_v41, %v2895_v49 }
 0x3dc   : > { %4180 = vmatpush3.bf16.msra.mxu1 %v4332_v4  ;;  %v2899_v9 = vld [vmem:[#allocation6 + $0x33] ss:$2 sm:$0xf]  ;;  %v2901_v45 = vld [vmem:[#allocation6 + $0x34] ss:$2 sm:$0xf] }
 0x3dd   : > { %2897 = vst.msk [vmem:[#allocation4 + $0x14] sm:$0xf] %vm2864_vm1, %v2896_v57  ;;  %4181 = vmatprep.subr.bf16.mxu1 %v4415_v0  ;;  %v2979_v4 = vld [vmem:[#allocation4 + $0x2d] sm:$0xf] }
 0x3e0   : > { %4182 = vmatpush3.bf16.msra.mxu1 %v4333_v5  ;;  %v2971_v5 = vld [vmem:[#allocation4 + $0x2c] sm:$0xf] }
 0x3e1   : > { %4183 = vmatprep.subr.bf16.mxu1 %v4415_v0 }
 0x3e4   : > { %v5480_v60 = vld [vmem:[#allocation4 + $0x10] sm:$0xff]  ;;  %4184 = vmatpush3.bf16.msra.mxu1 %v4334_v62 }
 0x3e5   : > { %v2964_v61 = vpack.c.bf16 %v5480_v60, %v5478_v59  ;;  %4197 = vmatprep.subr.bf16.mxu1 %v4415_v0  ;;  %v2975_v51 = vld [vmem:[#allocation4 + $0xd] sm:$0xff] }
 0x3e6   : > { %v5517_v29 = vld [vmem:[#allocation4 + $0xe] sm:$0xff] }
 0x3e7   : > { %3059 = vrot.lane.b32.xlu1 %v2964_v61, %s4418_s23  ;;  %v2966_v61 = vpack.c.bf16 %v2963_v54, %v2963_v54 }
 0x3f6   : > { %v2796_v6 = vpop.f32.mrf.mxu1 }
 0x3f7   : > { %v2797_v35 = vadd.f32 %v2796_v6, %v5426_v46  ;;  %v2906_v46 = vmax.f32 %v2899_v9, %v2901_v45  ;;  %v2982_v6 = vpack.c.bf16 %v2979_v4, %v2979_v4  ;;  %v2932_v9 = vld [vmem:[#allocation4 + $0x11] sm:$0xff] }
 0x3f8   : > { %v4159_v7 = vpop.f32.mrf.mxu1  ;;  %v4337_v4 = vld [vmem:[%s5740_s1 + $0xe8] sm:$0xff]  }
 0x3f9   : > { %v2834_v1 = vadd.f32 %v5437_v3, %v2797_v35  ;;  %v2974_v35 = vpack.c.bf16 %v2971_v5, %v2971_v5  ;;  %v2938_v7 = vld [vmem:[#allocation4 + $0x2] sm:$0xff]  ;;  %v4338_v5 = vld [vmem:[%s5740_s1 + $0xe0] sm:$0xff]  }
 0x3fa   : > { %v2799_v8 = vpop.f32.mrf.mxu1 }
 0x3fb   : > { %v2847_v10 = vmax.f32 %v2834_v1, 0.0  ;;  %v2800_v11 = vadd.f32 %v2799_v8, %v5428_v48  ;;  %v2939_v1 = vld [vmem:[#allocation4 + $0xa] sm:$0xff]  ;;  %v2930_v8 = vld [vmem:[#allocation4 + $0x1] sm:$0xff] }
 0x3fc   : > { %v4160_v12 = vpop.f32.mrf.mxu1 }
 0x3fd   : > { %2860 = vst.msk [vmem:[#allocation6 + $0x40] sm:$0xff] %vm1426_vm3, %v2847_v10  ;;  %v2835_v13 = vadd.f32 %v5437_v3, %v2800_v11  ;;  %v2931_v10 = vld [vmem:[#allocation4 + $0x9] sm:$0xff]  ;;  %v2943_v11 = vpack.c.bf16 %v2939_v1, %v2938_v7 }
 0x3fe   : > { %v2935_v12 = vpack.c.bf16 %v2931_v10, %v2930_v8  ;;  %v2958_v10 = vld [vmem:[#allocation4 + $0x27] sm:$0xf] }
 0x3ff   : > { %v2848_v14 = vmax.f32 %v2835_v13, 0.0  ;;  %v2946_v13 = vld [vmem:[#allocation4 + $0x6] sm:$0xff] }
 0x400   : > { %v2951_v45 = vpack.c.bf16 %v5517_v29, %v2946_v13  ;;  %v2961_v13 = vpack.c.bf16 %v2958_v10, %v2958_v10 }
 0x401   : > { %2861 = vst.msk [vmem:[#allocation6 + $0x48] sm:$0xff] %vm1426_vm3, %v2848_v14 }
 0x404   : > { %v2903_v15 = vld [vmem:[#allocation6 + $0x3d] ss:$2 sm:$0xf]  ;;  %v2905_v16 = vld [vmem:[#allocation6 + $0x3e] ss:$2 sm:$0xf] }
 0x405   : > { %v2907_v26 = vmax.f32 %v2903_v15, %v2905_v16  ;;  %v2804_v17 = vpop.f32.mrf.mxu1 }
 0x406   : > { %v2805_v63 = vadd.f32 %v2804_v17, %v5430_v52 }
 0x407   : > { %v2908_v18 = vmax.f32 %v2906_v46, %v2907_v26  ;;  %v4163_v19 = vpop.f32.mrf.mxu1  ;;  %v2940_v26 = vld [vmem:[#allocation4 + $0x12] sm:$0xff] }
 0x408   : > { %v2836_v48 = vadd.f32 %v5437_v3, %v2805_v63  ;;  %v2911_v33 = vld [vmem:[#allocation6 + $0x47] ss:$2 sm:$0xf]  ;;  %v2913_v34 = vld [vmem:[#allocation6 + $0x48] ss:$2 sm:$0xf] }
 0x409   : > { %2909 = vst.msk [vmem:[#allocation4 + $0x1a] sm:$0xf] %vm2864_vm1, %v2908_v18  ;;  %v2807_v25 = vpop.f32.mrf.mxu1  ;;  %v2918_v39 = vmax.f32 %v2911_v33, %v2913_v34  ;;  %v684_v33 = vld [vmem:[#allocation2 + $0x164] sm:$0xf] }
 0x40a   : > { %v2849_v20 = vmax.f32 %v2836_v48, 0.0  ;;  %v2808_v21 = vadd.f32 %v2807_v25, %v5432_v56  ;;  %v2950_v48 = vld [vmem:[#allocation4 + $0x26] sm:$0xf] }
 0x40b   : > { %v4164_v22 = vpop.f32.mrf.mxu1 }
 0x40c   : > { %2862 = vst.msk [vmem:[#allocation6 + $0x50] sm:$0xff] %vm1426_vm3, %v2849_v20  ;;  %v2837_v23 = vadd.f32 %v5437_v3, %v2808_v21  ;;  %v2953_v21 = vpack.c.bf16 %v2950_v48, %v2950_v48  ;;  %v4345_v22 = vld [vmem:[%s5742_s3 + $0x18] sm:$0xff]   ;;  %v2922_v48 = vld [vmem:[#allocation4] sm:$0xff] }
 0x40d   : > { %4242 = vmatpush3.bf16.msra.mxu0 %v4345_v22  ;;  %v2927_v22 = vpack.c.bf16 %v5478_v59, %v2922_v48  ;;  %v4344_v59 = vld [vmem:[%s5740_s1 + $0x140] sm:$0xff]  }
 0x40e   : > { %v2850_v24 = vmax.f32 %v2837_v23, 0.0  ;;  %v469_v23 = vld [vmem:[#allocation2 + $0x141] sm:$0xf]  ;;  %4243 = vmatprep.subr.bf16.mxu0 %v4415_v0 }
 0x410   : > { %2863 = vst.msk [vmem:[#allocation6 + $0x58] sm:$0xff] %vm1426_vm3, %v2850_v24  ;;  %v2968_v52 = vld [vmem:[#allocation4 + $0x14] sm:$0xff] }
 0x411   : > { %v2976_v50 = vld [vmem:[#allocation4 + $0x15] sm:$0xff]  ;;  %v2972_v28 = vpack.c.bf16 %v2968_v52, %v2967_v55  ;;  %v490_v55 = vpack.c.bf16 %v469_v23, %v469_v23  ;;  %v555_v52 = vld [vmem:[#allocation2 + $0x152] sm:$0xf] }
 0x412   : > { %v5515_v27 = vld [vmem:[#allocation4 + $0x18] sm:$0xff]  ;;  %v2980_v53 = vpack.c.bf16 %v2976_v50, %v2975_v51  ;;  %v2812_v31 = vpop.f32.mrf.mxu1  ;;  %v531_v24 = vld [vmem:[#allocation2 + $0x142] sm:$0xf]  ;;  %v598_v50 = vld [vmem:[#allocation2 + $0x153] sm:$0xf] }
 0x413   : > { %v5519_v30 = vld [vmem:[#allocation4 + $0x16] sm:$0xff]  ;;  %v2928_v56 = vpack.c.bf16 %v5515_v27, %v5480_v60  ;;  %3068 = vrot.lane.b32.xlu0 %v2972_v28, %s4424_s11  ;;  %v552_v51 = vpack.c.bf16 %v531_v24, %v531_v24  ;;  %v4346_v28 = vld [vmem:[%s5742_s3 + $0x10] sm:$0xff]   ;;  %v619_v31 = vpack.c.bf16 %v598_v50, %v598_v50 }
 0x414   : > { %v2985_v3 = vpack.c.bf16 %v5519_v30, %v5517_v29  ;;  %3077 = vrot.lane.b32.xlu1 %v2980_v53, %s4427_s6  ;;  %v4167_v32 = vpop.f32.mrf.mxu1  ;;  %v2915_v36 = vld [vmem:[#allocation6 + $0x51] ss:$2 sm:$0xf]  ;;  %v557_v53 = vpack.c.bf16 %v555_v52, %v555_v52  ;;  %4244 = vmatpush3.bf16.msra.mxu0 %v4346_v28  ;;  %v4347_v29 = vld [vmem:[%s5742_s3 + $0x8] sm:$0xff]  }
 0x415   : > { %v660_v32 = vld [vmem:[#allocation2 + $0x154] sm:$0xf]  ;;  %4245 = vmatprep.subr.bf16.mxu0 %v4415_v0 }
 0x416   : > { %v2815_v37 = vpop.f32.mrf.mxu1  ;;  %v681_v34 = vpack.c.bf16 %v660_v32, %v660_v32 }
 0x417   : > { %v2917_v38 = vld [vmem:[#allocation6 + $0x52] ss:$2 sm:$0xf] }
 0x418   : > { %v2919_v40 = vmax.f32 %v2915_v36, %v2917_v38  ;;  %v4168_v42 = vpop.f32.mrf.mxu1  ;;  %v686_v36 = vpack.c.bf16 %v684_v33, %v684_v33  ;;  %v727_v37 = vld [vmem:[#allocation2 + $0x165] sm:$0xf]  ;;  %4246 = vmatpush3.bf16.msra.mxu0 %v4347_v29 }
 0x419   : > { %v789_v38 = vld [vmem:[#allocation2 + $0x166] sm:$0xf]  ;;  %4247 = vmatprep.subr.bf16.mxu0 %v4415_v0 }
 0x41a   : > { %v2920_v44 = vmax.f32 %v2918_v39, %v2919_v40  ;;  %v748_v39 = vpack.c.bf16 %v727_v37, %v727_v37  ;;  %v810_v40 = vpack.c.bf16 %v789_v38, %v789_v38  ;;  %v2955_v42 = vld [vmem:[#allocation4 + $0xf] sm:$0xff] }
 0x41c   : > { %2921 = vst.msk [vmem:[#allocation4 + $0x20] sm:$0xf] %vm2864_vm1, %v2920_v44 }
 0x423   : > { %v2969_v41 = vld [vmem:[#allocation4 + $0x1c] sm:$0xff] }
 0x424   : > { %v2962_v49 = vld [vmem:[#allocation4 + $0x20] sm:$0xff]  ;;  %v2973_v57 = vpack.c.bf16 %v2970_v47, %v2969_v41 }
 0x425   : > { %v2965_v43 = vpack.c.bf16 %v2962_v49, %v5515_v27  ;;  %v2977_v58 = vld [vmem:[#allocation4 + $0x1d] sm:$0xff]  ;;  %v2954_v47 = vld [vmem:[#allocation4 + $0x7] sm:$0xff] }
 0x426   : > { %3070 = vrot.lane.b32.xlu1 %v2973_v57, %s4424_s11  ;;  %v2981_v62 = vpack.c.bf16 %v2978_v2, %v2977_v58  ;;  %v2933_v14 = vld [vmem:[#allocation4 + $0x19] sm:$0xff]  ;;  %v2934_v18 = vld [vmem:[#allocation4 + $0x21] sm:$0xf]  ;;  %v2959_v41 = vpack.c.bf16 %v2955_v42, %v2954_v47 }
 0x427   : > { %3061 = vrot.lane.b32.xlu0 %v2965_v43, %s4418_s23  ;;  %v2936_v15 = vpack.c.bf16 %v2933_v14, %v2932_v9  ;;  %v2941_v16 = vld [vmem:[#allocation4 + $0x1a] sm:$0xff]  ;;  %v2942_v19 = vld [vmem:[#allocation4 + $0x22] sm:$0xf]  ;;  %v2937_v25 = vpack.c.bf16 %v2934_v18, %v2934_v18  ;;  %v4335_v43 = vld [vmem:[%s5740_s1 + $0xf8] sm:$0xff]  }
 0x428   : > { %v5538_v46 = vld [vmem:[#allocation4 + $0x1e] sm:$0xff]  ;;  %v2944_v17 = vpack.c.bf16 %v2941_v16, %v2940_v26  ;;  %v2945_v20 = vpack.c.bf16 %v2942_v19, %v2942_v19  ;;  %v4342_v18 = vld [vmem:[%s5740_s1 + $0xc0] sm:$0xff]  }
 0x429   : > { %v2952_v63 = vpack.c.bf16 %v5538_v46, %v5519_v30  ;;  %v4341_v16 = vld [vmem:[%s5740_s1 + $0xc8] sm:$0xff]   ;;  %v4348_v30 = vld [vmem:[%s5742_s3] sm:$0xff]  }
 0x42a   : > { %3063 = vrot.lane.b32.xlu1 %v2966_v61, %s4418_s23  ;;  %v4336_v61 = vld [vmem:[%s5740_s1 + $0xf0] sm:$0xff]   ;;  %4248 = vmatpush3.bf16.msra.mxu0 %v4348_v30 }
 0x42b   : > { %3079 = vrot.lane.b32.xlu0 %v2981_v62, %s4427_s6  ;;  %v2957_v62 = vld [vmem:[#allocation4 + $0x1f] sm:$0xff]  ;;  %4253 = vmatprep.subr.bf16.mxu0 %v4415_v0 }
 0x42e   : > { %3081 = vrot.lane.b32.xlu1 %v2982_v6, %s4427_s6  ;;  %v4339_v6 = vld [vmem:[%s5740_s1 + $0xd8] sm:$0xff]  }
 0x42f   : > { %3072 = vrot.lane.b32.xlu0 %v2974_v35, %s4424_s11  ;;  %v2956_v35 = vld [vmem:[#allocation4 + $0x17] sm:$0xff] }
 0x430   : > { %v2960_v7 = vpack.c.bf16 %v2957_v62, %v2956_v35 }
 0x432   : > { %3000 = vrot.lane.b32.xlu1 %v2943_v11, %s4424_s11 }
 0x433   : > { %2991 = vrot.lane.b32.xlu0 %v2935_v12, %s4418_s23  ;;  %v4340_v12 = vld [vmem:[%s5740_s1 + $0xd0] sm:$0xff]  }
 0x436   : > { %2993 = vrot.lane.b32.xlu1 %v2936_v15, %s4418_s23 }
 0x437   : > { %3009 = vrot.lane.b32.xlu0 %v2951_v45, %s4427_s6 }
 0x43a   : > { %3011 = vrot.lane.b32.xlu1 %v2952_v63, %s4427_s6 }
 0x43b   : > { %3002 = vrot.lane.b32.xlu0 %v2944_v17, %s4424_s11 }
 0x43e   : > { %3004 = vrot.lane.b32.xlu1 %v2945_v20, %s4424_s11 }
 0x43f   : > { %2995 = vrot.lane.b32.xlu0 %v2937_v25, %s4418_s23 }
 0x442   : > { %872 = vrot.lane.b32.xlu1 %v490_v55, %s4417_s17  ;;  %v4343_v55 = vld [vmem:[%s5740_s1 + $0x148] sm:$0xff]  }
 0x443   : > { %3013 = vrot.lane.b32.xlu0 %v2953_v21, %s4427_s6 }
 0x446   : > { %979 = vrot.lane.b32.xlu1 %v557_v53, %s4416_s16  ;;  %s215_s16 = sand.u32 1, %s4405_s19  }
 0x447   : > { %935 = vrot.lane.b32.xlu0 %v552_v51, %s4419_s30  ;;  %s3834_s30 = sshll.u32 %s4480_s22, 4  ;;  %s3626_s26 = scalar_lea.sflag [#allocation9], %s215_s16 }
 0x448   : > { %s5698_s6 = scalar_lea.hbm %s5744_s5, %s3834_s30  ;;  %s4428_s22 = smov [#allocation8]  }
 0x449   : > { %s4357_s15 = sshll.u32 %s4428_s22, 4  ;;  %s4358_s15 = int_to_ptr.vmem [resolvable:$false] %s4357_s15 }
 0x44a   : > { %1105 = vrot.lane.b32.xlu1 %v681_v34, %s4421_s8  ;;  %v2926_v34 = vld [vmem:[#allocation4 + $0x20] sm:$0xf]  ;;  %s216_s8 = scalar_lea.vmem [#allocation8], %s215_s16  ;;  %s4359_s7 = scalar_lea.vmem %s4358_s15, 32 }
 0x44b   : > { %1042 = vrot.lane.b32.xlu0 %v619_v31, %s4418_s23  ;;  %v2929_v37 = vpack.c.bf16 %v2926_v34, %v2926_v34 }
 0x44e   : > { %1212 = vrot.lane.b32.xlu1 %v748_v39, %s4423_s10 }
 0x44f   : > { %1149 = vrot.lane.b32.xlu0 %v686_v36, %s4422_s9  ;;  %s3638_s9 = sshll.u32 %s216_s8, 4  ;;  %s5700_s9 = int_to_ptr.vmem [resolvable:$true] %s3638_s9 }
 0x450   : > { %s4353_s14 = scalar_lea.vmem %s5700_s9, 16  ;;  %p4360_p0 = scmp.lt.s32.totalorder %s5700_s9, %s4358_s15 }
 0x451   : > { %p4354_p11 = scmp.ne.s32.totalorder %s5700_s9, %s4353_s14  ;;  %p4361_p1 = scmp.lt.s32.totalorder %s4359_s7, %s4353_s14 }
 0x453   : > { %1275 = vrot.lane.b32.xlu0 %v810_v40, %s4424_s11  ;;  %p4355_p12 = pnand %p4354_p11, %p4497_p5  ;;  %p4362_p2 = por %p4361_p1, %p4360_p0 }
 0x455   : > { %p4356_p13 = pneg %p4355_p12 }
 0x457   : > { %p4363_p3 = pnand %p4362_p2, %p4356_p13 }
 0x459   : > { %v3060_v44 = vpop.permute.xlu1 %3059 }
 0x45a   : > { %v3085_v49 = vsel %vm1426_vm3, %v2959_v41, %v3060_v44  ;;  %v2984_v44 = vld [vmem:[#allocation4 + $0x2e] sm:$0xf] }
 0x45b   : > { %v2987_v47 = vpack.c.bf16 %v2984_v44, %v2984_v44 }
 0x485   : > { %v3069_v54 = vpop.permute.xlu0 %3068 }
 0x486   : > { %v3078_v57 = vpop.permute.xlu1 %3077  ;;  %v3093_v58 = vsel %vm1598_vm9, %v3085_v49, %v3069_v54 }
 0x487   : > { %v3099_v2 = vsel %vm2510_vm13, %v3093_v58, %v3078_v57 }
 0x488   : > { %4186 = vmatmul.mubr.bf16.vlgmr.msra.gmra.mxu1 %v3099_v2 }
 0x489   : > { %4198 = vmatpush3.bf16.msra.mxu1 %v4335_v43  ;;  %4189 = vmatprep.mubr.msk.bf16.mxu1 %vm4420_vm4, %v4415_v0 }
 0x48a   : > { %4199 = vmatprep.subr.bf16.mxu1 %v4415_v0 }
 0x48d   : > { %4200 = vmatpush3.bf16.msra.mxu1 %v4336_v61 }
 0x48e   : > { %4201 = vmatprep.subr.bf16.mxu1 %v4415_v0 }
 0x491   : > { %4202 = vmatpush3.bf16.msra.mxu1 %v4337_v4 }
 0x492   : > { %4203 = vmatprep.subr.bf16.mxu1 %v4415_v0 }
 0x495   : > { %4204 = vmatpush3.bf16.msra.mxu1 %v4338_v5 }
 0x496   : > { %4205 = vmatprep.subr.bf16.mxu1 %v4415_v0 }
 0x498   : > { %v3071_v1 = vpop.permute.xlu1 %3070 }
 0x499   : > { %v3062_v8 = vpop.permute.xlu0 %3061  ;;  %4206 = vmatpush3.bf16.msra.mxu1 %v4339_v6 }
 0x49a   : > { %v3088_v11 = vsel %vm1426_vm3, %v2960_v7, %v3062_v8  ;;  %4207 = vmatprep.subr.bf16.mxu1 %v4415_v0 }
 0x49b   : > { %v3095_v45 = vsel %vm1598_vm9, %v3088_v11, %v3071_v1 }
 0x49c   : > { %v3064_v14 = vpop.permute.xlu1 %3063 }
 0x49d   : > { %v3080_v9 = vpop.permute.xlu0 %3079  ;;  %4208 = vmatpush3.bf16.msra.mxu1 %v4340_v12  ;;  %v3091_v26 = vsel %vm1426_vm3, %v2961_v13, %v3064_v14 }
 0x49e   : > { %v3102_v15 = vsel %vm2510_vm13, %v3095_v45, %v3080_v9  ;;  %4209 = vmatprep.subr.bf16.mxu1 %v4415_v0 }
 0x49f   : > { %4190 = vmatmul.mubr.bf16.gmra.mxu1 %v3102_v15 }
 0x4a0   : > { %4193 = vmatprep.mubr.msk.bf16.mxu1 %vm4420_vm4, %v4415_v0  ;;  %v3082_v17 = vpop.permute.xlu1 %3081 }
 0x4a1   : > { %v3073_v63 = vpop.permute.xlu0 %3072  ;;  %4210 = vmatpush3.bf16.msra.mxu1 %v4341_v16 }
 0x4a2   : > { %v3097_v19 = vsel %vm1598_vm9, %v3091_v26, %v3073_v63  ;;  %4211 = vmatprep.subr.bf16.mxu1 %v4415_v0 }
 0x4a3   : > { %v3105_v20 = vsel %vm2510_vm13, %v3097_v19, %v3082_v17 }
 0x4a4   : > { %v3001_v21 = vpop.permute.xlu1 %3000 }
 0x4a5   : > { %v2992_v25 = vpop.permute.xlu0 %2991  ;;  %4212 = vmatpush3.bf16.msra.mxu1 %v4342_v18 }
 0x4a6   : > { %4225 = vmatprep.subr.bf16.mxu1 %v4415_v0  ;;  %v3017_v24 = vsel %vm1426_vm3, %v2927_v22, %v2992_v25 }
 0x4a7   : > { %4194 = vmatmul.mubr.bf16.gmra.mxu1 %v3105_v20  ;;  %v3025_v51 = vsel %vm1598_vm9, %v3017_v24, %v3001_v21 }
 0x4a8   : > { %4213 = vmatprep.mubr.msk.bf16.mxu1 %vm4420_vm4, %v4415_v0  ;;  %v2994_v52 = vpop.permute.xlu1 %2993 }
 0x4a9   : > { %v3010_v23 = vpop.permute.xlu0 %3009  ;;  %v3020_v53 = vsel %vm1426_vm3, %v2928_v56, %v2994_v52  ;;  %v2983_v56 = vld [vmem:[#allocation4 + $0x26] sm:$0xff] }
 0x4aa   : > { %v3031_v50 = vsel %vm2510_vm13, %v3025_v51, %v3010_v23  ;;  %v2986_v42 = vpack.c.bf16 %v2983_v56, %v5538_v46  ;;  %v407_v46 = vld [vmem:[#allocation2 + $0x140] sm:$0xf] }
 0x4ab   : > { %v428_v49 = vpack.c.bf16 %v407_v46, %v407_v46 }
 0x4ac   : > { %v3012_v32 = vpop.permute.xlu1 %3011 }
 0x4ad   : > { %v3003_v28 = vpop.permute.xlu0 %3002 }
 0x4ae   : > { %v3027_v31 = vsel %vm1598_vm9, %v3020_v53, %v3003_v28 }
 0x4af   : > { %4214 = vmatmul.mubr.bf16.vlgmr.msra.gmra.mxu1 %v3031_v50  ;;  %v3034_v36 = vsel %vm2510_vm13, %v3027_v31, %v3012_v32 }
 0x4b0   : > { %4226 = vmatpush3.bf16.msra.mxu1 %v4343_v55  ;;  %4217 = vmatprep.mubr.msk.bf16.mxu1 %vm4420_vm4, %v4415_v0  ;;  %v3005_v39 = vpop.permute.xlu1 %3004 }
 0x4b1   : > { %4227 = vmatprep.subr.bf16.mxu1 %v4415_v0  ;;  %v2996_v33 = vpop.permute.xlu0 %2995 }
 0x4b2   : > { %v3023_v38 = vsel %vm1426_vm3, %v2929_v37, %v2996_v33 }
 0x4b3   : > { %v3029_v60 = vsel %vm1598_vm9, %v3023_v38, %v3005_v39 }
 0x4b4   : > { %4228 = vmatpush3.bf16.msra.mxu1 %v4344_v59  ;;  %v3820_v59 = vld [vmem:[%s5741_s2 + $0x2] ss:$0 sm:$0xff] }
 0x4b5   : > { %v3014_v40 = vpop.permute.xlu0 %3013 }
 0x4b6   : > { %v3037_v27 = vsel %vm2510_vm13, %v3029_v60, %v3014_v40 }
 0x4b7   : > { %4218 = vmatmul.mubr.bf16.gmra.mxu1 %v3034_v36 }
 0x4b8   : > { %4221 = vmatprep.mubr.msk.bf16.mxu1 %vm4420_vm4, %v4415_v0 }
 0x4b9   : > { %v936_v41 = vpop.permute.xlu0 %935 }
 0x4bd   : > { %v1043_v58 = vpop.permute.xlu0 %1042 }
 0x4bf   : > { %4222 = vmatmul.mubr.bf16.gmra.mxu1 %v3037_v27 }
 0x4c0   : > { %4229 = vmatprep.mubr.msk.bf16.mxu1 %vm4420_vm4, %v4415_v0 }
 0x4c1   : > { %v1150_v62 = vpop.permute.xlu0 %1149 }
 0x4c5   : > { %v1276_v1 = vpop.permute.xlu0 %1275 }
 0x4c7   : > { %4230 = vmatmul.mubr.msk.bf16.vlgmr.msra.gmra.mxu1 %vm1426_vm3, %v2985_v3  ;;  %v873_v3 = vpop.permute.xlu1 %872 }
 0x4c8   : > { %4233 = vmatprep.mubr.msk.bf16.mxu1 %vm4420_vm4, %v4415_v0  ;;  %v1339_v54 = vsel %vm223_vm0, %v428_v49, %v873_v3  ;;  %vm3454_vm0 = vcmask 517120  }
 0x4c9   : > { %v1382_v43 = vsel %vm1340_vm2, %v1339_v54, %v936_v41 }
 0x4cb   : > { %v980_v57 = vpop.permute.xlu1 %979 }
 0x4cc   : > { %v1425_v2 = vsel %vm1383_vm5, %v1382_v43, %v980_v57 }
 0x4cd   : > { %v1468_v61 = vsel %vm1426_vm3, %v1425_v2, %v1043_v58 }
 0x4cf   : > { %4234 = vmatmul.mubr.msk.bf16.gmra.mxu1 %vm1426_vm3, %v2986_v42  ;;  %v1106_v4 = vpop.permute.xlu1 %1105 }
 0x4d0   : > { %4237 = vmatprep.mubr.msk.bf16.mxu1 %vm4420_vm4, %v4415_v0  ;;  %v1511_v5 = vsel %vm1469_vm6, %v1468_v61, %v1106_v4 }
 0x4d1   : > { %v1554_v6 = vsel %vm1512_vm7, %v1511_v5, %v1150_v62 }
 0x4d3   : > { %v1213_v35 = vpop.permute.xlu1 %1212 }
 0x4d4   : > { %v1597_v7 = vsel %vm1555_vm8, %v1554_v6, %v1213_v35 }
 0x4d5   : > { %v1640_v8 = vsel %vm1598_vm9, %v1597_v7, %v1276_v1 }
 0x4d6   : > { %4092 = vmatmul.mubr.msk.bf16.gmra.mxu0 %vm1684_vm10, %v1640_v8 }
 0x4d7   : > { %4238 = vmatmul.mubr.msk.bf16.gmra.mxu1 %vm1426_vm3, %v2987_v47  ;;  %4249 = vmatprep.mubr.msk.bf16.mxu0 %vm4420_vm4, %v4415_v0 }
 0x548   : > { %v3206_v10 = vpop.f32.mrf.mxu1 }
 0x54a   : > { %v4187_v11 = vpop.f32.mrf.mxu1 }
 0x54c   : > { %v3209_v12 = vpop.f32.mrf.mxu1 }
 0x54e   : > { %v4188_v13 = vpop.f32.mrf.mxu1 }
 0x55f   : > { %v3214_v14 = vpop.f32.mrf.mxu1 }
 0x561   : > { %v4191_v9 = vpop.f32.mrf.mxu1 }
 0x563   : > { %v3217_v45 = vpop.f32.mrf.mxu1 }
 0x565   : > { %v4192_v15 = vpop.f32.mrf.mxu1 }
 0x567   : > { %v3222_v16 = vpop.f32.mrf.mxu1 }
 0x569   : > { %v4195_v26 = vpop.f32.mrf.mxu1 }
 0x56b   : > { %v3225_v17 = vpop.f32.mrf.mxu1 }
 0x56d   : > { %v4196_v63 = vpop.f32.mrf.mxu1 }
 0x56f   : > { %v3310_v18 = vpop.f32.mrf.mxu1 }
 0x570   : > { %v3311_v50 = vadd.f32 %v3310_v18, %v3206_v10 }
 0x571   : > { %v4215_v19 = vpop.f32.mrf.mxu1 }
 0x573   : > { %v3313_v48 = vpop.f32.mrf.mxu1 }
 0x574   : > { %v3314_v32 = vadd.f32 %v3313_v48, %v3209_v12 }
 0x575   : > { %v4216_v25 = vpop.f32.mrf.mxu1 }
 0x577   : > { %v3318_v20 = vpop.f32.mrf.mxu1 }
 0x578   : > { %v3319_v39 = vadd.f32 %v3318_v20, %v3214_v14 }
 0x579   : > { %v4219_v21 = vpop.f32.mrf.mxu1 }
 0x57b   : > { %v3321_v22 = vpop.f32.mrf.mxu1 }
 0x57c   : > { %v3322_v44 = vadd.f32 %v3321_v22, %v3217_v45 }
 0x57d   : > { %v4220_v23 = vpop.f32.mrf.mxu1 }
 0x57f   : > { %v3326_v24 = vpop.f32.mrf.mxu1 }
 0x580   : > { %v4349_v24 = vld [vmem:[%s5742_s3 + $0x48] sm:$0xff]  }
 0x581   : > { %v4223_v55 = vpop.f32.mrf.mxu1 }
 0x583   : > { %v3329_v51 = vpop.f32.mrf.mxu1 }
 0x585   : > { %v4224_v52 = vpop.f32.mrf.mxu1 }
 0x587   : > { %v3392_v28 = vpop.f32.mrf.mxu1 }
 0x588   : > { %v3414_v53 = vadd.f32 %v3392_v28, %v3311_v50 }
 0x589   : > { %v4231_v31 = vpop.f32.mrf.mxu1 }
 0x58a   : > { %v3427_v33 = vadd.f32 %v3820_v59, %v3414_v53  ;;  %v3492_v53 = vld [vmem:[%s5743_s4] sm:$0x1] }
 0x58b   : > { %v3395_v34 = vpop.f32.mrf.mxu1 }
 0x58c   : > { %v3432_v36 = vmax.f32 %v3427_v33, 0.0  ;;  %v3415_v37 = vadd.f32 %v3395_v34, %v3314_v32 }
 0x58d   : > { %v4232_v38 = vpop.f32.mrf.mxu1 }
 0x58e   : > { %3437 = vst.msk [vmem:[#allocation7] sm:$0xff] %vm1598_vm9, %v3432_v36  ;;  %v3428_v40 = vadd.f32 %v3820_v59, %v3415_v37  ;;  %v3830_v38 = vld [vmem:[%s5743_s4 + $0x1] sm:$0x1] }
 0x58f   : > { %v3400_v60 = vpop.f32.mrf.mxu1 }
 0x590   : > { %v3433_v27 = vmax.f32 %v3428_v40, 0.0  ;;  %v3416_v56 = vadd.f32 %v3400_v60, %v3319_v39 }
 0x591   : > { %v4235_v42 = vpop.f32.mrf.mxu1 }
 0x592   : > { %3438 = vst.msk [vmem:[#allocation7 + $0x8] sm:$0xff] %vm1598_vm9, %v3433_v27  ;;  %v3429_v47 = vadd.f32 %v3820_v59, %v3416_v56 }
 0x593   : > { %v3403_v29 = vpop.f32.mrf.mxu1 }
 0x594   : > { %v3434_v30 = vmax.f32 %v3429_v47, 0.0  ;;  %v3417_v3 = vadd.f32 %v3403_v29, %v3322_v44 }
 0x595   : > { %v4236_v46 = vpop.f32.mrf.mxu1 }
 0x596   : > { %3439 = vst.msk [vmem:[#allocation7 + $0x10] sm:$0xff] %vm1598_vm9, %v3434_v30  ;;  %v3430_v41 = vadd.f32 %v3820_v59, %v3417_v3  ;;  %v1925_v51 = vpop.f32.mrf.mxu0  ;;  %v4350_v59 = vld [vmem:[%s5742_s3 + $0x40] sm:$0xff]  }
 0x597   : > { %v3408_v49 = vpop.f32.mrf.mxu1 }
 0x598   : > { %v3435_v54 = vmax.f32 %v3430_v41, 0.0  ;;  %v4093_v52 = vpop.f32.mrf.mxu0 }
 0x599   : > { %v4239_v57 = vpop.f32.mrf.mxu1  ;;  %v3444_v43 = vld [vmem:[#allocation7 + $0x7] ss:$2 sm:$0x3]  ;;  %v3446_v58 = vld [vmem:[#allocation7 + $0x8] ss:$2 sm:$0x3] }
 0x59a   : > { %3440 = vst.msk [vmem:[#allocation7 + $0x18] sm:$0xff] %vm1598_vm9, %v3435_v54  ;;  %v3448_v61 = vld [vmem:[#allocation7 + $0xd] ss:$2 sm:$0x3]  ;;  %v3451_v62 = vmax.f32 %v3444_v43, %v3446_v58  ;;  %v1928_v50 = vpop.f32.mrf.mxu0 }
 0x59b   : > { %v3411_v2 = vpop.f32.mrf.mxu1 }
 0x59c   : > { %v4094_v28 = vpop.f32.mrf.mxu0 }
 0x59d   : > { %v3450_v4 = vld [vmem:[#allocation7 + $0xe] ss:$2 sm:$0x3]  ;;  %v4240_v5 = vpop.f32.mrf.mxu1  ;;  %v3464_v35 = vld [vmem:[#allocation7 + $0x13] ss:$2 sm:$0x3] }
 0x59e   : > { %v3452_v6 = vmax.f32 %v3448_v61, %v3450_v4  ;;  %v3466_v7 = vld [vmem:[#allocation7 + $0x14] ss:$2 sm:$0x3] }
 0x59f   : > { %v3471_v12 = vmax.f32 %v3464_v35, %v3466_v7 }
 0x5a0   : > { %v3453_v1 = vmax.f32 %v3451_v62, %v3452_v6 }
 0x5a1   : > { %v3468_v8 = vld [vmem:[#allocation7 + $0x19] ss:$2 sm:$0x3]  ;;  %v3470_v10 = vld [vmem:[#allocation7 + $0x1a] ss:$2 sm:$0x3] }
 0x5a2   : > { %v3455_v11 = vsel %vm3454_vm0, %v3453_v1, 0.0  ;;  %v3472_v13 = vmax.f32 %v3468_v8, %v3470_v10 }
 0x5a3   : > { %v3456_v14 = vrot.slane %v3455_v11, 4 }
 0x5a4   : > { %v3473_v9 = vmax.f32 %v3471_v12, %v3472_v13 }
 0x5a5   : > { %v3457_v45 = vadd.f32 %v3456_v14, %v3455_v11 }
 0x5a6   : > { %v3474_v15 = vsel %vm3454_vm0, %v3473_v9, 0.0 }
 0x5a7   : > { %v3458_v16 = vrot.slane %v3457_v45, 2  ;;  %v3475_v26 = vrot.slane %v3474_v15, 4 }
 0x5a9   : > { %v3459_v17 = vadd.f32 %v3458_v16, %v3457_v45  ;;  %v3476_v63 = vadd.f32 %v3475_v26, %v3474_v15 }
 0x5ab   : > { %v3477_v18 = vrot.slane %v3476_v63, 2  ;;  %v3460_v19 = vrot.slane %v3459_v17, 1 }
 0x5ad   : > { %v3478_v48 = vadd.f32 %v3477_v18, %v3476_v63  ;;  %v3461_v20 = vadd.f32 %v3460_v19, %v3459_v17 }
 0x5af   : > { %v3479_v25 = vrot.slane %v3478_v48, 1 }
 0x5b1   : > { %v3480_v21 = vadd.f32 %v3479_v25, %v3478_v48 }
 0x5b3   : > { %v3481_v22 = vadd.f32 %v3480_v21, %v3461_v20 }
 0x5b5   : > { %v3482_v23 = vmul.f32 0.25, %v3481_v22 }
 0x5b7   : > { %v3483_v55 = vpack.c.bf16 %v3482_v23, %v3482_v23 }
 0x5b9   : > { %4250 = vmatmul.mubr.msk.bf16.vlgmr.msra.gmra.mxu0 %vm1598_vm9, %v3483_v55 }
 0x5ba   : > { %4254 = vmatpush3.bf16.msra.mxu0 %v4349_v24  ;;  %4257 = vmatprep.mubr.msk.bf16.mxu0 %vm4420_vm4, %v4415_v0 }
 0x5bb   : > { %4255 = vmatprep.subr.bf16.mxu0 %v4415_v0 }
 0x5be   : > { %4256 = vmatpush3.bf16.msra.mxu0 %v4350_v59 }
 0x679   : > { %v3554_v31 = vpop.f32.mrf.mxu0 }
 0x67a   : > { %v3555_v32 = vadd.f32 %v3554_v31, %v3492_v53 }
 0x67b   : > { %v4251_v33 = vpop.f32.mrf.mxu0 }
 0x67c   : > { %v3560_v34 = vmax.f32 %v3555_v32, 0.0 }
 0x67d   : > { %v3557_v0 = vpop.f32.mrf.mxu0 }
 0x67e   : > { %v3561_v36 = vpack.c.bf16 %v3560_v34, %v3560_v34 }
 0x67f   : > { %v4252_v37 = vpop.f32.mrf.mxu0 }
 0x680   : > { %4258 = vmatmul.mubr.msk.bf16.vlgmr.msra.gmra.mxu0 %vm1426_vm3, %v3561_v36 }
 0x740   : > { %v3618_v39 = vpop.f32.mrf.mxu0 }
 0x741   : > { %v3619_v40 = vadd.f32 %v3830_v38, %v3618_v39 }
 0x742   : > { %v4259_v60 = vpop.f32.mrf.mxu0 }
 0x743   : > { %3624 = vst [vmem:[%s216_s8] sm:$0x1] %v3619_v40 }
 0x744   : > { %v3621_v27 = vpop.f32.mrf.mxu0 }
 0x745   : > { %4366 = shalt.err (!%p4363_p3)
}
 0x746   : > { %s4367_s12 = scalar_lea.hbm %s5698_s6, 16  ;;  %s4371_s16 = scalar_lea.hbm %s5744_s5, 32 }
 0x747   : > { %p4368_p4 = scmp.ne.s32.totalorder %s5698_s6, %s4367_s12  ;;  %p4372_p9 = scmp.lt.s32.totalorder %s5698_s6, %s5744_s5 }
 0x748   : > { %p4373_p10 = scmp.lt.s32.totalorder %s4371_s16, %s4367_s12 }
 0x749   : > { %p4369_p7 = pnand %p4368_p4, %p4497_p5 }
 0x74a   : > { %p4374_p11 = por %p4373_p10, %p4372_p9 }
 0x74b   : > { %p4370_p8 = pneg %p4369_p7 }
 0x74d   : > { %p4375_p12 = pnand %p4374_p11, %p4370_p8 }
 0x74f   : > { %4378 = shalt.err (!%p4375_p12)
}
 0x750   : > { %4261 = dma.vmem_to_hbm [thread:$0]  (%p4497_p5), %s5700_s9, 16, %s5698_s6, %s3626_s26   ;;  %v4260_v56 = vpop.f32.mrf.mxu0 }
 0x751 PF: > { %p4267_p13 = scmp.ge.s32.totalorder %s4413_s21, 2  ;;  %s3650_s30 = sand.u32 1, %s4401_s18  }
 0x752   : > { %s3651_s8 = scalar_lea.sflag [#allocation9], %s3650_s30 }
 0x753   : > { %p4264_p0 = pnand %p4267_p13, %p4501_p6 }
 0x755   : > { %p4265_p1 = pneg %p4264_p0 }
 0x757   : > { %4396 = dma.done.wait (%p4265_p1), %s3651_s8, 16  }
 0x758   : > { %4398 = vsyncadd (%p4265_p1), %s3651_s8, 4294967280  ;;  %p15_p2 = scmp.ge.s32.totalorder %s4484_s24, 4   ;;  %s5747_s18 = smov %s4405_s19 }
 0x759   : > { %s5748_s19 = smov %s4409_s20  ;;  %s5749_s20 = smov %s4495_s27 }
 0x75a   : > { %s5750_s21 = smov %s4484_s24  ;;  %17 = sbr.rel (!%p15_p2) target bundleno = 3 (0x3), region = 140 }
 0x75f   :  { %3655 = vsyncpa [#allocation9], 1 }
 0x760   :  { %3657 = vsyncpa [#allocation9 + $0x1], 1 }

</bundles_post_ra>
